<compile_context>
chip_gen: v5e
topology: v5e:2x2
jax: 0.10.0
libtpu: 0.0.40
codegen_flags: <defaults>
</compile_context>

<pallas_src>
import functools
import math

import jax
import jax.numpy as jnp
import numpy as np
from jax import lax
from jax.experimental import pallas as pl
from jax.experimental.pallas import tpu as pltpu

MM_DTYPE = jnp.bfloat16   # matmul operand dtype (f32 accumulation everywhere)


def _mm(a, b):
    """MXU matmul: bf16 operands, f32 accumulation."""
    return jnp.dot(a.astype(MM_DTYPE), b.astype(MM_DTYPE),
                   preferred_element_type=jnp.float32)


# ----------------------------------------------------------------------------
# The single fused kernel.
# ----------------------------------------------------------------------------
def _amip_fused_kernel(x_ref, w_ref, fc1_ref, fc2_ref, m_ref, o_ref,
                       h1_scr, h2_scr, fc_scr, *,
                       B, L, K, chans, num_hidden, num_heads, use_ds,
                       woff, moff):
    f32 = jnp.float32
    BL = B * L
    E = L                      # attention embed dim (= feature_in)
    S = chans[-1]              # attention/LSTM sequence length (= num_channels[2])
    H = num_heads
    BS = B * S
    HBS = H * BS

    # per-column "position within sample" index, for causal masking
    t_idx = lax.broadcasted_iota(jnp.int32, (1, BL), 1) % L

    # ---------------- TCN stack: activations laid out as (C, B*L) -----------
    def causal_conv(h, c_in, c_out, wkey, bkey):
        hp = jnp.concatenate([jnp.zeros((c_in, K - 1), f32), h], axis=1)
        r0 = moff[bkey]
        out = m_ref[r0:r0 + c_out, 0:1]                       # (c_out, 1) bias
        for k in range(K):
            s = K - 1 - k                                     # causal shift
            hk = hp[:, k:k + BL]
            if s > 0:
                hk = jnp.where(t_idx >= s, hk, 0.0)           # kill cross-batch leak
            w0 = woff[f"{wkey}_{k}"]
            wk = w_ref[w0:w0 + c_out, 0:c_in]
            out = out + _mm(wk, hk)
        return out

    h = x_ref[...]                                            # (C_in0, B*L), f32
    for i in range(3):
        c_in, c_out = chans[i], chans[i + 1]
        h1 = jnp.maximum(causal_conv(h, c_in, c_out, f"tcn{i}_w1", f"tcn{i}_b1"), 0.0)
        h2 = jnp.maximum(causal_conv(h1, c_out, c_out, f"tcn{i}_w2", f"tcn{i}_b2"), 0.0)
        if use_ds[i]:
            w0 = woff[f"tcn{i}_wd"]
            r0 = moff[f"tcn{i}_bd"]
            res = _mm(w_ref[w0:w0 + c_out, 0:c_in], h) + m_ref[r0:r0 + c_out, 0:1]
        else:
            res = h
        h = jnp.maximum(h2 + res, 0.0)                        # (c_out, B*L)

    # ---------------- multi-head self-attention ------------------------------
    # batch-major rows: row b*S + s  (one small concat over B)
    x2 = jnp.concatenate([h[:, b * L:b * L + E] for b in range(B)], axis=0)  # (B*S, E)

    w0 = woff["attn_wqkv"]
    r0 = moff["attn_bqkv"]
    qkv = _mm(x2, w_ref[w0:w0 + E, 0:3 * E]) + m_ref[r0:r0 + 1, 0:3 * E]     # (B*S, 3E)
    q = qkv[:, 0:E]            # 1/sqrt(dh) scale folded into Wq at pack time
    k = qkv[:, E:2 * E]
    v = qkv[:, 2 * E:3 * E]

    r0 = moff["head_mask"]
    head_mask = m_ref[r0:r0 + HBS, 0:E]                      # 1s on head-h columns
    r0 = moff["batch_mask"]
    batch_mask = m_ref[r0:r0 + HBS, 0:BS]                    # 0 / -1e30 additive

    # rows stacked (h, b, s); head-masked queries against all keys of the batch
    q_t = jnp.concatenate([q] * H, axis=0) * head_mask       # (HBS, E)
    s_mat = _mm(q_t, k.T) + batch_mask                       # (HBS, B*S)
    s_mat = s_mat - jnp.max(s_mat, axis=-1, keepdims=True)
    p = jnp.exp(s_mat)                                       # one EUP launch
    p = p * pl.reciprocal(jnp.sum(p, axis=-1, keepdims=True), approx=True)
    c_st = _mm(p, v) * head_mask                             # (HBS, E)

    # head-sum + (b,s)->(s,b) reorder folded into one constant 0/1 matmul
    w0 = woff["attn_fold"]
    ctx_tm = _mm(w_ref[w0:w0 + S * B, 0:HBS], c_st)          # (S*B, E), time-major
    w0 = woff["attn_wo"]
    r0 = moff["attn_bo"]
    x_l = _mm(ctx_tm, w_ref[w0:w0 + E, 0:E]) + m_ref[r0:r0 + 1, 0:E]

    # ---------------- LSTM stack (hoisted input projections) -----------------
    out_scr = (h1_scr, h2_scr)
    for li in range(3):
        Hn = num_hidden[li]
        In = E if li == 0 else num_hidden[li - 1]
        w0 = woff[f"lstm{li}_wih"]
        wih = w_ref[w0:w0 + In, 0:4 * Hn]
        w0 = woff[f"lstm{li}_whh"]
        whh = w_ref[w0:w0 + Hn, 0:4 * Hn]
        r0 = moff[f"lstm{li}_b"]
        bias = m_ref[r0:r0 + 1, 0:4 * Hn]
        r0 = moff[f"lstm{li}_h0"]
        hs = m_ref[r0:r0 + B, 0:Hn]
        r0 = moff[f"lstm{li}_c0"]
        cs = m_ref[r0:r0 + B, 0:Hn]

        gx = _mm(x_l, wih) + bias                            # (S*B, 4H), order i,f,o | g
        for t in range(S):
            g = gx[t * B:(t + 1) * B, :] + _mm(hs, whh)      # (B, 4H)
            z = jax.nn.sigmoid(g[:, 0:3 * Hn])               # i | f | o in one launch
            gg = jnp.tanh(g[:, 3 * Hn:4 * Hn])
            cs = z[:, Hn:2 * Hn] * cs + z[:, 0:Hn] * gg
            hs = z[:, 2 * Hn:3 * Hn] * jnp.tanh(cs)
            if li < 2:
                out_scr[li][t * B:(t + 1) * B, 0:Hn] = hs
            else:
                # LSTM-3 written directly in PyTorch reshape(B, -1) layout
                fc_scr[0:B, t * Hn:(t + 1) * Hn] = hs
        if li < 2:
            x_l = out_scr[li][...]                           # (S*B, Hn)

    # ---------------- FC head (single matmuls, bias as appended row) ---------
    n_in = fc1_ref.shape[0] - 1
    y1 = _mm(fc_scr[...], fc1_ref[0:n_in, :]) + fc1_ref[n_in:n_in + 1, :].astype(f32)
    n_mid = fc2_ref.shape[0] - 1
    o_ref[...] = (_mm(y1, fc2_ref[0:n_mid, :])
                  + fc2_ref[n_mid:n_mid + 1, :].astype(f32))     # (B, L_out)


# ----------------------------------------------------------------------------
# Host-side parameter packing (runs once, outside jit).
# ----------------------------------------------------------------------------
def _pack_slab(entries, *, width, align):
    offs, blocks, off = {}, [], 0
    for key, arr in entries:
        arr = np.asarray(arr, np.float32)
        r, c = arr.shape
        assert c <= width, (key, arr.shape)
        rp = -(-r // align) * align
        blk = np.zeros((rp, width), np.float32)
        blk[:r, :c] = arr
        offs[key] = off
        blocks.append(blk)
        off += rp
    return np.concatenate(blocks, axis=0), offs


def pack_params(params, h0c0, *, length_in, feature_in, length_out, ker_size,
                num_channels, num_hidden, num_heads, batch_size):
    B, L, E, K = batch_size, feature_in, feature_in, ker_size
    S, H = num_channels[2], num_heads
    dh = E // H
    chans = [length_in] + list(num_channels)

    w_entries, m_entries, use_ds = [], [], []

    # --- TCNs: per-tap weight blocks, column-vector biases ---
    for i in range(3):
        t = params[f"tcn{i}"]
        c_out, c_in, _ = np.asarray(t["w1"]).shape
        w1 = np.asarray(t["w1"], np.float32)
        w2 = np.asarray(t["w2"], np.float32)
        for k in range(K):
            w_entries.append((f"tcn{i}_w1_{k}", w1[:, :, k]))
            w_entries.append((f"tcn{i}_w2_{k}", w2[:, :, k]))
        w_entries.append((f"tcn{i}_wd", np.asarray(t["wd"], np.float32)))
        m_entries.append((f"tcn{i}_b1", np.asarray(t["b1"], np.float32)))
        m_entries.append((f"tcn{i}_b2", np.asarray(t["b2"], np.float32)))
        m_entries.append((f"tcn{i}_bd", np.asarray(t["bd"], np.float32)))
        use_ds.append(bool(c_in != c_out))

    # --- attention: fused QKV (Wq pre-scaled), fold matrix, masks ---
    a = params["attn"]
    scale = 1.0 / math.sqrt(dh)
    wqkv = np.concatenate([np.asarray(a["wq"], np.float32) * scale,
                           np.asarray(a["wk"], np.float32),
                           np.asarray(a["wv"], np.float32)], axis=1)
    bqkv = np.concatenate([np.asarray(a["bq"], np.float32) * scale,
                           np.asarray(a["bk"], np.float32),
                           np.asarray(a["bv"], np.float32)], axis=1)
    w_entries.append(("attn_wqkv", wqkv))
    w_entries.append(("attn_wo", np.asarray(a["wo"], np.float32)))
    m_entries.append(("attn_bqkv", bqkv))
    m_entries.append(("attn_bo", np.asarray(a["bo"], np.float32)))

    HBS = H * B * S
    fold = np.zeros((S * B, HBS), np.float32)        # head-sum + (b,s)->(s,b)
    head_mask = np.zeros((HBS, E), np.float32)
    batch_mask = np.full((HBS, B * S), -1e30, np.float32)
    for h in range(H):
        head_mask[h * B * S:(h + 1) * B * S, h * dh:(h + 1) * dh] = 1.0
        for b in range(B):
            batch_mask[h * B * S + b * S:h * B * S + (b + 1) * S,
                       b * S:(b + 1) * S] = 0.0
            for s in range(S):
                fold[s * B + b, h * B * S + b * S + s] = 1.0
    w_entries.append(("attn_fold", fold))
    m_entries.append(("head_mask", head_mask))
    m_entries.append(("batch_mask", batch_mask))

    # --- LSTMs: gate columns reordered (i,f,g,o) -> (i,f,o,g) ---
    def reorder(w, Hn):
        w = np.asarray(w, np.float32)
        return np.concatenate([w[..., 0:Hn], w[..., Hn:2 * Hn],
                               w[..., 3 * Hn:4 * Hn], w[..., 2 * Hn:3 * Hn]], axis=-1)

    for i in range(3):
        lp = params[f"lstm{i}"]
        Hn = num_hidden[i]
        w_entries.append((f"lstm{i}_wih", reorder(lp["wih"], Hn)))
        w_entries.append((f"lstm{i}_whh", reorder(lp["whh"], Hn)))
        m_entries.append((f"lstm{i}_b", reorder(lp["b"], Hn)))
        h0, c0 = h0c0[i]
        m_entries.append((f"lstm{i}_h0", np.asarray(h0, np.float32)))
        m_entries.append((f"lstm{i}_c0", np.asarray(c0, np.float32)))

    w_slab, woff = _pack_slab(w_entries, width=128, align=16)
    m_slab, moff = _pack_slab(m_entries, width=128, align=8)

    # --- FC head: bias appended as an extra weight row ---
    f = params["fc"]
    fc1 = np.concatenate([np.asarray(f["w1"], np.float32),
                          np.asarray(f["b1"], np.float32)], axis=0)
    fc2 = np.concatenate([np.asarray(f["w2"], np.float32),
                          np.asarray(f["b2"], np.float32)], axis=0)

    packed = dict(
        w_slab=jnp.asarray(w_slab, dtype=MM_DTYPE),
        fc1=jnp.asarray(fc1, dtype=MM_DTYPE),
        fc2=jnp.asarray(fc2, dtype=MM_DTYPE),
        misc=jnp.asarray(m_slab, dtype=jnp.float32),
    )
    cfg = dict(B=B, L=L, K=K, chans=tuple(chans), num_hidden=tuple(num_hidden),
               num_heads=H, length_out=length_out, use_ds=tuple(use_ds),
               woff=woff, moff=moff)
    return packed, cfg


# ----------------------------------------------------------------------------
# Wrapper: single pallas_call, no grid, everything resident in VMEM.
# ----------------------------------------------------------------------------
def make_forward(cfg):
    B, L, Lout = cfg["B"], cfg["L"], cfg["length_out"]
    S = cfg["chans"][-1]
    nh = cfg["num_hidden"]

    kern = functools.partial(
        _amip_fused_kernel,
        B=B, L=L, K=cfg["K"], chans=cfg["chans"], num_hidden=nh,
        num_heads=cfg["num_heads"], use_ds=cfg["use_ds"],
        woff=cfg["woff"], moff=cfg["moff"])

    vmem = pl.BlockSpec(memory_space=pltpu.MemorySpace.VMEM)
    call = pl.pallas_call(
        kern,
        out_shape=jax.ShapeDtypeStruct((B, Lout), jnp.float32),
        in_specs=[vmem] * 5,
        out_specs=vmem,
        scratch_shapes=[
            pltpu.VMEM((S * B, nh[0]), jnp.float32),   # LSTM-1 outputs (time-major)
            pltpu.VMEM((S * B, nh[1]), jnp.float32),   # LSTM-2 outputs (time-major)
            pltpu.VMEM((B, S * nh[2]), jnp.float32),   # LSTM-3 outputs, FC layout
        ],
    )

    @jax.jit
    def forward(x, w_slab, fc1, fc2, misc):
        c_in0 = x.shape[1]
        # (B, C, L) -> (C, B*L): batch folded into the matmul free dimension.
        x_cbl = jnp.transpose(x, (1, 0, 2)).reshape(c_in0, B * L).astype(jnp.float32)
        out = call(x_cbl, w_slab, fc1, fc2, misc)
        return out.reshape(B, Lout, 1)

    return forward


# ----------------------------------------------------------------------------
# Deterministic synthetic parameters (PyTorch-like layouts).
# ----------------------------------------------------------------------------
def make_params(rng, *, length_in, feature_in, length_out, ker_size,
                num_channels, num_hidden):
    def nrm(*shape, s=0.1):
        return (s * rng.standard_normal(shape)).astype(np.float32)

    p = {}
    chans = [length_in] + list(num_channels)
    for i in range(3):
        c_in, c_out = chans[i], chans[i + 1]
        p[f"tcn{i}"] = dict(w1=nrm(c_out, c_in, ker_size), b1=nrm(c_out, 1),
                            w2=nrm(c_out, c_out, ker_size), b2=nrm(c_out, 1),
                            wd=nrm(c_out, c_in), bd=nrm(c_out, 1))
    E = feature_in
    p["attn"] = dict(wq=nrm(E, E), bq=nrm(1, E), wk=nrm(E, E), bk=nrm(1, E),
                     wv=nrm(E, E), bv=nrm(1, E), wo=nrm(E, E), bo=nrm(1, E))
    ins = [feature_in, num_hidden[0], num_hidden[1]]
    for i in range(3):
        Hn = num_hidden[i]
        p[f"lstm{i}"] = dict(wih=nrm(ins[i], 4 * Hn), whh=nrm(Hn, 4 * Hn),
                             b=nrm(1, 4 * Hn))
    fc_in = num_hidden[1] * num_hidden[2]
    p["fc"] = dict(w1=nrm(fc_in, 512), b1=nrm(1, 512),
                   w2=nrm(512, length_out), b2=nrm(1, length_out))
    return p


# ----------------------------------------------------------------------------
if __name__ == "__main__":
    B = 2
    length_in = 8            # seq_len of X_cont == Conv1d channels
    feature_in = 16          # features of X_cont == Conv1d length == attn embed dim
    ker_size = 3
    num_channels = [12, 10, 6]
    num_hidden = [16, 6, 8]
    num_heads = 4
    length_out = 5

    # fc1 expects num_hidden[1]*num_hidden[2] inputs; the LSTM stack produces
    # num_channels[2]*num_hidden[2] — the module's implicit invariant.
    assert num_channels[2] == num_hidden[1], "config invariant of AMIP_N"
    assert feature_in % num_heads == 0

    rng = np.random.default_rng(0)
    params = make_params(rng, length_in=length_in, feature_in=feature_in,
                         length_out=length_out, ker_size=ker_size,
                         num_channels=num_channels, num_hidden=num_hidden)
    # initial LSTM states (torch.randn in the module) — deterministic here
    h0c0 = [(rng.standard_normal((B, num_hidden[i])).astype(np.float32),
             rng.standard_normal((B, num_hidden[i])).astype(np.float32))
            for i in range(3)]

    packed, cfg = pack_params(params, h0c0,
                              length_in=length_in, feature_in=feature_in,
                              length_out=length_out, ker_size=ker_size,
                              num_channels=num_channels, num_hidden=num_hidden,
                              num_heads=num_heads, batch_size=B)

    fwd = make_forward(cfg)

    x = jax.random.normal(jax.random.PRNGKey(0), (B, length_in, feature_in),
                          dtype=jnp.float32)

    out = jax.block_until_ready(fwd(x, packed["w_slab"], packed["fc1"],
                                    packed["fc2"], packed["misc"]))
    assert out.shape == (B, length_out, 1)
    assert bool(jnp.all(jnp.isfinite(out)))
    print("KERNEL_OK")
</pallas_src>

<mosaic_0001>
module attributes {stable_mosaic.version = 11 : i64} {
  func.func @_amip_fused_kernel(%arg0: memref<8x32xf32, #tpu.memory_space<vmem>>, %arg1: memref<480x128xbf16, #tpu.memory_space<vmem>>, %arg2: memref<49x512xbf16, #tpu.memory_space<vmem>>, %arg3: memref<513x5xbf16, #tpu.memory_space<vmem>>, %arg4: memref<304x128xf32, #tpu.memory_space<vmem>>, %arg5: memref<2x5xf32, #tpu.memory_space<vmem>>, %arg6: memref<12x16xf32, #tpu.memory_space<vmem>>, %arg7: memref<12x6xf32, #tpu.memory_space<vmem>>, %arg8: memref<2x48xf32, #tpu.memory_space<vmem>>) attributes {dimension_semantics = [], scalar_prefetch = 0 : i64, scratch_operands = 3 : i64, tpu.core_type = #tpu.core_type<tc>} {
    %0 = tpu.iota {dimensions = array<i32: 1>} : vector<1x32xi32>
    %c16_i32 = arith.constant 16 : i32
    %c0_i32 = arith.constant 0 : i32
    %1 = arith.cmpi eq, %c16_i32, %c0_i32 : i32
    %c1_i32 = arith.constant 1 : i32
    %2 = arith.select %1, %c1_i32, %c16_i32 : i32
    %3 = vector.broadcast %2 : i32 to vector<1x32xi32>
    %4 = arith.remsi %0, %3 : vector<1x32xi32>
    %c0_i32_0 = arith.constant 0 : i32
    %5 = vector.broadcast %c0_i32_0 : i32 to vector<1x32xi32>
    %6 = arith.cmpi ne, %4, %5 : vector<1x32xi32>
    %c0_i32_1 = arith.constant 0 : i32
    %7 = vector.broadcast %c0_i32_1 : i32 to vector<1x32xi32>
    %8 = arith.cmpi slt, %4, %7 : vector<1x32xi32>
    %c0_i32_2 = arith.constant 0 : i32
    %9 = arith.cmpi slt, %2, %c0_i32_2 : i32
    %10 = vector.broadcast %9 : i1 to vector<1x32xi1>
    %11 = vector.broadcast %10 : vector<1x32xi1> to vector<1x32xi1>
    %12 = arith.xori %8, %11 : vector<1x32xi1>
    %13 = arith.andi %12, %6 : vector<1x32xi1>
    %14 = vector.broadcast %2 : i32 to vector<1x32xi32>
    %15 = arith.addi %4, %14 : vector<1x32xi32>
    %16 = arith.select %13, %15, %4 : vector<1x32xi1>, vector<1x32xi32>
    %c0 = arith.constant 0 : index
    %c0_3 = arith.constant 0 : index
    %17 = vector.load %arg0[%c0, %c0_3] : memref<8x32xf32, #tpu.memory_space<vmem>>, vector<8x32xf32>
    %cst = arith.constant 0.000000e+00 : f32
    %18 = vector.broadcast %cst : f32 to vector<8x2xf32>
    %19 = tpu.concatenate %18, %17 in 1 : vector<8x2xf32>, vector<8x32xf32> -> vector<8x34xf32>
    %c0_4 = arith.constant 0 : index
    %c0_5 = arith.constant 0 : index
    %20 = vector.load %arg4[%c0_4, %c0_5] : memref<304x128xf32, #tpu.memory_space<vmem>>, vector<12x1xf32>
    %21 = vector.extract_strided_slice %19 {offsets = [0, 0], sizes = [8, 32], strides = [1, 1]} : vector<8x34xf32> to vector<8x32xf32>
    %c2_i32 = arith.constant 2 : i32
    %22 = vector.broadcast %c2_i32 : i32 to vector<1x32xi32>
    %23 = arith.cmpi sge, %16, %22 : vector<1x32xi32>
    %cst_6 = arith.constant 0.000000e+00 : f32
    %24 = vector.shape_cast %23 : vector<1x32xi1> to vector<1x32xi1>
    %25 = vector.broadcast %24 : vector<1x32xi1> to vector<8x32xi1>
    %26 = vector.broadcast %cst_6 : f32 to vector<8x32xf32>
    %27 = arith.select %25, %21, %26 : vector<8x32xi1>, vector<8x32xf32>
    %c0_7 = arith.constant 0 : index
    %c0_8 = arith.constant 0 : index
    %28 = vector.load %arg1[%c0_7, %c0_8] : memref<480x128xbf16, #tpu.memory_space<vmem>>, vector<12x8xbf16>
    %29 = arith.truncf %27 : vector<8x32xf32> to vector<8x32xbf16>
    %cst_9 = arith.constant dense<0.000000e+00> : vector<12x32xf32>
    %30 = tpu.matmul %28, %29, %cst_9 {dimension_numbers = #tpu.dot_dimension_numbers<[1], [0], [0], [1], [0, 0, 1, 1], [], []>} : vector<12x8xbf16>, vector<8x32xbf16>, vector<12x32xf32> -> vector<12x32xf32>
    %31 = vector.broadcast %20 : vector<12x1xf32> to vector<12x32xf32>
    %32 = arith.addf %31, %30 : vector<12x32xf32>
    %33 = vector.extract_strided_slice %19 {offsets = [0, 1], sizes = [8, 32], strides = [1, 1]} : vector<8x34xf32> to vector<8x32xf32>
    %c1_i32_10 = arith.constant 1 : i32
    %34 = vector.broadcast %c1_i32_10 : i32 to vector<1x32xi32>
    %35 = arith.cmpi sge, %16, %34 : vector<1x32xi32>
    %cst_11 = arith.constant 0.000000e+00 : f32
    %36 = vector.shape_cast %35 : vector<1x32xi1> to vector<1x32xi1>
    %37 = vector.broadcast %36 : vector<1x32xi1> to vector<8x32xi1>
    %38 = vector.broadcast %cst_11 : f32 to vector<8x32xf32>
    %39 = arith.select %37, %33, %38 : vector<8x32xi1>, vector<8x32xf32>
    %c32 = arith.constant 32 : index
    %c0_12 = arith.constant 0 : index
    %40 = vector.load %arg1[%c32, %c0_12] : memref<480x128xbf16, #tpu.memory_space<vmem>>, vector<12x8xbf16>
    %41 = arith.truncf %39 : vector<8x32xf32> to vector<8x32xbf16>
    %cst_13 = arith.constant dense<0.000000e+00> : vector<12x32xf32>
    %42 = tpu.matmul %40, %41, %cst_13 {dimension_numbers = #tpu.dot_dimension_numbers<[1], [0], [0], [1], [0, 0, 1, 1], [], []>} : vector<12x8xbf16>, vector<8x32xbf16>, vector<12x32xf32> -> vector<12x32xf32>
    %43 = arith.addf %32, %42 : vector<12x32xf32>
    %44 = vector.extract_strided_slice %19 {offsets = [0, 2], sizes = [8, 32], strides = [1, 1]} : vector<8x34xf32> to vector<8x32xf32>
    %c64 = arith.constant 64 : index
    %c0_14 = arith.constant 0 : index
    %45 = vector.load %arg1[%c64, %c0_14] : memref<480x128xbf16, #tpu.memory_space<vmem>>, vector<12x8xbf16>
    %46 = arith.truncf %44 : vector<8x32xf32> to vector<8x32xbf16>
    %cst_15 = arith.constant dense<0.000000e+00> : vector<12x32xf32>
    %47 = tpu.matmul %45, %46, %cst_15 {dimension_numbers = #tpu.dot_dimension_numbers<[1], [0], [0], [1], [0, 0, 1, 1], [], []>} : vector<12x8xbf16>, vector<8x32xbf16>, vector<12x32xf32> -> vector<12x32xf32>
    %48 = arith.addf %43, %47 : vector<12x32xf32>
    %cst_16 = arith.constant 0.000000e+00 : f32
    %49 = vector.broadcast %cst_16 : f32 to vector<12x32xf32>
    %50 = arith.maximumf %48, %49 : vector<12x32xf32>
    %cst_17 = arith.constant 0.000000e+00 : f32
    %51 = vector.broadcast %cst_17 : f32 to vector<12x2xf32>
    %52 = tpu.concatenate %51, %50 in 1 : vector<12x2xf32>, vector<12x32xf32> -> vector<12x34xf32>
    %c16 = arith.constant 16 : index
    %c0_18 = arith.constant 0 : index
    %53 = vector.load %arg4[%c16, %c0_18] : memref<304x128xf32, #tpu.memory_space<vmem>>, vector<12x1xf32>
    %54 = vector.extract_strided_slice %52 {offsets = [0, 0], sizes = [12, 32], strides = [1, 1]} : vector<12x34xf32> to vector<12x32xf32>
    %c2_i32_19 = arith.constant 2 : i32
    %55 = vector.broadcast %c2_i32_19 : i32 to vector<1x32xi32>
    %56 = arith.cmpi sge, %16, %55 : vector<1x32xi32>
    %cst_20 = arith.constant 0.000000e+00 : f32
    %57 = vector.shape_cast %56 : vector<1x32xi1> to vector<1x32xi1>
    %58 = vector.broadcast %57 : vector<1x32xi1> to vector<12x32xi1>
    %59 = vector.broadcast %cst_20 : f32 to vector<12x32xf32>
    %60 = arith.select %58, %54, %59 : vector<12x32xi1>, vector<12x32xf32>
    %c16_21 = arith.constant 16 : index
    %c0_22 = arith.constant 0 : index
    %61 = vector.load %arg1[%c16_21, %c0_22] : memref<480x128xbf16, #tpu.memory_space<vmem>>, vector<12x12xbf16>
    %62 = arith.truncf %60 : vector<12x32xf32> to vector<12x32xbf16>
    %cst_23 = arith.constant dense<0.000000e+00> : vector<12x32xf32>
    %63 = tpu.matmul %61, %62, %cst_23 {dimension_numbers = #tpu.dot_dimension_numbers<[1], [0], [0], [1], [0, 0, 1, 1], [], []>} : vector<12x12xbf16>, vector<12x32xbf16>, vector<12x32xf32> -> vector<12x32xf32>
    %64 = vector.broadcast %53 : vector<12x1xf32> to vector<12x32xf32>
    %65 = arith.addf %64, %63 : vector<12x32xf32>
    %66 = vector.extract_strided_slice %52 {offsets = [0, 1], sizes = [12, 32], strides = [1, 1]} : vector<12x34xf32> to vector<12x32xf32>
    %c1_i32_24 = arith.constant 1 : i32
    %67 = vector.broadcast %c1_i32_24 : i32 to vector<1x32xi32>
    %68 = arith.cmpi sge, %16, %67 : vector<1x32xi32>
    %cst_25 = arith.constant 0.000000e+00 : f32
    %69 = vector.shape_cast %68 : vector<1x32xi1> to vector<1x32xi1>
    %70 = vector.broadcast %69 : vector<1x32xi1> to vector<12x32xi1>
    %71 = vector.broadcast %cst_25 : f32 to vector<12x32xf32>
    %72 = arith.select %70, %66, %71 : vector<12x32xi1>, vector<12x32xf32>
    %c48 = arith.constant 48 : index
    %c0_26 = arith.constant 0 : index
    %73 = vector.load %arg1[%c48, %c0_26] : memref<480x128xbf16, #tpu.memory_space<vmem>>, vector<12x12xbf16>
    %74 = arith.truncf %72 : vector<12x32xf32> to vector<12x32xbf16>
    %cst_27 = arith.constant dense<0.000000e+00> : vector<12x32xf32>
    %75 = tpu.matmul %73, %74, %cst_27 {dimension_numbers = #tpu.dot_dimension_numbers<[1], [0], [0], [1], [0, 0, 1, 1], [], []>} : vector<12x12xbf16>, vector<12x32xbf16>, vector<12x32xf32> -> vector<12x32xf32>
    %76 = arith.addf %65, %75 : vector<12x32xf32>
    %77 = vector.extract_strided_slice %52 {offsets = [0, 2], sizes = [12, 32], strides = [1, 1]} : vector<12x34xf32> to vector<12x32xf32>
    %c80 = arith.constant 80 : index
    %c0_28 = arith.constant 0 : index
    %78 = vector.load %arg1[%c80, %c0_28] : memref<480x128xbf16, #tpu.memory_space<vmem>>, vector<12x12xbf16>
    %79 = arith.truncf %77 : vector<12x32xf32> to vector<12x32xbf16>
    %cst_29 = arith.constant dense<0.000000e+00> : vector<12x32xf32>
    %80 = tpu.matmul %78, %79, %cst_29 {dimension_numbers = #tpu.dot_dimension_numbers<[1], [0], [0], [1], [0, 0, 1, 1], [], []>} : vector<12x12xbf16>, vector<12x32xbf16>, vector<12x32xf32> -> vector<12x32xf32>
    %81 = arith.addf %76, %80 : vector<12x32xf32>
    %cst_30 = arith.constant 0.000000e+00 : f32
    %82 = vector.broadcast %cst_30 : f32 to vector<12x32xf32>
    %83 = arith.maximumf %81, %82 : vector<12x32xf32>
    %c96 = arith.constant 96 : index
    %c0_31 = arith.constant 0 : index
    %84 = vector.load %arg1[%c96, %c0_31] : memref<480x128xbf16, #tpu.memory_space<vmem>>, vector<12x8xbf16>
    %85 = arith.truncf %17 : vector<8x32xf32> to vector<8x32xbf16>
    %cst_32 = arith.constant dense<0.000000e+00> : vector<12x32xf32>
    %86 = tpu.matmul %84, %85, %cst_32 {dimension_numbers = #tpu.dot_dimension_numbers<[1], [0], [0], [1], [0, 0, 1, 1], [], []>} : vector<12x8xbf16>, vector<8x32xbf16>, vector<12x32xf32> -> vector<12x32xf32>
    %c32_33 = arith.constant 32 : index
    %c0_34 = arith.constant 0 : index
    %87 = vector.load %arg4[%c32_33, %c0_34] : memref<304x128xf32, #tpu.memory_space<vmem>>, vector<12x1xf32>
    %88 = vector.broadcast %87 : vector<12x1xf32> to vector<12x32xf32>
    %89 = arith.addf %86, %88 : vector<12x32xf32>
    %90 = arith.addf %83, %89 : vector<12x32xf32>
    %cst_35 = arith.constant 0.000000e+00 : f32
    %91 = vector.broadcast %cst_35 : f32 to vector<12x32xf32>
    %92 = arith.maximumf %90, %91 : vector<12x32xf32>
    %cst_36 = arith.constant 0.000000e+00 : f32
    %93 = vector.broadcast %cst_36 : f32 to vector<12x2xf32>
    %94 = tpu.concatenate %93, %92 in 1 : vector<12x2xf32>, vector<12x32xf32> -> vector<12x34xf32>
    %c48_37 = arith.constant 48 : index
    %c0_38 = arith.constant 0 : index
    %95 = vector.load %arg4[%c48_37, %c0_38] : memref<304x128xf32, #tpu.memory_space<vmem>>, vector<10x1xf32>
    %96 = vector.extract_strided_slice %94 {offsets = [0, 0], sizes = [12, 32], strides = [1, 1]} : vector<12x34xf32> to vector<12x32xf32>
    %c2_i32_39 = arith.constant 2 : i32
    %97 = vector.broadcast %c2_i32_39 : i32 to vector<1x32xi32>
    %98 = arith.cmpi sge, %16, %97 : vector<1x32xi32>
    %cst_40 = arith.constant 0.000000e+00 : f32
    %99 = vector.shape_cast %98 : vector<1x32xi1> to vector<1x32xi1>
    %100 = vector.broadcast %99 : vector<1x32xi1> to vector<12x32xi1>
    %101 = vector.broadcast %cst_40 : f32 to vector<12x32xf32>
    %102 = arith.select %100, %96, %101 : vector<12x32xi1>, vector<12x32xf32>
    %c112 = arith.constant 112 : index
    %c0_41 = arith.constant 0 : index
    %103 = vector.load %arg1[%c112, %c0_41] : memref<480x128xbf16, #tpu.memory_space<vmem>>, vector<10x12xbf16>
    %104 = arith.truncf %102 : vector<12x32xf32> to vector<12x32xbf16>
    %cst_42 = arith.constant dense<0.000000e+00> : vector<10x32xf32>
    %105 = tpu.matmul %103, %104, %cst_42 {dimension_numbers = #tpu.dot_dimension_numbers<[1], [0], [0], [1], [0, 0, 1, 1], [], []>} : vector<10x12xbf16>, vector<12x32xbf16>, vector<10x32xf32> -> vector<10x32xf32>
    %106 = vector.broadcast %95 : vector<10x1xf32> to vector<10x32xf32>
    %107 = arith.addf %106, %105 : vector<10x32xf32>
    %108 = vector.extract_strided_slice %94 {offsets = [0, 1], sizes = [12, 32], strides = [1, 1]} : vector<12x34xf32> to vector<12x32xf32>
    %c1_i32_43 = arith.constant 1 : i32
    %109 = vector.broadcast %c1_i32_43 : i32 to vector<1x32xi32>
    %110 = arith.cmpi sge, %16, %109 : vector<1x32xi32>
    %cst_44 = arith.constant 0.000000e+00 : f32
    %111 = vector.shape_cast %110 : vector<1x32xi1> to vector<1x32xi1>
    %112 = vector.broadcast %111 : vector<1x32xi1> to vector<12x32xi1>
    %113 = vector.broadcast %cst_44 : f32 to vector<12x32xf32>
    %114 = arith.select %112, %108, %113 : vector<12x32xi1>, vector<12x32xf32>
    %c144 = arith.constant 144 : index
    %c0_45 = arith.constant 0 : index
    %115 = vector.load %arg1[%c144, %c0_45] : memref<480x128xbf16, #tpu.memory_space<vmem>>, vector<10x12xbf16>
    %116 = arith.truncf %114 : vector<12x32xf32> to vector<12x32xbf16>
    %cst_46 = arith.constant dense<0.000000e+00> : vector<10x32xf32>
    %117 = tpu.matmul %115, %116, %cst_46 {dimension_numbers = #tpu.dot_dimension_numbers<[1], [0], [0], [1], [0, 0, 1, 1], [], []>} : vector<10x12xbf16>, vector<12x32xbf16>, vector<10x32xf32> -> vector<10x32xf32>
    %118 = arith.addf %107, %117 : vector<10x32xf32>
    %119 = vector.extract_strided_slice %94 {offsets = [0, 2], sizes = [12, 32], strides = [1, 1]} : vector<12x34xf32> to vector<12x32xf32>
    %c176 = arith.constant 176 : index
    %c0_47 = arith.constant 0 : index
    %120 = vector.load %arg1[%c176, %c0_47] : memref<480x128xbf16, #tpu.memory_space<vmem>>, vector<10x12xbf16>
    %121 = arith.truncf %119 : vector<12x32xf32> to vector<12x32xbf16>
    %cst_48 = arith.constant dense<0.000000e+00> : vector<10x32xf32>
    %122 = tpu.matmul %120, %121, %cst_48 {dimension_numbers = #tpu.dot_dimension_numbers<[1], [0], [0], [1], [0, 0, 1, 1], [], []>} : vector<10x12xbf16>, vector<12x32xbf16>, vector<10x32xf32> -> vector<10x32xf32>
    %123 = arith.addf %118, %122 : vector<10x32xf32>
    %cst_49 = arith.constant 0.000000e+00 : f32
    %124 = vector.broadcast %cst_49 : f32 to vector<10x32xf32>
    %125 = arith.maximumf %123, %124 : vector<10x32xf32>
    %cst_50 = arith.constant 0.000000e+00 : f32
    %126 = vector.broadcast %cst_50 : f32 to vector<10x2xf32>
    %127 = tpu.concatenate %126, %125 in 1 : vector<10x2xf32>, vector<10x32xf32> -> vector<10x34xf32>
    %c64_51 = arith.constant 64 : index
    %c0_52 = arith.constant 0 : index
    %128 = vector.load %arg4[%c64_51, %c0_52] : memref<304x128xf32, #tpu.memory_space<vmem>>, vector<10x1xf32>
    %129 = vector.extract_strided_slice %127 {offsets = [0, 0], sizes = [10, 32], strides = [1, 1]} : vector<10x34xf32> to vector<10x32xf32>
    %c2_i32_53 = arith.constant 2 : i32
    %130 = vector.broadcast %c2_i32_53 : i32 to vector<1x32xi32>
    %131 = arith.cmpi sge, %16, %130 : vector<1x32xi32>
    %cst_54 = arith.constant 0.000000e+00 : f32
    %132 = vector.shape_cast %131 : vector<1x32xi1> to vector<1x32xi1>
    %133 = vector.broadcast %132 : vector<1x32xi1> to vector<10x32xi1>
    %134 = vector.broadcast %cst_54 : f32 to vector<10x32xf32>
    %135 = arith.select %133, %129, %134 : vector<10x32xi1>, vector<10x32xf32>
    %c128 = arith.constant 128 : index
    %c0_55 = arith.constant 0 : index
    %136 = vector.load %arg1[%c128, %c0_55] : memref<480x128xbf16, #tpu.memory_space<vmem>>, vector<10x10xbf16>
    %137 = arith.truncf %135 : vector<10x32xf32> to vector<10x32xbf16>
    %cst_56 = arith.constant dense<0.000000e+00> : vector<10x32xf32>
    %138 = tpu.matmul %136, %137, %cst_56 {dimension_numbers = #tpu.dot_dimension_numbers<[1], [0], [0], [1], [0, 0, 1, 1], [], []>} : vector<10x10xbf16>, vector<10x32xbf16>, vector<10x32xf32> -> vector<10x32xf32>
    %139 = vector.broadcast %128 : vector<10x1xf32> to vector<10x32xf32>
    %140 = arith.addf %139, %138 : vector<10x32xf32>
    %141 = vector.extract_strided_slice %127 {offsets = [0, 1], sizes = [10, 32], strides = [1, 1]} : vector<10x34xf32> to vector<10x32xf32>
    %c1_i32_57 = arith.constant 1 : i32
    %142 = vector.broadcast %c1_i32_57 : i32 to vector<1x32xi32>
    %143 = arith.cmpi sge, %16, %142 : vector<1x32xi32>
    %cst_58 = arith.constant 0.000000e+00 : f32
    %144 = vector.shape_cast %143 : vector<1x32xi1> to vector<1x32xi1>
    %145 = vector.broadcast %144 : vector<1x32xi1> to vector<10x32xi1>
    %146 = vector.broadcast %cst_58 : f32 to vector<10x32xf32>
    %147 = arith.select %145, %141, %146 : vector<10x32xi1>, vector<10x32xf32>
    %c160 = arith.constant 160 : index
    %c0_59 = arith.constant 0 : index
    %148 = vector.load %arg1[%c160, %c0_59] : memref<480x128xbf16, #tpu.memory_space<vmem>>, vector<10x10xbf16>
    %149 = arith.truncf %147 : vector<10x32xf32> to vector<10x32xbf16>
    %cst_60 = arith.constant dense<0.000000e+00> : vector<10x32xf32>
    %150 = tpu.matmul %148, %149, %cst_60 {dimension_numbers = #tpu.dot_dimension_numbers<[1], [0], [0], [1], [0, 0, 1, 1], [], []>} : vector<10x10xbf16>, vector<10x32xbf16>, vector<10x32xf32> -> vector<10x32xf32>
    %151 = arith.addf %140, %150 : vector<10x32xf32>
    %152 = vector.extract_strided_slice %127 {offsets = [0, 2], sizes = [10, 32], strides = [1, 1]} : vector<10x34xf32> to vector<10x32xf32>
    %c192 = arith.constant 192 : index
    %c0_61 = arith.constant 0 : index
    %153 = vector.load %arg1[%c192, %c0_61] : memref<480x128xbf16, #tpu.memory_space<vmem>>, vector<10x10xbf16>
    %154 = arith.truncf %152 : vector<10x32xf32> to vector<10x32xbf16>
    %cst_62 = arith.constant dense<0.000000e+00> : vector<10x32xf32>
    %155 = tpu.matmul %153, %154, %cst_62 {dimension_numbers = #tpu.dot_dimension_numbers<[1], [0], [0], [1], [0, 0, 1, 1], [], []>} : vector<10x10xbf16>, vector<10x32xbf16>, vector<10x32xf32> -> vector<10x32xf32>
    %156 = arith.addf %151, %155 : vector<10x32xf32>
    %cst_63 = arith.constant 0.000000e+00 : f32
    %157 = vector.broadcast %cst_63 : f32 to vector<10x32xf32>
    %158 = arith.maximumf %156, %157 : vector<10x32xf32>
    %c208 = arith.constant 208 : index
    %c0_64 = arith.constant 0 : index
    %159 = vector.load %arg1[%c208, %c0_64] : memref<480x128xbf16, #tpu.memory_space<vmem>>, vector<10x12xbf16>
    %160 = arith.truncf %92 : vector<12x32xf32> to vector<12x32xbf16>
    %cst_65 = arith.constant dense<0.000000e+00> : vector<10x32xf32>
    %161 = tpu.matmul %159, %160, %cst_65 {dimension_numbers = #tpu.dot_dimension_numbers<[1], [0], [0], [1], [0, 0, 1, 1], [], []>} : vector<10x12xbf16>, vector<12x32xbf16>, vector<10x32xf32> -> vector<10x32xf32>
    %c80_66 = arith.constant 80 : index
    %c0_67 = arith.constant 0 : index
    %162 = vector.load %arg4[%c80_66, %c0_67] : memref<304x128xf32, #tpu.memory_space<vmem>>, vector<10x1xf32>
    %163 = vector.broadcast %162 : vector<10x1xf32> to vector<10x32xf32>
    %164 = arith.addf %161, %163 : vector<10x32xf32>
    %165 = arith.addf %158, %164 : vector<10x32xf32>
    %cst_68 = arith.constant 0.000000e+00 : f32
    %166 = vector.broadcast %cst_68 : f32 to vector<10x32xf32>
    %167 = arith.maximumf %165, %166 : vector<10x32xf32>
    %cst_69 = arith.constant 0.000000e+00 : f32
    %168 = vector.broadcast %cst_69 : f32 to vector<10x2xf32>
    %169 = tpu.concatenate %168, %167 in 1 : vector<10x2xf32>, vector<10x32xf32> -> vector<10x34xf32>
    %c96_70 = arith.constant 96 : index
    %c0_71 = arith.constant 0 : index
    %170 = vector.load %arg4[%c96_70, %c0_71] : memref<304x128xf32, #tpu.memory_space<vmem>>, vector<6x1xf32>
    %171 = vector.extract_strided_slice %169 {offsets = [0, 0], sizes = [10, 32], strides = [1, 1]} : vector<10x34xf32> to vector<10x32xf32>
    %c2_i32_72 = arith.constant 2 : i32
    %172 = vector.broadcast %c2_i32_72 : i32 to vector<1x32xi32>
    %173 = arith.cmpi sge, %16, %172 : vector<1x32xi32>
    %cst_73 = arith.constant 0.000000e+00 : f32
    %174 = vector.shape_cast %173 : vector<1x32xi1> to vector<1x32xi1>
    %175 = vector.broadcast %174 : vector<1x32xi1> to vector<10x32xi1>
    %176 = vector.broadcast %cst_73 : f32 to vector<10x32xf32>
    %177 = arith.select %175, %171, %176 : vector<10x32xi1>, vector<10x32xf32>
    %c224 = arith.constant 224 : index
    %c0_74 = arith.constant 0 : index
    %178 = vector.load %arg1[%c224, %c0_74] : memref<480x128xbf16, #tpu.memory_space<vmem>>, vector<6x10xbf16>
    %179 = arith.truncf %177 : vector<10x32xf32> to vector<10x32xbf16>
    %cst_75 = arith.constant dense<0.000000e+00> : vector<6x32xf32>
    %180 = tpu.matmul %178, %179, %cst_75 {dimension_numbers = #tpu.dot_dimension_numbers<[1], [0], [0], [1], [0, 0, 1, 1], [], []>} : vector<6x10xbf16>, vector<10x32xbf16>, vector<6x32xf32> -> vector<6x32xf32>
    %181 = vector.broadcast %170 : vector<6x1xf32> to vector<6x32xf32>
    %182 = arith.addf %181, %180 : vector<6x32xf32>
    %183 = vector.extract_strided_slice %169 {offsets = [0, 1], sizes = [10, 32], strides = [1, 1]} : vector<10x34xf32> to vector<10x32xf32>
    %c1_i32_76 = arith.constant 1 : i32
    %184 = vector.broadcast %c1_i32_76 : i32 to vector<1x32xi32>
    %185 = arith.cmpi sge, %16, %184 : vector<1x32xi32>
    %cst_77 = arith.constant 0.000000e+00 : f32
    %186 = vector.shape_cast %185 : vector<1x32xi1> to vector<1x32xi1>
    %187 = vector.broadcast %186 : vector<1x32xi1> to vector<10x32xi1>
    %188 = vector.broadcast %cst_77 : f32 to vector<10x32xf32>
    %189 = arith.select %187, %183, %188 : vector<10x32xi1>, vector<10x32xf32>
    %c256 = arith.constant 256 : index
    %c0_78 = arith.constant 0 : index
    %190 = vector.load %arg1[%c256, %c0_78] : memref<480x128xbf16, #tpu.memory_space<vmem>>, vector<6x10xbf16>
    %191 = arith.truncf %189 : vector<10x32xf32> to vector<10x32xbf16>
    %cst_79 = arith.constant dense<0.000000e+00> : vector<6x32xf32>
    %192 = tpu.matmul %190, %191, %cst_79 {dimension_numbers = #tpu.dot_dimension_numbers<[1], [0], [0], [1], [0, 0, 1, 1], [], []>} : vector<6x10xbf16>, vector<10x32xbf16>, vector<6x32xf32> -> vector<6x32xf32>
    %193 = arith.addf %182, %192 : vector<6x32xf32>
    %194 = vector.extract_strided_slice %169 {offsets = [0, 2], sizes = [10, 32], strides = [1, 1]} : vector<10x34xf32> to vector<10x32xf32>
    %c288 = arith.constant 288 : index
    %c0_80 = arith.constant 0 : index
    %195 = vector.load %arg1[%c288, %c0_80] : memref<480x128xbf16, #tpu.memory_space<vmem>>, vector<6x10xbf16>
    %196 = arith.truncf %194 : vector<10x32xf32> to vector<10x32xbf16>
    %cst_81 = arith.constant dense<0.000000e+00> : vector<6x32xf32>
    %197 = tpu.matmul %195, %196, %cst_81 {dimension_numbers = #tpu.dot_dimension_numbers<[1], [0], [0], [1], [0, 0, 1, 1], [], []>} : vector<6x10xbf16>, vector<10x32xbf16>, vector<6x32xf32> -> vector<6x32xf32>
    %198 = arith.addf %193, %197 : vector<6x32xf32>
    %cst_82 = arith.constant 0.000000e+00 : f32
    %199 = vector.broadcast %cst_82 : f32 to vector<6x32xf32>
    %200 = arith.maximumf %198, %199 : vector<6x32xf32>
    %cst_83 = arith.constant 0.000000e+00 : f32
    %201 = vector.broadcast %cst_83 : f32 to vector<6x2xf32>
    %202 = tpu.concatenate %201, %200 in 1 : vector<6x2xf32>, vector<6x32xf32> -> vector<6x34xf32>
    %c104 = arith.constant 104 : index
    %c0_84 = arith.constant 0 : index
    %203 = vector.load %arg4[%c104, %c0_84] : memref<304x128xf32, #tpu.memory_space<vmem>>, vector<6x1xf32>
    %204 = vector.extract_strided_slice %202 {offsets = [0, 0], sizes = [6, 32], strides = [1, 1]} : vector<6x34xf32> to vector<6x32xf32>
    %c2_i32_85 = arith.constant 2 : i32
    %205 = vector.broadcast %c2_i32_85 : i32 to vector<1x32xi32>
    %206 = arith.cmpi sge, %16, %205 : vector<1x32xi32>
    %cst_86 = arith.constant 0.000000e+00 : f32
    %207 = vector.shape_cast %206 : vector<1x32xi1> to vector<1x32xi1>
    %208 = vector.broadcast %207 : vector<1x32xi1> to vector<6x32xi1>
    %209 = vector.broadcast %cst_86 : f32 to vector<6x32xf32>
    %210 = arith.select %208, %204, %209 : vector<6x32xi1>, vector<6x32xf32>
    %c240 = arith.constant 240 : index
    %c0_87 = arith.constant 0 : index
    %211 = vector.load %arg1[%c240, %c0_87] : memref<480x128xbf16, #tpu.memory_space<vmem>>, vector<6x6xbf16>
    %212 = arith.truncf %210 : vector<6x32xf32> to vector<6x32xbf16>
    %cst_88 = arith.constant dense<0.000000e+00> : vector<6x32xf32>
    %213 = tpu.matmul %211, %212, %cst_88 {dimension_numbers = #tpu.dot_dimension_numbers<[1], [0], [0], [1], [0, 0, 1, 1], [], []>} : vector<6x6xbf16>, vector<6x32xbf16>, vector<6x32xf32> -> vector<6x32xf32>
    %214 = vector.broadcast %203 : vector<6x1xf32> to vector<6x32xf32>
    %215 = arith.addf %214, %213 : vector<6x32xf32>
    %216 = vector.extract_strided_slice %202 {offsets = [0, 1], sizes = [6, 32], strides = [1, 1]} : vector<6x34xf32> to vector<6x32xf32>
    %c1_i32_89 = arith.constant 1 : i32
    %217 = vector.broadcast %c1_i32_89 : i32 to vector<1x32xi32>
    %218 = arith.cmpi sge, %16, %217 : vector<1x32xi32>
    %cst_90 = arith.constant 0.000000e+00 : f32
    %219 = vector.shape_cast %218 : vector<1x32xi1> to vector<1x32xi1>
    %220 = vector.broadcast %219 : vector<1x32xi1> to vector<6x32xi1>
    %221 = vector.broadcast %cst_90 : f32 to vector<6x32xf32>
    %222 = arith.select %220, %216, %221 : vector<6x32xi1>, vector<6x32xf32>
    %c272 = arith.constant 272 : index
    %c0_91 = arith.constant 0 : index
    %223 = vector.load %arg1[%c272, %c0_91] : memref<480x128xbf16, #tpu.memory_space<vmem>>, vector<6x6xbf16>
    %224 = arith.truncf %222 : vector<6x32xf32> to vector<6x32xbf16>
    %cst_92 = arith.constant dense<0.000000e+00> : vector<6x32xf32>
    %225 = tpu.matmul %223, %224, %cst_92 {dimension_numbers = #tpu.dot_dimension_numbers<[1], [0], [0], [1], [0, 0, 1, 1], [], []>} : vector<6x6xbf16>, vector<6x32xbf16>, vector<6x32xf32> -> vector<6x32xf32>
    %226 = arith.addf %215, %225 : vector<6x32xf32>
    %227 = vector.extract_strided_slice %202 {offsets = [0, 2], sizes = [6, 32], strides = [1, 1]} : vector<6x34xf32> to vector<6x32xf32>
    %c304 = arith.constant 304 : index
    %c0_93 = arith.constant 0 : index
    %228 = vector.load %arg1[%c304, %c0_93] : memref<480x128xbf16, #tpu.memory_space<vmem>>, vector<6x6xbf16>
    %229 = arith.truncf %227 : vector<6x32xf32> to vector<6x32xbf16>
    %cst_94 = arith.constant dense<0.000000e+00> : vector<6x32xf32>
    %230 = tpu.matmul %228, %229, %cst_94 {dimension_numbers = #tpu.dot_dimension_numbers<[1], [0], [0], [1], [0, 0, 1, 1], [], []>} : vector<6x6xbf16>, vector<6x32xbf16>, vector<6x32xf32> -> vector<6x32xf32>
    %231 = arith.addf %226, %230 : vector<6x32xf32>
    %cst_95 = arith.constant 0.000000e+00 : f32
    %232 = vector.broadcast %cst_95 : f32 to vector<6x32xf32>
    %233 = arith.maximumf %231, %232 : vector<6x32xf32>
    %c320 = arith.constant 320 : index
    %c0_96 = arith.constant 0 : index
    %234 = vector.load %arg1[%c320, %c0_96] : memref<480x128xbf16, #tpu.memory_space<vmem>>, vector<6x10xbf16>
    %235 = arith.truncf %167 : vector<10x32xf32> to vector<10x32xbf16>
    %cst_97 = arith.constant dense<0.000000e+00> : vector<6x32xf32>
    %236 = tpu.matmul %234, %235, %cst_97 {dimension_numbers = #tpu.dot_dimension_numbers<[1], [0], [0], [1], [0, 0, 1, 1], [], []>} : vector<6x10xbf16>, vector<10x32xbf16>, vector<6x32xf32> -> vector<6x32xf32>
    %c112_98 = arith.constant 112 : index
    %c0_99 = arith.constant 0 : index
    %237 = vector.load %arg4[%c112_98, %c0_99] : memref<304x128xf32, #tpu.memory_space<vmem>>, vector<6x1xf32>
    %238 = vector.broadcast %237 : vector<6x1xf32> to vector<6x32xf32>
    %239 = arith.addf %236, %238 : vector<6x32xf32>
    %240 = arith.addf %233, %239 : vector<6x32xf32>
    %cst_100 = arith.constant 0.000000e+00 : f32
    %241 = vector.broadcast %cst_100 : f32 to vector<6x32xf32>
    %242 = arith.maximumf %240, %241 : vector<6x32xf32>
    %243 = vector.extract_strided_slice %242 {offsets = [0, 0], sizes = [6, 16], strides = [1, 1]} : vector<6x32xf32> to vector<6x16xf32>
    %244 = vector.extract_strided_slice %242 {offsets = [0, 16], sizes = [6, 16], strides = [1, 1]} : vector<6x32xf32> to vector<6x16xf32>
    %245 = tpu.concatenate %243, %244 in 0 : vector<6x16xf32>, vector<6x16xf32> -> vector<12x16xf32>
    %c336 = arith.constant 336 : index
    %c0_101 = arith.constant 0 : index
    %246 = vector.load %arg1[%c336, %c0_101] : memref<480x128xbf16, #tpu.memory_space<vmem>>, vector<16x48xbf16>
    %247 = arith.truncf %245 : vector<12x16xf32> to vector<12x16xbf16>
    %cst_102 = arith.constant dense<0.000000e+00> : vector<12x48xf32>
    %248 = tpu.matmul %247, %246, %cst_102 {dimension_numbers = #tpu.dot_dimension_numbers<[1], [0], [0], [1], [0, 0, 1, 1], [], []>} : vector<12x16xbf16>, vector<16x48xbf16>, vector<12x48xf32> -> vector<12x48xf32>
    %c120 = arith.constant 120 : index
    %c0_103 = arith.constant 0 : index
    %249 = vector.load %arg4[%c120, %c0_103] : memref<304x128xf32, #tpu.memory_space<vmem>>, vector<1x48xf32>
    %250 = vector.broadcast %249 : vector<1x48xf32> to vector<12x48xf32>
    %251 = arith.addf %248, %250 : vector<12x48xf32>
    %252 = vector.extract_strided_slice %251 {offsets = [0, 0], sizes = [12, 16], strides = [1, 1]} : vector<12x48xf32> to vector<12x16xf32>
    %253 = vector.extract_strided_slice %251 {offsets = [0, 16], sizes = [12, 16], strides = [1, 1]} : vector<12x48xf32> to vector<12x16xf32>
    %254 = vector.extract_strided_slice %251 {offsets = [0, 32], sizes = [12, 16], strides = [1, 1]} : vector<12x48xf32> to vector<12x16xf32>
    %c136 = arith.constant 136 : index
    %c0_104 = arith.constant 0 : index
    %255 = vector.load %arg4[%c136, %c0_104] : memref<304x128xf32, #tpu.memory_space<vmem>>, vector<48x16xf32>
    %c184 = arith.constant 184 : index
    %c0_105 = arith.constant 0 : index
    %256 = vector.load %arg4[%c184, %c0_105] : memref<304x128xf32, #tpu.memory_space<vmem>>, vector<48x12xf32>
    %257 = tpu.concatenate %252, %252, %252, %252 in 0 : vector<12x16xf32>, vector<12x16xf32>, vector<12x16xf32>, vector<12x16xf32> -> vector<48x16xf32>
    %258 = arith.mulf %257, %255 : vector<48x16xf32>
    %259 = tpu.transpose %253, [1, 0] : vector<12x16xf32> -> vector<16x12xf32>
    %260 = arith.truncf %258 : vector<48x16xf32> to vector<48x16xbf16>
    %261 = arith.truncf %259 : vector<16x12xf32> to vector<16x12xbf16>
    %cst_106 = arith.constant dense<0.000000e+00> : vector<48x12xf32>
    %262 = tpu.matmul %260, %261, %cst_106 {dimension_numbers = #tpu.dot_dimension_numbers<[1], [0], [0], [1], [0, 0, 1, 1], [], []>} : vector<48x16xbf16>, vector<16x12xbf16>, vector<48x12xf32> -> vector<48x12xf32>
    %263 = arith.addf %262, %256 : vector<48x12xf32>
    %cst_107 = arith.constant dense<0xFF800000> : vector<48xf32>
    %264 = vector.multi_reduction <maximumf>, %263, %cst_107 [1] : vector<48x12xf32> to vector<48xf32>
    %265 = vector.shape_cast %264 : vector<48xf32> to vector<48x1xf32>
    %266 = vector.broadcast %265 : vector<48x1xf32> to vector<48x12xf32>
    %267 = arith.subf %263, %266 : vector<48x12xf32>
    %268 = math.exp %267 : vector<48x12xf32>
    %cst_108 = arith.constant dense<0.000000e+00> : vector<48xf32>
    %269 = vector.multi_reduction <add>, %268, %cst_108 [1] : vector<48x12xf32> to vector<48xf32>
    %270 = vector.shape_cast %269 : vector<48xf32> to vector<48x1xf32>
    %271 = tpu.reciprocal %270 {approx = true} : vector<48x1xf32> -> vector<48x1xf32>
    %272 = vector.broadcast %271 : vector<48x1xf32> to vector<48x12xf32>
    %273 = arith.mulf %268, %272 : vector<48x12xf32>
    %274 = arith.truncf %273 : vector<48x12xf32> to vector<48x12xbf16>
    %275 = arith.truncf %254 : vector<12x16xf32> to vector<12x16xbf16>
    %cst_109 = arith.constant dense<0.000000e+00> : vector<48x16xf32>
    %276 = tpu.matmul %274, %275, %cst_109 {dimension_numbers = #tpu.dot_dimension_numbers<[1], [0], [0], [1], [0, 0, 1, 1], [], []>} : vector<48x12xbf16>, vector<12x16xbf16>, vector<48x16xf32> -> vector<48x16xf32>
    %277 = arith.mulf %276, %255 : vector<48x16xf32>
    %c368 = arith.constant 368 : index
    %c0_110 = arith.constant 0 : index
    %278 = vector.load %arg1[%c368, %c0_110] : memref<480x128xbf16, #tpu.memory_space<vmem>>, vector<12x48xbf16>
    %279 = arith.truncf %277 : vector<48x16xf32> to vector<48x16xbf16>
    %cst_111 = arith.constant dense<0.000000e+00> : vector<12x16xf32>
    %280 = tpu.matmul %278, %279, %cst_111 {dimension_numbers = #tpu.dot_dimension_numbers<[1], [0], [0], [1], [0, 0, 1, 1], [], []>} : vector<12x48xbf16>, vector<48x16xbf16>, vector<12x16xf32> -> vector<12x16xf32>
    %c352 = arith.constant 352 : index
    %c0_112 = arith.constant 0 : index
    %281 = vector.load %arg1[%c352, %c0_112] : memref<480x128xbf16, #tpu.memory_space<vmem>>, vector<16x16xbf16>
    %282 = arith.truncf %280 : vector<12x16xf32> to vector<12x16xbf16>
    %cst_113 = arith.constant dense<0.000000e+00> : vector<12x16xf32>
    %283 = tpu.matmul %282, %281, %cst_113 {dimension_numbers = #tpu.dot_dimension_numbers<[1], [0], [0], [1], [0, 0, 1, 1], [], []>} : vector<12x16xbf16>, vector<16x16xbf16>, vector<12x16xf32> -> vector<12x16xf32>
    %c128_114 = arith.constant 128 : index
    %c0_115 = arith.constant 0 : index
    %284 = vector.load %arg4[%c128_114, %c0_115] : memref<304x128xf32, #tpu.memory_space<vmem>>, vector<1x16xf32>
    %285 = vector.broadcast %284 : vector<1x16xf32> to vector<12x16xf32>
    %286 = arith.addf %283, %285 : vector<12x16xf32>
    %c384 = arith.constant 384 : index
    %c0_116 = arith.constant 0 : index
    %287 = vector.load %arg1[%c384, %c0_116] : memref<480x128xbf16, #tpu.memory_space<vmem>>, vector<16x64xbf16>
    %c400 = arith.constant 400 : index
    %c0_117 = arith.constant 0 : index
    %288 = vector.load %arg1[%c400, %c0_117] : memref<480x128xbf16, #tpu.memory_space<vmem>>, vector<16x64xbf16>
    %c232 = arith.constant 232 : index
    %c0_118 = arith.constant 0 : index
    %289 = vector.load %arg4[%c232, %c0_118] : memref<304x128xf32, #tpu.memory_space<vmem>>, vector<1x64xf32>
    %c240_119 = arith.constant 240 : index
    %c0_120 = arith.constant 0 : index
    %290 = vector.load %arg4[%c240_119, %c0_120] : memref<304x128xf32, #tpu.memory_space<vmem>>, vector<2x16xf32>
    %c248 = arith.constant 248 : index
    %c0_121 = arith.constant 0 : index
    %291 = vector.load %arg4[%c248, %c0_121] : memref<304x128xf32, #tpu.memory_space<vmem>>, vector<2x16xf32>
    %292 = arith.truncf %286 : vector<12x16xf32> to vector<12x16xbf16>
    %cst_122 = arith.constant dense<0.000000e+00> : vector<12x64xf32>
    %293 = tpu.matmul %292, %287, %cst_122 {dimension_numbers = #tpu.dot_dimension_numbers<[1], [0], [0], [1], [0, 0, 1, 1], [], []>} : vector<12x16xbf16>, vector<16x64xbf16>, vector<12x64xf32> -> vector<12x64xf32>
    %294 = vector.broadcast %289 : vector<1x64xf32> to vector<12x64xf32>
    %295 = arith.addf %293, %294 : vector<12x64xf32>
    %296 = vector.extract_strided_slice %295 {offsets = [0, 0], sizes = [2, 64], strides = [1, 1]} : vector<12x64xf32> to vector<2x64xf32>
    %297 = arith.truncf %290 : vector<2x16xf32> to vector<2x16xbf16>
    %cst_123 = arith.constant dense<0.000000e+00> : vector<2x64xf32>
    %298 = tpu.matmul %297, %288, %cst_123 {dimension_numbers = #tpu.dot_dimension_numbers<[1], [0], [0], [1], [0, 0, 1, 1], [], []>} : vector<2x16xbf16>, vector<16x64xbf16>, vector<2x64xf32> -> vector<2x64xf32>
    %299 = arith.addf %296, %298 : vector<2x64xf32>
    %300 = vector.extract_strided_slice %299 {offsets = [0, 0], sizes = [2, 48], strides = [1, 1]} : vector<2x64xf32> to vector<2x48xf32>
    %301 = arith.negf %300 : vector<2x48xf32>
    %302 = math.exp %301 : vector<2x48xf32>
    %cst_124 = arith.constant 1.000000e+00 : f32
    %303 = vector.broadcast %cst_124 : f32 to vector<2x48xf32>
    %304 = arith.addf %303, %302 : vector<2x48xf32>
    %305 = arith.divf %303, %304 : vector<2x48xf32>
    %306 = vector.extract_strided_slice %299 {offsets = [0, 48], sizes = [2, 16], strides = [1, 1]} : vector<2x64xf32> to vector<2x16xf32>
    %307 = math.tanh %306 : vector<2x16xf32>
    %308 = vector.extract_strided_slice %305 {offsets = [0, 16], sizes = [2, 16], strides = [1, 1]} : vector<2x48xf32> to vector<2x16xf32>
    %309 = arith.mulf %308, %291 : vector<2x16xf32>
    %310 = vector.extract_strided_slice %305 {offsets = [0, 0], sizes = [2, 16], strides = [1, 1]} : vector<2x48xf32> to vector<2x16xf32>
    %311 = arith.mulf %310, %307 : vector<2x16xf32>
    %312 = arith.addf %309, %311 : vector<2x16xf32>
    %313 = vector.extract_strided_slice %305 {offsets = [0, 32], sizes = [2, 16], strides = [1, 1]} : vector<2x48xf32> to vector<2x16xf32>
    %314 = math.tanh %312 : vector<2x16xf32>
    %315 = arith.mulf %313, %314 : vector<2x16xf32>
    %c0_125 = arith.constant 0 : index
    %c0_126 = arith.constant 0 : index
    %316 = vector.load %arg6[%c0_125, %c0_126] : memref<12x16xf32, #tpu.memory_space<vmem>>, vector<2x16xf32>
    tpu.vector_store %arg6[%c0_125, %c0_126], %315 {strides = array<i32>} : memref<12x16xf32, #tpu.memory_space<vmem>>, vector<2x16xf32>,
    %317 = vector.extract_strided_slice %295 {offsets = [2, 0], sizes = [2, 64], strides = [1, 1]} : vector<12x64xf32> to vector<2x64xf32>
    %318 = arith.truncf %315 : vector<2x16xf32> to vector<2x16xbf16>
    %cst_127 = arith.constant dense<0.000000e+00> : vector<2x64xf32>
    %319 = tpu.matmul %318, %288, %cst_127 {dimension_numbers = #tpu.dot_dimension_numbers<[1], [0], [0], [1], [0, 0, 1, 1], [], []>} : vector<2x16xbf16>, vector<16x64xbf16>, vector<2x64xf32> -> vector<2x64xf32>
    %320 = arith.addf %317, %319 : vector<2x64xf32>
    %321 = vector.extract_strided_slice %320 {offsets = [0, 0], sizes = [2, 48], strides = [1, 1]} : vector<2x64xf32> to vector<2x48xf32>
    %322 = arith.negf %321 : vector<2x48xf32>
    %323 = math.exp %322 : vector<2x48xf32>
    %cst_128 = arith.constant 1.000000e+00 : f32
    %324 = vector.broadcast %cst_128 : f32 to vector<2x48xf32>
    %325 = arith.addf %324, %323 : vector<2x48xf32>
    %326 = arith.divf %324, %325 : vector<2x48xf32>
    %327 = vector.extract_strided_slice %320 {offsets = [0, 48], sizes = [2, 16], strides = [1, 1]} : vector<2x64xf32> to vector<2x16xf32>
    %328 = math.tanh %327 : vector<2x16xf32>
    %329 = vector.extract_strided_slice %326 {offsets = [0, 16], sizes = [2, 16], strides = [1, 1]} : vector<2x48xf32> to vector<2x16xf32>
    %330 = arith.mulf %329, %312 : vector<2x16xf32>
    %331 = vector.extract_strided_slice %326 {offsets = [0, 0], sizes = [2, 16], strides = [1, 1]} : vector<2x48xf32> to vector<2x16xf32>
    %332 = arith.mulf %331, %328 : vector<2x16xf32>
    %333 = arith.addf %330, %332 : vector<2x16xf32>
    %334 = vector.extract_strided_slice %326 {offsets = [0, 32], sizes = [2, 16], strides = [1, 1]} : vector<2x48xf32> to vector<2x16xf32>
    %335 = math.tanh %333 : vector<2x16xf32>
    %336 = arith.mulf %334, %335 : vector<2x16xf32>
    %c2 = arith.constant 2 : index
    %c0_129 = arith.constant 0 : index
    %337 = vector.load %arg6[%c2, %c0_129] : memref<12x16xf32, #tpu.memory_space<vmem>>, vector<2x16xf32>
    tpu.vector_store %arg6[%c2, %c0_129], %336 {strides = array<i32>} : memref<12x16xf32, #tpu.memory_space<vmem>>, vector<2x16xf32>,
    %338 = vector.extract_strided_slice %295 {offsets = [4, 0], sizes = [2, 64], strides = [1, 1]} : vector<12x64xf32> to vector<2x64xf32>
    %339 = arith.truncf %336 : vector<2x16xf32> to vector<2x16xbf16>
    %cst_130 = arith.constant dense<0.000000e+00> : vector<2x64xf32>
    %340 = tpu.matmul %339, %288, %cst_130 {dimension_numbers = #tpu.dot_dimension_numbers<[1], [0], [0], [1], [0, 0, 1, 1], [], []>} : vector<2x16xbf16>, vector<16x64xbf16>, vector<2x64xf32> -> vector<2x64xf32>
    %341 = arith.addf %338, %340 : vector<2x64xf32>
    %342 = vector.extract_strided_slice %341 {offsets = [0, 0], sizes = [2, 48], strides = [1, 1]} : vector<2x64xf32> to vector<2x48xf32>
    %343 = arith.negf %342 : vector<2x48xf32>
    %344 = math.exp %343 : vector<2x48xf32>
    %cst_131 = arith.constant 1.000000e+00 : f32
    %345 = vector.broadcast %cst_131 : f32 to vector<2x48xf32>
    %346 = arith.addf %345, %344 : vector<2x48xf32>
    %347 = arith.divf %345, %346 : vector<2x48xf32>
    %348 = vector.extract_strided_slice %341 {offsets = [0, 48], sizes = [2, 16], strides = [1, 1]} : vector<2x64xf32> to vector<2x16xf32>
    %349 = math.tanh %348 : vector<2x16xf32>
    %350 = vector.extract_strided_slice %347 {offsets = [0, 16], sizes = [2, 16], strides = [1, 1]} : vector<2x48xf32> to vector<2x16xf32>
    %351 = arith.mulf %350, %333 : vector<2x16xf32>
    %352 = vector.extract_strided_slice %347 {offsets = [0, 0], sizes = [2, 16], strides = [1, 1]} : vector<2x48xf32> to vector<2x16xf32>
    %353 = arith.mulf %352, %349 : vector<2x16xf32>
    %354 = arith.addf %351, %353 : vector<2x16xf32>
    %355 = vector.extract_strided_slice %347 {offsets = [0, 32], sizes = [2, 16], strides = [1, 1]} : vector<2x48xf32> to vector<2x16xf32>
    %356 = math.tanh %354 : vector<2x16xf32>
    %357 = arith.mulf %355, %356 : vector<2x16xf32>
    %c4 = arith.constant 4 : index
    %c0_132 = arith.constant 0 : index
    %358 = vector.load %arg6[%c4, %c0_132] : memref<12x16xf32, #tpu.memory_space<vmem>>, vector<2x16xf32>
    tpu.vector_store %arg6[%c4, %c0_132], %357 {strides = array<i32>} : memref<12x16xf32, #tpu.memory_space<vmem>>, vector<2x16xf32>,
    %359 = vector.extract_strided_slice %295 {offsets = [6, 0], sizes = [2, 64], strides = [1, 1]} : vector<12x64xf32> to vector<2x64xf32>
    %360 = arith.truncf %357 : vector<2x16xf32> to vector<2x16xbf16>
    %cst_133 = arith.constant dense<0.000000e+00> : vector<2x64xf32>
    %361 = tpu.matmul %360, %288, %cst_133 {dimension_numbers = #tpu.dot_dimension_numbers<[1], [0], [0], [1], [0, 0, 1, 1], [], []>} : vector<2x16xbf16>, vector<16x64xbf16>, vector<2x64xf32> -> vector<2x64xf32>
    %362 = arith.addf %359, %361 : vector<2x64xf32>
    %363 = vector.extract_strided_slice %362 {offsets = [0, 0], sizes = [2, 48], strides = [1, 1]} : vector<2x64xf32> to vector<2x48xf32>
    %364 = arith.negf %363 : vector<2x48xf32>
    %365 = math.exp %364 : vector<2x48xf32>
    %cst_134 = arith.constant 1.000000e+00 : f32
    %366 = vector.broadcast %cst_134 : f32 to vector<2x48xf32>
    %367 = arith.addf %366, %365 : vector<2x48xf32>
    %368 = arith.divf %366, %367 : vector<2x48xf32>
    %369 = vector.extract_strided_slice %362 {offsets = [0, 48], sizes = [2, 16], strides = [1, 1]} : vector<2x64xf32> to vector<2x16xf32>
    %370 = math.tanh %369 : vector<2x16xf32>
    %371 = vector.extract_strided_slice %368 {offsets = [0, 16], sizes = [2, 16], strides = [1, 1]} : vector<2x48xf32> to vector<2x16xf32>
    %372 = arith.mulf %371, %354 : vector<2x16xf32>
    %373 = vector.extract_strided_slice %368 {offsets = [0, 0], sizes = [2, 16], strides = [1, 1]} : vector<2x48xf32> to vector<2x16xf32>
    %374 = arith.mulf %373, %370 : vector<2x16xf32>
    %375 = arith.addf %372, %374 : vector<2x16xf32>
    %376 = vector.extract_strided_slice %368 {offsets = [0, 32], sizes = [2, 16], strides = [1, 1]} : vector<2x48xf32> to vector<2x16xf32>
    %377 = math.tanh %375 : vector<2x16xf32>
    %378 = arith.mulf %376, %377 : vector<2x16xf32>
    %c6 = arith.constant 6 : index
    %c0_135 = arith.constant 0 : index
    %379 = vector.load %arg6[%c6, %c0_135] : memref<12x16xf32, #tpu.memory_space<vmem>>, vector<2x16xf32>
    tpu.vector_store %arg6[%c6, %c0_135], %378 {strides = array<i32>} : memref<12x16xf32, #tpu.memory_space<vmem>>, vector<2x16xf32>,
    %380 = vector.extract_strided_slice %295 {offsets = [8, 0], sizes = [2, 64], strides = [1, 1]} : vector<12x64xf32> to vector<2x64xf32>
    %381 = arith.truncf %378 : vector<2x16xf32> to vector<2x16xbf16>
    %cst_136 = arith.constant dense<0.000000e+00> : vector<2x64xf32>
    %382 = tpu.matmul %381, %288, %cst_136 {dimension_numbers = #tpu.dot_dimension_numbers<[1], [0], [0], [1], [0, 0, 1, 1], [], []>} : vector<2x16xbf16>, vector<16x64xbf16>, vector<2x64xf32> -> vector<2x64xf32>
    %383 = arith.addf %380, %382 : vector<2x64xf32>
    %384 = vector.extract_strided_slice %383 {offsets = [0, 0], sizes = [2, 48], strides = [1, 1]} : vector<2x64xf32> to vector<2x48xf32>
    %385 = arith.negf %384 : vector<2x48xf32>
    %386 = math.exp %385 : vector<2x48xf32>
    %cst_137 = arith.constant 1.000000e+00 : f32
    %387 = vector.broadcast %cst_137 : f32 to vector<2x48xf32>
    %388 = arith.addf %387, %386 : vector<2x48xf32>
    %389 = arith.divf %387, %388 : vector<2x48xf32>
    %390 = vector.extract_strided_slice %383 {offsets = [0, 48], sizes = [2, 16], strides = [1, 1]} : vector<2x64xf32> to vector<2x16xf32>
    %391 = math.tanh %390 : vector<2x16xf32>
    %392 = vector.extract_strided_slice %389 {offsets = [0, 16], sizes = [2, 16], strides = [1, 1]} : vector<2x48xf32> to vector<2x16xf32>
    %393 = arith.mulf %392, %375 : vector<2x16xf32>
    %394 = vector.extract_strided_slice %389 {offsets = [0, 0], sizes = [2, 16], strides = [1, 1]} : vector<2x48xf32> to vector<2x16xf32>
    %395 = arith.mulf %394, %391 : vector<2x16xf32>
    %396 = arith.addf %393, %395 : vector<2x16xf32>
    %397 = vector.extract_strided_slice %389 {offsets = [0, 32], sizes = [2, 16], strides = [1, 1]} : vector<2x48xf32> to vector<2x16xf32>
    %398 = math.tanh %396 : vector<2x16xf32>
    %399 = arith.mulf %397, %398 : vector<2x16xf32>
    %c8 = arith.constant 8 : index
    %c0_138 = arith.constant 0 : index
    %400 = vector.load %arg6[%c8, %c0_138] : memref<12x16xf32, #tpu.memory_space<vmem>>, vector<2x16xf32>
    tpu.vector_store %arg6[%c8, %c0_138], %399 {strides = array<i32>} : memref<12x16xf32, #tpu.memory_space<vmem>>, vector<2x16xf32>,
    %401 = vector.extract_strided_slice %295 {offsets = [10, 0], sizes = [2, 64], strides = [1, 1]} : vector<12x64xf32> to vector<2x64xf32>
    %402 = arith.truncf %399 : vector<2x16xf32> to vector<2x16xbf16>
    %cst_139 = arith.constant dense<0.000000e+00> : vector<2x64xf32>
    %403 = tpu.matmul %402, %288, %cst_139 {dimension_numbers = #tpu.dot_dimension_numbers<[1], [0], [0], [1], [0, 0, 1, 1], [], []>} : vector<2x16xbf16>, vector<16x64xbf16>, vector<2x64xf32> -> vector<2x64xf32>
    %404 = arith.addf %401, %403 : vector<2x64xf32>
    %405 = vector.extract_strided_slice %404 {offsets = [0, 0], sizes = [2, 48], strides = [1, 1]} : vector<2x64xf32> to vector<2x48xf32>
    %406 = arith.negf %405 : vector<2x48xf32>
    %407 = math.exp %406 : vector<2x48xf32>
    %cst_140 = arith.constant 1.000000e+00 : f32
    %408 = vector.broadcast %cst_140 : f32 to vector<2x48xf32>
    %409 = arith.addf %408, %407 : vector<2x48xf32>
    %410 = arith.divf %408, %409 : vector<2x48xf32>
    %411 = vector.extract_strided_slice %404 {offsets = [0, 48], sizes = [2, 16], strides = [1, 1]} : vector<2x64xf32> to vector<2x16xf32>
    %412 = math.tanh %411 : vector<2x16xf32>
    %413 = vector.extract_strided_slice %410 {offsets = [0, 16], sizes = [2, 16], strides = [1, 1]} : vector<2x48xf32> to vector<2x16xf32>
    %414 = arith.mulf %413, %396 : vector<2x16xf32>
    %415 = vector.extract_strided_slice %410 {offsets = [0, 0], sizes = [2, 16], strides = [1, 1]} : vector<2x48xf32> to vector<2x16xf32>
    %416 = arith.mulf %415, %412 : vector<2x16xf32>
    %417 = arith.addf %414, %416 : vector<2x16xf32>
    %418 = vector.extract_strided_slice %410 {offsets = [0, 32], sizes = [2, 16], strides = [1, 1]} : vector<2x48xf32> to vector<2x16xf32>
    %419 = math.tanh %417 : vector<2x16xf32>
    %420 = arith.mulf %418, %419 : vector<2x16xf32>
    %c10 = arith.constant 10 : index
    %c0_141 = arith.constant 0 : index
    %421 = vector.load %arg6[%c10, %c0_141] : memref<12x16xf32, #tpu.memory_space<vmem>>, vector<2x16xf32>
    tpu.vector_store %arg6[%c10, %c0_141], %420 {strides = array<i32>} : memref<12x16xf32, #tpu.memory_space<vmem>>, vector<2x16xf32>,
    %c0_142 = arith.constant 0 : index
    %c0_143 = arith.constant 0 : index
    %422 = vector.load %arg6[%c0_142, %c0_143] : memref<12x16xf32, #tpu.memory_space<vmem>>, vector<12x16xf32>
    %c416 = arith.constant 416 : index
    %c0_144 = arith.constant 0 : index
    %423 = vector.load %arg1[%c416, %c0_144] : memref<480x128xbf16, #tpu.memory_space<vmem>>, vector<16x24xbf16>
    %c432 = arith.constant 432 : index
    %c0_145 = arith.constant 0 : index
    %424 = vector.load %arg1[%c432, %c0_145] : memref<480x128xbf16, #tpu.memory_space<vmem>>, vector<6x24xbf16>
    %c256_146 = arith.constant 256 : index
    %c0_147 = arith.constant 0 : index
    %425 = vector.load %arg4[%c256_146, %c0_147] : memref<304x128xf32, #tpu.memory_space<vmem>>, vector<1x24xf32>
    %c264 = arith.constant 264 : index
    %c0_148 = arith.constant 0 : index
    %426 = vector.load %arg4[%c264, %c0_148] : memref<304x128xf32, #tpu.memory_space<vmem>>, vector<2x6xf32>
    %c272_149 = arith.constant 272 : index
    %c0_150 = arith.constant 0 : index
    %427 = vector.load %arg4[%c272_149, %c0_150] : memref<304x128xf32, #tpu.memory_space<vmem>>, vector<2x6xf32>
    %428 = arith.truncf %422 : vector<12x16xf32> to vector<12x16xbf16>
    %cst_151 = arith.constant dense<0.000000e+00> : vector<12x24xf32>
    %429 = tpu.matmul %428, %423, %cst_151 {dimension_numbers = #tpu.dot_dimension_numbers<[1], [0], [0], [1], [0, 0, 1, 1], [], []>} : vector<12x16xbf16>, vector<16x24xbf16>, vector<12x24xf32> -> vector<12x24xf32>
    %430 = vector.broadcast %425 : vector<1x24xf32> to vector<12x24xf32>
    %431 = arith.addf %429, %430 : vector<12x24xf32>
    %432 = vector.extract_strided_slice %431 {offsets = [0, 0], sizes = [2, 24], strides = [1, 1]} : vector<12x24xf32> to vector<2x24xf32>
    %433 = arith.truncf %426 : vector<2x6xf32> to vector<2x6xbf16>
    %cst_152 = arith.constant dense<0.000000e+00> : vector<2x24xf32>
    %434 = tpu.matmul %433, %424, %cst_152 {dimension_numbers = #tpu.dot_dimension_numbers<[1], [0], [0], [1], [0, 0, 1, 1], [], []>} : vector<2x6xbf16>, vector<6x24xbf16>, vector<2x24xf32> -> vector<2x24xf32>
    %435 = arith.addf %432, %434 : vector<2x24xf32>
    %436 = vector.extract_strided_slice %435 {offsets = [0, 0], sizes = [2, 18], strides = [1, 1]} : vector<2x24xf32> to vector<2x18xf32>
    %437 = arith.negf %436 : vector<2x18xf32>
    %438 = math.exp %437 : vector<2x18xf32>
    %cst_153 = arith.constant 1.000000e+00 : f32
    %439 = vector.broadcast %cst_153 : f32 to vector<2x18xf32>
    %440 = arith.addf %439, %438 : vector<2x18xf32>
    %441 = arith.divf %439, %440 : vector<2x18xf32>
    %442 = vector.extract_strided_slice %435 {offsets = [0, 18], sizes = [2, 6], strides = [1, 1]} : vector<2x24xf32> to vector<2x6xf32>
    %443 = math.tanh %442 : vector<2x6xf32>
    %444 = vector.extract_strided_slice %441 {offsets = [0, 6], sizes = [2, 6], strides = [1, 1]} : vector<2x18xf32> to vector<2x6xf32>
    %445 = arith.mulf %444, %427 : vector<2x6xf32>
    %446 = vector.extract_strided_slice %441 {offsets = [0, 0], sizes = [2, 6], strides = [1, 1]} : vector<2x18xf32> to vector<2x6xf32>
    %447 = arith.mulf %446, %443 : vector<2x6xf32>
    %448 = arith.addf %445, %447 : vector<2x6xf32>
    %449 = vector.extract_strided_slice %441 {offsets = [0, 12], sizes = [2, 6], strides = [1, 1]} : vector<2x18xf32> to vector<2x6xf32>
    %450 = math.tanh %448 : vector<2x6xf32>
    %451 = arith.mulf %449, %450 : vector<2x6xf32>
    %c0_154 = arith.constant 0 : index
    %c0_155 = arith.constant 0 : index
    %452 = vector.load %arg7[%c0_154, %c0_155] : memref<12x6xf32, #tpu.memory_space<vmem>>, vector<2x6xf32>
    tpu.vector_store %arg7[%c0_154, %c0_155], %451 {strides = array<i32>} : memref<12x6xf32, #tpu.memory_space<vmem>>, vector<2x6xf32>,
    %453 = vector.extract_strided_slice %431 {offsets = [2, 0], sizes = [2, 24], strides = [1, 1]} : vector<12x24xf32> to vector<2x24xf32>
    %454 = arith.truncf %451 : vector<2x6xf32> to vector<2x6xbf16>
    %cst_156 = arith.constant dense<0.000000e+00> : vector<2x24xf32>
    %455 = tpu.matmul %454, %424, %cst_156 {dimension_numbers = #tpu.dot_dimension_numbers<[1], [0], [0], [1], [0, 0, 1, 1], [], []>} : vector<2x6xbf16>, vector<6x24xbf16>, vector<2x24xf32> -> vector<2x24xf32>
    %456 = arith.addf %453, %455 : vector<2x24xf32>
    %457 = vector.extract_strided_slice %456 {offsets = [0, 0], sizes = [2, 18], strides = [1, 1]} : vector<2x24xf32> to vector<2x18xf32>
    %458 = arith.negf %457 : vector<2x18xf32>
    %459 = math.exp %458 : vector<2x18xf32>
    %cst_157 = arith.constant 1.000000e+00 : f32
    %460 = vector.broadcast %cst_157 : f32 to vector<2x18xf32>
    %461 = arith.addf %460, %459 : vector<2x18xf32>
    %462 = arith.divf %460, %461 : vector<2x18xf32>
    %463 = vector.extract_strided_slice %456 {offsets = [0, 18], sizes = [2, 6], strides = [1, 1]} : vector<2x24xf32> to vector<2x6xf32>
    %464 = math.tanh %463 : vector<2x6xf32>
    %465 = vector.extract_strided_slice %462 {offsets = [0, 6], sizes = [2, 6], strides = [1, 1]} : vector<2x18xf32> to vector<2x6xf32>
    %466 = arith.mulf %465, %448 : vector<2x6xf32>
    %467 = vector.extract_strided_slice %462 {offsets = [0, 0], sizes = [2, 6], strides = [1, 1]} : vector<2x18xf32> to vector<2x6xf32>
    %468 = arith.mulf %467, %464 : vector<2x6xf32>
    %469 = arith.addf %466, %468 : vector<2x6xf32>
    %470 = vector.extract_strided_slice %462 {offsets = [0, 12], sizes = [2, 6], strides = [1, 1]} : vector<2x18xf32> to vector<2x6xf32>
    %471 = math.tanh %469 : vector<2x6xf32>
    %472 = arith.mulf %470, %471 : vector<2x6xf32>
    %c2_158 = arith.constant 2 : index
    %c0_159 = arith.constant 0 : index
    %473 = vector.load %arg7[%c2_158, %c0_159] : memref<12x6xf32, #tpu.memory_space<vmem>>, vector<2x6xf32>
    tpu.vector_store %arg7[%c2_158, %c0_159], %472 {strides = array<i32>} : memref<12x6xf32, #tpu.memory_space<vmem>>, vector<2x6xf32>,
    %474 = vector.extract_strided_slice %431 {offsets = [4, 0], sizes = [2, 24], strides = [1, 1]} : vector<12x24xf32> to vector<2x24xf32>
    %475 = arith.truncf %472 : vector<2x6xf32> to vector<2x6xbf16>
    %cst_160 = arith.constant dense<0.000000e+00> : vector<2x24xf32>
    %476 = tpu.matmul %475, %424, %cst_160 {dimension_numbers = #tpu.dot_dimension_numbers<[1], [0], [0], [1], [0, 0, 1, 1], [], []>} : vector<2x6xbf16>, vector<6x24xbf16>, vector<2x24xf32> -> vector<2x24xf32>
    %477 = arith.addf %474, %476 : vector<2x24xf32>
    %478 = vector.extract_strided_slice %477 {offsets = [0, 0], sizes = [2, 18], strides = [1, 1]} : vector<2x24xf32> to vector<2x18xf32>
    %479 = arith.negf %478 : vector<2x18xf32>
    %480 = math.exp %479 : vector<2x18xf32>
    %cst_161 = arith.constant 1.000000e+00 : f32
    %481 = vector.broadcast %cst_161 : f32 to vector<2x18xf32>
    %482 = arith.addf %481, %480 : vector<2x18xf32>
    %483 = arith.divf %481, %482 : vector<2x18xf32>
    %484 = vector.extract_strided_slice %477 {offsets = [0, 18], sizes = [2, 6], strides = [1, 1]} : vector<2x24xf32> to vector<2x6xf32>
    %485 = math.tanh %484 : vector<2x6xf32>
    %486 = vector.extract_strided_slice %483 {offsets = [0, 6], sizes = [2, 6], strides = [1, 1]} : vector<2x18xf32> to vector<2x6xf32>
    %487 = arith.mulf %486, %469 : vector<2x6xf32>
    %488 = vector.extract_strided_slice %483 {offsets = [0, 0], sizes = [2, 6], strides = [1, 1]} : vector<2x18xf32> to vector<2x6xf32>
    %489 = arith.mulf %488, %485 : vector<2x6xf32>
    %490 = arith.addf %487, %489 : vector<2x6xf32>
    %491 = vector.extract_strided_slice %483 {offsets = [0, 12], sizes = [2, 6], strides = [1, 1]} : vector<2x18xf32> to vector<2x6xf32>
    %492 = math.tanh %490 : vector<2x6xf32>
    %493 = arith.mulf %491, %492 : vector<2x6xf32>
    %c4_162 = arith.constant 4 : index
    %c0_163 = arith.constant 0 : index
    %494 = vector.load %arg7[%c4_162, %c0_163] : memref<12x6xf32, #tpu.memory_space<vmem>>, vector<2x6xf32>
    tpu.vector_store %arg7[%c4_162, %c0_163], %493 {strides = array<i32>} : memref<12x6xf32, #tpu.memory_space<vmem>>, vector<2x6xf32>,
    %495 = vector.extract_strided_slice %431 {offsets = [6, 0], sizes = [2, 24], strides = [1, 1]} : vector<12x24xf32> to vector<2x24xf32>
    %496 = arith.truncf %493 : vector<2x6xf32> to vector<2x6xbf16>
    %cst_164 = arith.constant dense<0.000000e+00> : vector<2x24xf32>
    %497 = tpu.matmul %496, %424, %cst_164 {dimension_numbers = #tpu.dot_dimension_numbers<[1], [0], [0], [1], [0, 0, 1, 1], [], []>} : vector<2x6xbf16>, vector<6x24xbf16>, vector<2x24xf32> -> vector<2x24xf32>
    %498 = arith.addf %495, %497 : vector<2x24xf32>
    %499 = vector.extract_strided_slice %498 {offsets = [0, 0], sizes = [2, 18], strides = [1, 1]} : vector<2x24xf32> to vector<2x18xf32>
    %500 = arith.negf %499 : vector<2x18xf32>
    %501 = math.exp %500 : vector<2x18xf32>
    %cst_165 = arith.constant 1.000000e+00 : f32
    %502 = vector.broadcast %cst_165 : f32 to vector<2x18xf32>
    %503 = arith.addf %502, %501 : vector<2x18xf32>
    %504 = arith.divf %502, %503 : vector<2x18xf32>
    %505 = vector.extract_strided_slice %498 {offsets = [0, 18], sizes = [2, 6], strides = [1, 1]} : vector<2x24xf32> to vector<2x6xf32>
    %506 = math.tanh %505 : vector<2x6xf32>
    %507 = vector.extract_strided_slice %504 {offsets = [0, 6], sizes = [2, 6], strides = [1, 1]} : vector<2x18xf32> to vector<2x6xf32>
    %508 = arith.mulf %507, %490 : vector<2x6xf32>
    %509 = vector.extract_strided_slice %504 {offsets = [0, 0], sizes = [2, 6], strides = [1, 1]} : vector<2x18xf32> to vector<2x6xf32>
    %510 = arith.mulf %509, %506 : vector<2x6xf32>
    %511 = arith.addf %508, %510 : vector<2x6xf32>
    %512 = vector.extract_strided_slice %504 {offsets = [0, 12], sizes = [2, 6], strides = [1, 1]} : vector<2x18xf32> to vector<2x6xf32>
    %513 = math.tanh %511 : vector<2x6xf32>
    %514 = arith.mulf %512, %513 : vector<2x6xf32>
    %c6_166 = arith.constant 6 : index
    %c0_167 = arith.constant 0 : index
    %515 = vector.load %arg7[%c6_166, %c0_167] : memref<12x6xf32, #tpu.memory_space<vmem>>, vector<2x6xf32>
    tpu.vector_store %arg7[%c6_166, %c0_167], %514 {strides = array<i32>} : memref<12x6xf32, #tpu.memory_space<vmem>>, vector<2x6xf32>,
    %516 = vector.extract_strided_slice %431 {offsets = [8, 0], sizes = [2, 24], strides = [1, 1]} : vector<12x24xf32> to vector<2x24xf32>
    %517 = arith.truncf %514 : vector<2x6xf32> to vector<2x6xbf16>
    %cst_168 = arith.constant dense<0.000000e+00> : vector<2x24xf32>
    %518 = tpu.matmul %517, %424, %cst_168 {dimension_numbers = #tpu.dot_dimension_numbers<[1], [0], [0], [1], [0, 0, 1, 1], [], []>} : vector<2x6xbf16>, vector<6x24xbf16>, vector<2x24xf32> -> vector<2x24xf32>
    %519 = arith.addf %516, %518 : vector<2x24xf32>
    %520 = vector.extract_strided_slice %519 {offsets = [0, 0], sizes = [2, 18], strides = [1, 1]} : vector<2x24xf32> to vector<2x18xf32>
    %521 = arith.negf %520 : vector<2x18xf32>
    %522 = math.exp %521 : vector<2x18xf32>
    %cst_169 = arith.constant 1.000000e+00 : f32
    %523 = vector.broadcast %cst_169 : f32 to vector<2x18xf32>
    %524 = arith.addf %523, %522 : vector<2x18xf32>
    %525 = arith.divf %523, %524 : vector<2x18xf32>
    %526 = vector.extract_strided_slice %519 {offsets = [0, 18], sizes = [2, 6], strides = [1, 1]} : vector<2x24xf32> to vector<2x6xf32>
    %527 = math.tanh %526 : vector<2x6xf32>
    %528 = vector.extract_strided_slice %525 {offsets = [0, 6], sizes = [2, 6], strides = [1, 1]} : vector<2x18xf32> to vector<2x6xf32>
    %529 = arith.mulf %528, %511 : vector<2x6xf32>
    %530 = vector.extract_strided_slice %525 {offsets = [0, 0], sizes = [2, 6], strides = [1, 1]} : vector<2x18xf32> to vector<2x6xf32>
    %531 = arith.mulf %530, %527 : vector<2x6xf32>
    %532 = arith.addf %529, %531 : vector<2x6xf32>
    %533 = vector.extract_strided_slice %525 {offsets = [0, 12], sizes = [2, 6], strides = [1, 1]} : vector<2x18xf32> to vector<2x6xf32>
    %534 = math.tanh %532 : vector<2x6xf32>
    %535 = arith.mulf %533, %534 : vector<2x6xf32>
    %c8_170 = arith.constant 8 : index
    %c0_171 = arith.constant 0 : index
    %536 = vector.load %arg7[%c8_170, %c0_171] : memref<12x6xf32, #tpu.memory_space<vmem>>, vector<2x6xf32>
    tpu.vector_store %arg7[%c8_170, %c0_171], %535 {strides = array<i32>} : memref<12x6xf32, #tpu.memory_space<vmem>>, vector<2x6xf32>,
    %537 = vector.extract_strided_slice %431 {offsets = [10, 0], sizes = [2, 24], strides = [1, 1]} : vector<12x24xf32> to vector<2x24xf32>
    %538 = arith.truncf %535 : vector<2x6xf32> to vector<2x6xbf16>
    %cst_172 = arith.constant dense<0.000000e+00> : vector<2x24xf32>
    %539 = tpu.matmul %538, %424, %cst_172 {dimension_numbers = #tpu.dot_dimension_numbers<[1], [0], [0], [1], [0, 0, 1, 1], [], []>} : vector<2x6xbf16>, vector<6x24xbf16>, vector<2x24xf32> -> vector<2x24xf32>
    %540 = arith.addf %537, %539 : vector<2x24xf32>
    %541 = vector.extract_strided_slice %540 {offsets = [0, 0], sizes = [2, 18], strides = [1, 1]} : vector<2x24xf32> to vector<2x18xf32>
    %542 = arith.negf %541 : vector<2x18xf32>
    %543 = math.exp %542 : vector<2x18xf32>
    %cst_173 = arith.constant 1.000000e+00 : f32
    %544 = vector.broadcast %cst_173 : f32 to vector<2x18xf32>
    %545 = arith.addf %544, %543 : vector<2x18xf32>
    %546 = arith.divf %544, %545 : vector<2x18xf32>
    %547 = vector.extract_strided_slice %540 {offsets = [0, 18], sizes = [2, 6], strides = [1, 1]} : vector<2x24xf32> to vector<2x6xf32>
    %548 = math.tanh %547 : vector<2x6xf32>
    %549 = vector.extract_strided_slice %546 {offsets = [0, 6], sizes = [2, 6], strides = [1, 1]} : vector<2x18xf32> to vector<2x6xf32>
    %550 = arith.mulf %549, %532 : vector<2x6xf32>
    %551 = vector.extract_strided_slice %546 {offsets = [0, 0], sizes = [2, 6], strides = [1, 1]} : vector<2x18xf32> to vector<2x6xf32>
    %552 = arith.mulf %551, %548 : vector<2x6xf32>
    %553 = arith.addf %550, %552 : vector<2x6xf32>
    %554 = vector.extract_strided_slice %546 {offsets = [0, 12], sizes = [2, 6], strides = [1, 1]} : vector<2x18xf32> to vector<2x6xf32>
    %555 = math.tanh %553 : vector<2x6xf32>
    %556 = arith.mulf %554, %555 : vector<2x6xf32>
    %c10_174 = arith.constant 10 : index
    %c0_175 = arith.constant 0 : index
    %557 = vector.load %arg7[%c10_174, %c0_175] : memref<12x6xf32, #tpu.memory_space<vmem>>, vector<2x6xf32>
    tpu.vector_store %arg7[%c10_174, %c0_175], %556 {strides = array<i32>} : memref<12x6xf32, #tpu.memory_space<vmem>>, vector<2x6xf32>,
    %c0_176 = arith.constant 0 : index
    %c0_177 = arith.constant 0 : index
    %558 = vector.load %arg7[%c0_176, %c0_177] : memref<12x6xf32, #tpu.memory_space<vmem>>, vector<12x6xf32>
    %c448 = arith.constant 448 : index
    %c0_178 = arith.constant 0 : index
    %559 = vector.load %arg1[%c448, %c0_178] : memref<480x128xbf16, #tpu.memory_space<vmem>>, vector<6x32xbf16>
    %c464 = arith.constant 464 : index
    %c0_179 = arith.constant 0 : index
    %560 = vector.load %arg1[%c464, %c0_179] : memref<480x128xbf16, #tpu.memory_space<vmem>>, vector<8x32xbf16>
    %c280 = arith.constant 280 : index
    %c0_180 = arith.constant 0 : index
    %561 = vector.load %arg4[%c280, %c0_180] : memref<304x128xf32, #tpu.memory_space<vmem>>, vector<1x32xf32>
    %c288_181 = arith.constant 288 : index
    %c0_182 = arith.constant 0 : index
    %562 = vector.load %arg4[%c288_181, %c0_182] : memref<304x128xf32, #tpu.memory_space<vmem>>, vector<2x8xf32>
    %c296 = arith.constant 296 : index
    %c0_183 = arith.constant 0 : index
    %563 = vector.load %arg4[%c296, %c0_183] : memref<304x128xf32, #tpu.memory_space<vmem>>, vector<2x8xf32>
    %564 = arith.truncf %558 : vector<12x6xf32> to vector<12x6xbf16>
    %cst_184 = arith.constant dense<0.000000e+00> : vector<12x32xf32>
    %565 = tpu.matmul %564, %559, %cst_184 {dimension_numbers = #tpu.dot_dimension_numbers<[1], [0], [0], [1], [0, 0, 1, 1], [], []>} : vector<12x6xbf16>, vector<6x32xbf16>, vector<12x32xf32> -> vector<12x32xf32>
    %566 = vector.broadcast %561 : vector<1x32xf32> to vector<12x32xf32>
    %567 = arith.addf %565, %566 : vector<12x32xf32>
    %568 = vector.extract_strided_slice %567 {offsets = [0, 0], sizes = [2, 32], strides = [1, 1]} : vector<12x32xf32> to vector<2x32xf32>
    %569 = arith.truncf %562 : vector<2x8xf32> to vector<2x8xbf16>
    %cst_185 = arith.constant dense<0.000000e+00> : vector<2x32xf32>
    %570 = tpu.matmul %569, %560, %cst_185 {dimension_numbers = #tpu.dot_dimension_numbers<[1], [0], [0], [1], [0, 0, 1, 1], [], []>} : vector<2x8xbf16>, vector<8x32xbf16>, vector<2x32xf32> -> vector<2x32xf32>
    %571 = arith.addf %568, %570 : vector<2x32xf32>
    %572 = vector.extract_strided_slice %571 {offsets = [0, 0], sizes = [2, 24], strides = [1, 1]} : vector<2x32xf32> to vector<2x24xf32>
    %573 = arith.negf %572 : vector<2x24xf32>
    %574 = math.exp %573 : vector<2x24xf32>
    %cst_186 = arith.constant 1.000000e+00 : f32
    %575 = vector.broadcast %cst_186 : f32 to vector<2x24xf32>
    %576 = arith.addf %575, %574 : vector<2x24xf32>
    %577 = arith.divf %575, %576 : vector<2x24xf32>
    %578 = vector.extract_strided_slice %571 {offsets = [0, 24], sizes = [2, 8], strides = [1, 1]} : vector<2x32xf32> to vector<2x8xf32>
    %579 = math.tanh %578 : vector<2x8xf32>
    %580 = vector.extract_strided_slice %577 {offsets = [0, 8], sizes = [2, 8], strides = [1, 1]} : vector<2x24xf32> to vector<2x8xf32>
    %581 = arith.mulf %580, %563 : vector<2x8xf32>
    %582 = vector.extract_strided_slice %577 {offsets = [0, 0], sizes = [2, 8], strides = [1, 1]} : vector<2x24xf32> to vector<2x8xf32>
    %583 = arith.mulf %582, %579 : vector<2x8xf32>
    %584 = arith.addf %581, %583 : vector<2x8xf32>
    %585 = vector.extract_strided_slice %577 {offsets = [0, 16], sizes = [2, 8], strides = [1, 1]} : vector<2x24xf32> to vector<2x8xf32>
    %586 = math.tanh %584 : vector<2x8xf32>
    %587 = arith.mulf %585, %586 : vector<2x8xf32>
    %c0_187 = arith.constant 0 : index
    %c0_188 = arith.constant 0 : index
    %588 = vector.load %arg8[%c0_187, %c0_188] : memref<2x48xf32, #tpu.memory_space<vmem>>, vector<2x8xf32>
    tpu.vector_store %arg8[%c0_187, %c0_188], %587 {strides = array<i32>} : memref<2x48xf32, #tpu.memory_space<vmem>>, vector<2x8xf32>,
    %589 = vector.extract_strided_slice %567 {offsets = [2, 0], sizes = [2, 32], strides = [1, 1]} : vector<12x32xf32> to vector<2x32xf32>
    %590 = arith.truncf %587 : vector<2x8xf32> to vector<2x8xbf16>
    %cst_189 = arith.constant dense<0.000000e+00> : vector<2x32xf32>
    %591 = tpu.matmul %590, %560, %cst_189 {dimension_numbers = #tpu.dot_dimension_numbers<[1], [0], [0], [1], [0, 0, 1, 1], [], []>} : vector<2x8xbf16>, vector<8x32xbf16>, vector<2x32xf32> -> vector<2x32xf32>
    %592 = arith.addf %589, %591 : vector<2x32xf32>
    %593 = vector.extract_strided_slice %592 {offsets = [0, 0], sizes = [2, 24], strides = [1, 1]} : vector<2x32xf32> to vector<2x24xf32>
    %594 = arith.negf %593 : vector<2x24xf32>
    %595 = math.exp %594 : vector<2x24xf32>
    %cst_190 = arith.constant 1.000000e+00 : f32
    %596 = vector.broadcast %cst_190 : f32 to vector<2x24xf32>
    %597 = arith.addf %596, %595 : vector<2x24xf32>
    %598 = arith.divf %596, %597 : vector<2x24xf32>
    %599 = vector.extract_strided_slice %592 {offsets = [0, 24], sizes = [2, 8], strides = [1, 1]} : vector<2x32xf32> to vector<2x8xf32>
    %600 = math.tanh %599 : vector<2x8xf32>
    %601 = vector.extract_strided_slice %598 {offsets = [0, 8], sizes = [2, 8], strides = [1, 1]} : vector<2x24xf32> to vector<2x8xf32>
    %602 = arith.mulf %601, %584 : vector<2x8xf32>
    %603 = vector.extract_strided_slice %598 {offsets = [0, 0], sizes = [2, 8], strides = [1, 1]} : vector<2x24xf32> to vector<2x8xf32>
    %604 = arith.mulf %603, %600 : vector<2x8xf32>
    %605 = arith.addf %602, %604 : vector<2x8xf32>
    %606 = vector.extract_strided_slice %598 {offsets = [0, 16], sizes = [2, 8], strides = [1, 1]} : vector<2x24xf32> to vector<2x8xf32>
    %607 = math.tanh %605 : vector<2x8xf32>
    %608 = arith.mulf %606, %607 : vector<2x8xf32>
    %c0_191 = arith.constant 0 : index
    %c8_192 = arith.constant 8 : index
    %609 = vector.load %arg8[%c0_191, %c8_192] : memref<2x48xf32, #tpu.memory_space<vmem>>, vector<2x8xf32>
    tpu.vector_store %arg8[%c0_191, %c8_192], %608 {strides = array<i32>} : memref<2x48xf32, #tpu.memory_space<vmem>>, vector<2x8xf32>,
    %610 = vector.extract_strided_slice %567 {offsets = [4, 0], sizes = [2, 32], strides = [1, 1]} : vector<12x32xf32> to vector<2x32xf32>
    %611 = arith.truncf %608 : vector<2x8xf32> to vector<2x8xbf16>
    %cst_193 = arith.constant dense<0.000000e+00> : vector<2x32xf32>
    %612 = tpu.matmul %611, %560, %cst_193 {dimension_numbers = #tpu.dot_dimension_numbers<[1], [0], [0], [1], [0, 0, 1, 1], [], []>} : vector<2x8xbf16>, vector<8x32xbf16>, vector<2x32xf32> -> vector<2x32xf32>
    %613 = arith.addf %610, %612 : vector<2x32xf32>
    %614 = vector.extract_strided_slice %613 {offsets = [0, 0], sizes = [2, 24], strides = [1, 1]} : vector<2x32xf32> to vector<2x24xf32>
    %615 = arith.negf %614 : vector<2x24xf32>
    %616 = math.exp %615 : vector<2x24xf32>
    %cst_194 = arith.constant 1.000000e+00 : f32
    %617 = vector.broadcast %cst_194 : f32 to vector<2x24xf32>
    %618 = arith.addf %617, %616 : vector<2x24xf32>
    %619 = arith.divf %617, %618 : vector<2x24xf32>
    %620 = vector.extract_strided_slice %613 {offsets = [0, 24], sizes = [2, 8], strides = [1, 1]} : vector<2x32xf32> to vector<2x8xf32>
    %621 = math.tanh %620 : vector<2x8xf32>
    %622 = vector.extract_strided_slice %619 {offsets = [0, 8], sizes = [2, 8], strides = [1, 1]} : vector<2x24xf32> to vector<2x8xf32>
    %623 = arith.mulf %622, %605 : vector<2x8xf32>
    %624 = vector.extract_strided_slice %619 {offsets = [0, 0], sizes = [2, 8], strides = [1, 1]} : vector<2x24xf32> to vector<2x8xf32>
    %625 = arith.mulf %624, %621 : vector<2x8xf32>
    %626 = arith.addf %623, %625 : vector<2x8xf32>
    %627 = vector.extract_strided_slice %619 {offsets = [0, 16], sizes = [2, 8], strides = [1, 1]} : vector<2x24xf32> to vector<2x8xf32>
    %628 = math.tanh %626 : vector<2x8xf32>
    %629 = arith.mulf %627, %628 : vector<2x8xf32>
    %c0_195 = arith.constant 0 : index
    %c16_196 = arith.constant 16 : index
    %630 = vector.load %arg8[%c0_195, %c16_196] : memref<2x48xf32, #tpu.memory_space<vmem>>, vector<2x8xf32>
    tpu.vector_store %arg8[%c0_195, %c16_196], %629 {strides = array<i32>} : memref<2x48xf32, #tpu.memory_space<vmem>>, vector<2x8xf32>,
    %631 = vector.extract_strided_slice %567 {offsets = [6, 0], sizes = [2, 32], strides = [1, 1]} : vector<12x32xf32> to vector<2x32xf32>
    %632 = arith.truncf %629 : vector<2x8xf32> to vector<2x8xbf16>
    %cst_197 = arith.constant dense<0.000000e+00> : vector<2x32xf32>
    %633 = tpu.matmul %632, %560, %cst_197 {dimension_numbers = #tpu.dot_dimension_numbers<[1], [0], [0], [1], [0, 0, 1, 1], [], []>} : vector<2x8xbf16>, vector<8x32xbf16>, vector<2x32xf32> -> vector<2x32xf32>
    %634 = arith.addf %631, %633 : vector<2x32xf32>
    %635 = vector.extract_strided_slice %634 {offsets = [0, 0], sizes = [2, 24], strides = [1, 1]} : vector<2x32xf32> to vector<2x24xf32>
    %636 = arith.negf %635 : vector<2x24xf32>
    %637 = math.exp %636 : vector<2x24xf32>
    %cst_198 = arith.constant 1.000000e+00 : f32
    %638 = vector.broadcast %cst_198 : f32 to vector<2x24xf32>
    %639 = arith.addf %638, %637 : vector<2x24xf32>
    %640 = arith.divf %638, %639 : vector<2x24xf32>
    %641 = vector.extract_strided_slice %634 {offsets = [0, 24], sizes = [2, 8], strides = [1, 1]} : vector<2x32xf32> to vector<2x8xf32>
    %642 = math.tanh %641 : vector<2x8xf32>
    %643 = vector.extract_strided_slice %640 {offsets = [0, 8], sizes = [2, 8], strides = [1, 1]} : vector<2x24xf32> to vector<2x8xf32>
    %644 = arith.mulf %643, %626 : vector<2x8xf32>
    %645 = vector.extract_strided_slice %640 {offsets = [0, 0], sizes = [2, 8], strides = [1, 1]} : vector<2x24xf32> to vector<2x8xf32>
    %646 = arith.mulf %645, %642 : vector<2x8xf32>
    %647 = arith.addf %644, %646 : vector<2x8xf32>
    %648 = vector.extract_strided_slice %640 {offsets = [0, 16], sizes = [2, 8], strides = [1, 1]} : vector<2x24xf32> to vector<2x8xf32>
    %649 = math.tanh %647 : vector<2x8xf32>
    %650 = arith.mulf %648, %649 : vector<2x8xf32>
    %c0_199 = arith.constant 0 : index
    %c24 = arith.constant 24 : index
    %651 = vector.load %arg8[%c0_199, %c24] : memref<2x48xf32, #tpu.memory_space<vmem>>, vector<2x8xf32>
    tpu.vector_store %arg8[%c0_199, %c24], %650 {strides = array<i32>} : memref<2x48xf32, #tpu.memory_space<vmem>>, vector<2x8xf32>,
    %652 = vector.extract_strided_slice %567 {offsets = [8, 0], sizes = [2, 32], strides = [1, 1]} : vector<12x32xf32> to vector<2x32xf32>
    %653 = arith.truncf %650 : vector<2x8xf32> to vector<2x8xbf16>
    %cst_200 = arith.constant dense<0.000000e+00> : vector<2x32xf32>
    %654 = tpu.matmul %653, %560, %cst_200 {dimension_numbers = #tpu.dot_dimension_numbers<[1], [0], [0], [1], [0, 0, 1, 1], [], []>} : vector<2x8xbf16>, vector<8x32xbf16>, vector<2x32xf32> -> vector<2x32xf32>
    %655 = arith.addf %652, %654 : vector<2x32xf32>
    %656 = vector.extract_strided_slice %655 {offsets = [0, 0], sizes = [2, 24], strides = [1, 1]} : vector<2x32xf32> to vector<2x24xf32>
    %657 = arith.negf %656 : vector<2x24xf32>
    %658 = math.exp %657 : vector<2x24xf32>
    %cst_201 = arith.constant 1.000000e+00 : f32
    %659 = vector.broadcast %cst_201 : f32 to vector<2x24xf32>
    %660 = arith.addf %659, %658 : vector<2x24xf32>
    %661 = arith.divf %659, %660 : vector<2x24xf32>
    %662 = vector.extract_strided_slice %655 {offsets = [0, 24], sizes = [2, 8], strides = [1, 1]} : vector<2x32xf32> to vector<2x8xf32>
    %663 = math.tanh %662 : vector<2x8xf32>
    %664 = vector.extract_strided_slice %661 {offsets = [0, 8], sizes = [2, 8], strides = [1, 1]} : vector<2x24xf32> to vector<2x8xf32>
    %665 = arith.mulf %664, %647 : vector<2x8xf32>
    %666 = vector.extract_strided_slice %661 {offsets = [0, 0], sizes = [2, 8], strides = [1, 1]} : vector<2x24xf32> to vector<2x8xf32>
    %667 = arith.mulf %666, %663 : vector<2x8xf32>
    %668 = arith.addf %665, %667 : vector<2x8xf32>
    %669 = vector.extract_strided_slice %661 {offsets = [0, 16], sizes = [2, 8], strides = [1, 1]} : vector<2x24xf32> to vector<2x8xf32>
    %670 = math.tanh %668 : vector<2x8xf32>
    %671 = arith.mulf %669, %670 : vector<2x8xf32>
    %c0_202 = arith.constant 0 : index
    %c32_203 = arith.constant 32 : index
    %672 = vector.load %arg8[%c0_202, %c32_203] : memref<2x48xf32, #tpu.memory_space<vmem>>, vector<2x8xf32>
    tpu.vector_store %arg8[%c0_202, %c32_203], %671 {strides = array<i32>} : memref<2x48xf32, #tpu.memory_space<vmem>>, vector<2x8xf32>,
    %673 = vector.extract_strided_slice %567 {offsets = [10, 0], sizes = [2, 32], strides = [1, 1]} : vector<12x32xf32> to vector<2x32xf32>
    %674 = arith.truncf %671 : vector<2x8xf32> to vector<2x8xbf16>
    %cst_204 = arith.constant dense<0.000000e+00> : vector<2x32xf32>
    %675 = tpu.matmul %674, %560, %cst_204 {dimension_numbers = #tpu.dot_dimension_numbers<[1], [0], [0], [1], [0, 0, 1, 1], [], []>} : vector<2x8xbf16>, vector<8x32xbf16>, vector<2x32xf32> -> vector<2x32xf32>
    %676 = arith.addf %673, %675 : vector<2x32xf32>
    %677 = vector.extract_strided_slice %676 {offsets = [0, 0], sizes = [2, 24], strides = [1, 1]} : vector<2x32xf32> to vector<2x24xf32>
    %678 = arith.negf %677 : vector<2x24xf32>
    %679 = math.exp %678 : vector<2x24xf32>
    %cst_205 = arith.constant 1.000000e+00 : f32
    %680 = vector.broadcast %cst_205 : f32 to vector<2x24xf32>
    %681 = arith.addf %680, %679 : vector<2x24xf32>
    %682 = arith.divf %680, %681 : vector<2x24xf32>
    %683 = vector.extract_strided_slice %676 {offsets = [0, 24], sizes = [2, 8], strides = [1, 1]} : vector<2x32xf32> to vector<2x8xf32>
    %684 = math.tanh %683 : vector<2x8xf32>
    %685 = vector.extract_strided_slice %682 {offsets = [0, 8], sizes = [2, 8], strides = [1, 1]} : vector<2x24xf32> to vector<2x8xf32>
    %686 = arith.mulf %685, %668 : vector<2x8xf32>
    %687 = vector.extract_strided_slice %682 {offsets = [0, 0], sizes = [2, 8], strides = [1, 1]} : vector<2x24xf32> to vector<2x8xf32>
    %688 = arith.mulf %687, %684 : vector<2x8xf32>
    %689 = arith.addf %686, %688 : vector<2x8xf32>
    %690 = vector.extract_strided_slice %682 {offsets = [0, 16], sizes = [2, 8], strides = [1, 1]} : vector<2x24xf32> to vector<2x8xf32>
    %691 = math.tanh %689 : vector<2x8xf32>
    %692 = arith.mulf %690, %691 : vector<2x8xf32>
    %c0_206 = arith.constant 0 : index
    %c40 = arith.constant 40 : index
    %693 = vector.load %arg8[%c0_206, %c40] : memref<2x48xf32, #tpu.memory_space<vmem>>, vector<2x8xf32>
    tpu.vector_store %arg8[%c0_206, %c40], %692 {strides = array<i32>} : memref<2x48xf32, #tpu.memory_space<vmem>>, vector<2x8xf32>,
    %c0_207 = arith.constant 0 : index
    %c0_208 = arith.constant 0 : index
    %694 = vector.load %arg8[%c0_207, %c0_208] : memref<2x48xf32, #tpu.memory_space<vmem>>, vector<2x48xf32>
    %c0_209 = arith.constant 0 : index
    %c0_210 = arith.constant 0 : index
    %695 = vector.load %arg2[%c0_209, %c0_210] : memref<49x512xbf16, #tpu.memory_space<vmem>>, vector<48x512xbf16>
    %696 = arith.truncf %694 : vector<2x48xf32> to vector<2x48xbf16>
    %cst_211 = arith.constant dense<0.000000e+00> : vector<2x512xf32>
    %697 = tpu.matmul %696, %695, %cst_211 {dimension_numbers = #tpu.dot_dimension_numbers<[1], [0], [0], [1], [0, 0, 1, 1], [], []>} : vector<2x48xbf16>, vector<48x512xbf16>, vector<2x512xf32> -> vector<2x512xf32>
    %c48_212 = arith.constant 48 : index
    %c0_213 = arith.constant 0 : index
    %698 = vector.load %arg2[%c48_212, %c0_213] : memref<49x512xbf16, #tpu.memory_space<vmem>>, vector<1x512xbf16>
    %699 = arith.extf %698 : vector<1x512xbf16> to vector<1x512xf32>
    %700 = vector.broadcast %699 : vector<1x512xf32> to vector<2x512xf32>
    %701 = arith.addf %697, %700 : vector<2x512xf32>
    %c0_214 = arith.constant 0 : index
    %c0_215 = arith.constant 0 : index
    %702 = vector.load %arg3[%c0_214, %c0_215] : memref<513x5xbf16, #tpu.memory_space<vmem>>, vector<512x5xbf16>
    %703 = arith.truncf %701 : vector<2x512xf32> to vector<2x512xbf16>
    %cst_216 = arith.constant dense<0.000000e+00> : vector<2x5xf32>
    %704 = tpu.matmul %703, %702, %cst_216 {dimension_numbers = #tpu.dot_dimension_numbers<[1], [0], [0], [1], [0, 0, 1, 1], [], []>} : vector<2x512xbf16>, vector<512x5xbf16>, vector<2x5xf32> -> vector<2x5xf32>
    %c512 = arith.constant 512 : index
    %c0_217 = arith.constant 0 : index
    %705 = vector.load %arg3[%c512, %c0_217] : memref<513x5xbf16, #tpu.memory_space<vmem>>, vector<1x5xbf16>
    %706 = arith.extf %705 : vector<1x5xbf16> to vector<1x5xf32>
    %707 = vector.broadcast %706 : vector<1x5xf32> to vector<2x5xf32>
    %708 = arith.addf %704, %707 : vector<2x5xf32>
    %c0_218 = arith.constant 0 : index
    %c0_219 = arith.constant 0 : index
    %709 = vector.load %arg5[%c0_218, %c0_219] : memref<2x5xf32, #tpu.memory_space<vmem>>, vector<2x5xf32>
    tpu.vector_store %arg5[%c0_218, %c0_219], %708 {strides = array<i32>} : memref<2x5xf32, #tpu.memory_space<vmem>>, vector<2x5xf32>,
    return
  }
}

</mosaic_0001>

<bundles_post_ra>
// kernel: forward.1
= control target key start
LH: loop header
LB: loop body
LE: loop exit
PB: predicated region body
PF: predicated region fallthrough
CT: control target
= control target key end

     0   :  { %10 = vsyncpa [#allocation6], 0  ;;  %s4391_s0 = inlined_call_operand.vmem [shape: f32[8,32], index: 0, kind: input, shape index: {}]   ;;  %s4392_s1 = inlined_call_operand.hbm [shape: bf16[480,128], index: 1, kind: input, shape index: {}]   ;;  %s4393_s2 = inlined_call_operand.hbm [shape: bf16[49,512], index: 2, kind: input, shape index: {}]   ;;  %s4394_s3 = inlined_call_operand.vmem [shape: bf16[513,5], index: 3, kind: input, shape index: {}]   ;;  %s4395_s4 = inlined_call_operand.vmem [shape: f32[304,128], index: 4, kind: input, shape index: {}]   ;;  %s4396_s5 = inlined_call_operand.hbm [shape: f32[2,5], index: 5, kind: output, shape index: {}]  }
   0x1   :  { %11 = vsyncpa [#allocation9], 0 }
   0x2   :  { %12 = vsyncpa [#allocation7], 0  ;;  %s19_s20 = sshll.u32 %s4392_s1, 4  ;;  %s3724_s21 = smov [#allocation5]   ;;  %s20_s20 = int_to_ptr.hbm [resolvable:$true] %s19_s20 }
   0x3   :  { %s21_s22 = sshll.u32 %s3724_s21, 4  ;;  %s32_s25 = sshll.u32 %s4393_s2, 4  ;;  %s22_s22 = int_to_ptr.vmem [resolvable:$true] %s21_s22  ;;  %s33_s25 = int_to_ptr.hbm [resolvable:$true] %s32_s25 }
   0x4   :  { %s3725_s26 = smov 64   ;;  %s3726_s27 = smov 4  }
   0x5   :  { %27 = dma.hbm_to_vmem [thread:$0]  %s20_s20, 3840, %s22_s22, [#allocation6], %s3725_s26, %s3725_s26, %s3726_s27  }
   0x6   :  { %s3727_s28 = smov [#allocation8]   ;;  %s3728_s30 = smov 256  }
   0x7   :  { %s34_s29 = sshll.u32 %s3727_s28, 4  ;;  %s3729_s6 = smov 16   ;;  %s35_s29 = int_to_ptr.vmem [resolvable:$true] %s34_s29 }
   0x8   :  { %40 = dma.hbm_to_vmem [thread:$0]  %s33_s25, 1792, %s35_s29, [#allocation9], %s3728_s30, %s3728_s30, %s3729_s6  }
   0x9   :  { %3718 = dma.done.wait [#allocation6], 3840  }
   0xa   :  { %3719 = vsyncadd [#allocation6], 4294963456 }
   0xb   :  { %3720 = dma.done.wait [#allocation9], 1792  }
   0xc   :  { %3721 = vsyncadd [#allocation9], 4294965504  ;;  %v68_v0 = vld [vmem:[%s4391_s0] sm:$0xff]  ;;  %s3730_s2 = smov 2   ;;  %v54_v1 = vlaneseq  ;;  %vm73_vm0 = vcmask 15360   ;;  %s3731_s8 = smov 127  }
   0xd   :  { %70 = vrot.lane.b32.xlu0 %v68_v0, %s3730_s2  ;;  %vm93_vm2 = vcmask 1043456   ;;  %s3732_s0 = smov 126   ;;  %v3017_v11 = vld [vmem:[#allocation5] sm:$0xf]  ;;  %v3344_v12 = vld [vmem:[#allocation5] sm:$0x30]  ;;  %v329_v17 = vpack.c.bf16 %v68_v0, %v68_v0 }
   0xe   :  { %v55_v2 = vand.u32 127, %v54_v1  ;;  %v3018_v13 = vor.u32 %v3344_v12, %v3017_v11  ;;  %vm89_vm3 = vcmask 64512   ;;  %v75_v14 = vld [vmem:[%s4395_s4] sm:$0xff]  ;;  %v76_v15 = vld [vmem:[%s4395_s4 + $0x8] sm:$0xf]  ;;  %v3733_v16 = vmov 0  }
   0xf   :  { %3430 = vset.pattern.permute.xlu1 %v3733_v16  ;;  %3431 = vset.pattern.permute.xlu2 %v3733_v16  ;;  %v3027_v20 = vld [vmem:[#allocation5 + $0x20] sm:$0xf]  ;;  %v3346_v21 = vld [vmem:[#allocation5 + $0x20] sm:$0x30]  ;;  %v3022_v23 = vld [vmem:[#allocation5 + $0x10] sm:$0xf] }
  0x10   :  { %v60_v3 = vand.u32 15, %v55_v2  ;;  %118 = vperm.xlu2 %3431, %v76_v15   ;;  %3442 = vset.pattern.permute.xlu0 %v3733_v16  ;;  %v3345_v24 = vld [vmem:[#allocation5 + $0x10] sm:$0x30]  ;;  %v351_v27 = vsel %vm93_vm2, %v329_v17, 0  ;;  %v3028_v29 = vor.u32 %v3346_v21, %v3027_v20  ;;  %v3047_v32 = vld [vmem:[#allocation5 + $0x30] sm:$0xf] }
  0x11   :  { %v3023_v31 = vor.u32 %v3345_v24, %v3022_v23  ;;  %v3350_v33 = vld [vmem:[#allocation5 + $0x30] sm:$0x30]  ;;  %v331_v53 = vld [vmem:[%s4395_s4 + $0x28] sm:$0xf]  ;;  %vm222_vm5 = vcmask 1045504   ;;  %vm218_vm6 = vcmask 97280  }
  0x12   :  { %vm3786_vm1 = vcmp.ge.s32.totalorder %v60_v3, 2  ;;  %vm3803_vm4 = vcmp.ge.s32.totalorder %v60_v3, 1  ;;  %v3048_v34 = vor.u32 %v3350_v33, %v3047_v32  ;;  %v206_v52 = vld [vmem:[%s4395_s4 + $0x10] sm:$0xff]  ;;  %v3032_v63 = vld [vmem:[#allocation5 + $0x8] sm:$0xf]  ;;  %vm526_vm7 = vcmask 1044480  }
  0x13   :  { %v3347_v0 = vld [vmem:[#allocation5 + $0x8] sm:$0x30]  ;;  %v3037_v17 = vld [vmem:[#allocation5 + $0x18] sm:$0xf]  ;;  %vm522_vm8 = vcmask 80896   ;;  %vm786_vm9 = vcmask 1042432  }
  0x14   :  { %v3033_v3 = vor.u32 %v3347_v0, %v3032_v63  ;;  %vm782_vm10 = vcmask 48128   ;;  %vm908_vm11 = vcmask 130048   ;;  %vm1152_vm12 = vcmask 392192   ;;  %s3736_s20 = smov 80   ;;  %s3737_s27 = smov 6  }
  0x15   :  { %s3738_s30 = smov 110   ;;  %s3739_s1 = smov 116  }
  0x16   :  { %s3740_s12 = smov 8   ;;  %s3744_s21 = smov [#allocation10]  }
  0x17   :  { %s3002_s22 = sshll.u32 %s3744_s21, 4  ;;  %s3004_s25 = sshll.u32 %s4396_s5, 4  ;;  %s3003_s22 = int_to_ptr.vmem [resolvable:$true] %s3002_s22  ;;  %s3005_s25 = int_to_ptr.hbm [resolvable:$true] %s3004_s25 }
  0x6a   :  { %v119_v40 = vpop.permute.xlu2 %118 }
  0x7f   :  { %v71_v5 = vpop.permute.xlu0 %70 }
  0x80   :  { %v74_v6 = vsel %vm73_vm0, 0.0, %v71_v5  ;;  %v330_v5 = vld [vmem:[%s4395_s4 + $0x20] sm:$0xff] }
  0x81   :  { %127 = vrot.lane.b32.xlu1 %v74_v6, %s3731_s8  ;;  %v163_v7 = vpack.c.bf16 %v74_v6, %v74_v6  ;;  %v80_v8 = vsel %vm3786_vm1, %v74_v6, 0.0  ;;  %v207_v6 = vld [vmem:[%s4395_s4 + $0x18] sm:$0xf] }
  0x82   :  { %v83_v9 = vpack.c.bf16 %v80_v8, %v80_v8  ;;  %v3349_v8 = vld [vmem:[#allocation5 + $0x28] sm:$0x30] }
  0x83   :  { %170 = vrot.lane.b32.xlu0 %v163_v7, %s3732_s0  ;;  %v3042_v7 = vld [vmem:[#allocation5 + $0x28] sm:$0xf] }
  0x84   :  { %v95_v10 = vsel %vm93_vm2, %v83_v9, 0 }
  0x85   :  { %104 = vmatpush.bf16.msra.mxu0 %v95_v10 }
  0x88   :  { %3019 = vmatmul.msk.bf16.vlgmr.msra.gmra.mxu0 %vm89_vm3, %v3018_v13 }
  0x89   :  { %113 = vperm.xlu1 %3430, %v75_v14   ;;  %v3043_v14 = vor.u32 %v3349_v8, %v3042_v7 }
  0xf3   :  { %v128_v19 = vpop.permute.xlu1 %127 }
  0xf4   :  { %v130_v22 = vsel %vm3803_vm4, %v128_v19, 0.0  ;;  %v3348_v19 = vld [vmem:[#allocation5 + $0x18] sm:$0x30] }
  0xf5   :  { %v133_v25 = vpack.c.bf16 %v130_v22, %v130_v22  ;;  %v171_v26 = vpop.permute.xlu0 %170  ;;  %v3038_v22 = vor.u32 %v3348_v19, %v3037_v17 }
  0xf6   :  { %v176_v28 = vsel %vm93_vm2, %v171_v26, 0 }
  0xf7   :  { %185 = vmatpush.bf16.msra.mxu2 %v176_v28  ;;  %v143_v30 = vsel %vm93_vm2, %v133_v25, 0 }
  0xf8   :  { %152 = vmatpush.bf16.msra.mxu1 %v143_v30 }
  0xfa   :  { %3029 = vmatmul.msk.bf16.vlgmr.msra.gmra.mxu2 %vm89_vm3, %v3028_v29 }
  0xfb   :  { %360 = vmatpush.bf16.msrb.mxu2 %v351_v27  ;;  %3024 = vmatmul.msk.bf16.vlgmr.msra.gmra.mxu1 %vm89_vm3, %v3023_v31  ;;  %v114_v37 = vpop.permute.xlu1 %113 }
 0x105   :  { %v106_v35 = vpop.f32.mrf.mxu0 }
 0x106   :  { %v121_v38 = vadd.f32 %v114_v37, %v106_v35 }
 0x10a   :  { %3049 = vmatmul.msk.bf16.vlgmr.msrb.gmra.mxu2 %vm89_vm3, %v3048_v34 }
 0x10d   :  { %v108_v41 = vpop.f32.mrf.mxu0 }
 0x10e   :  { %v122_v44 = vadd.f32 %v119_v40, %v108_v41 }
 0x178   :  { %v154_v36 = vpop.f32.mrf.mxu1 }
 0x179   :  { %v159_v42 = vadd.f32 %v154_v36, %v121_v38 }
 0x17d   :  { %v187_v39 = vpop.f32.mrf.mxu2 }
 0x17e   :  { %v192_v45 = vadd.f32 %v187_v39, %v159_v42 }
 0x180   :  { %v156_v43 = vpop.f32.mrf.mxu1  ;;  %v194_v49 = vmax.f32 %v192_v45, 0.0 }
 0x181   :  { %v160_v46 = vadd.f32 %v156_v43, %v122_v44 }
 0x185   :  { %v189_v47 = vpop.f32.mrf.mxu2 }
 0x186   :  { %v193_v48 = vadd.f32 %v189_v47, %v160_v46 }
 0x188   :  { %v195_v50 = vmax.f32 %v193_v48, 0.0 }
 0x18a   :  { %v3432_v51 = vpack.i.bf16 %v195_v50, %v194_v49 }
 0x18c   :  { %3433 = vrot.lane.b32.xlu2 %v3432_v51, %s3730_s2  ;;  %v381_v51 = vld [vmem:[%s4395_s4 + $0x30] sm:$0xff] }
 0x18d   :  { %v362_v25 = vpop.f32.mrf.mxu2 }
 0x194   :  { %242 = vperm.xlu2 %3431, %v206_v52  }
 0x195   :  { %v364_v36 = vpop.f32.mrf.mxu2 }
 0x19c   :  { %339 = vperm.xlu2 %3431, %v331_v53  }
 0x1e6   :  { %v3434_v54 = vpop.permute.xlu2 %3433 }
 0x1e7   :  { %v3436_v55 = vunpack.i.h.bf16 %v3434_v54  ;;  %v3435_v56 = vunpack.i.l.bf16 %v3434_v54 }
 0x1e9   :  { %v205_v57 = vsel %vm73_vm0, 0.0, %v3436_v55  ;;  %v204_v58 = vsel %vm73_vm0, 0.0, %v3435_v56 }
 0x1ea   :  { %v3437_v59 = vpack.i.bf16 %v205_v57, %v204_v58  ;;  %v294_v60 = vpack.c.bf16 %v205_v57, %v204_v58  ;;  %v208_v61 = vsel %vm3786_vm1, %v204_v58, 0.0  ;;  %v209_v62 = vsel %vm3786_vm1, %v205_v57, 0.0 }
 0x1eb   :  { %v212_v1 = vpack.c.bf16 %v209_v62, %v208_v61  ;;  %v3052_v61 = vld [vmem:[#allocation5 + $0x38] sm:$0xf]  ;;  %v3351_v62 = vld [vmem:[#allocation5 + $0x38] sm:$0x10] }
 0x1ec   :  { %3438 = vrot.lane.b32.xlu0 %v3437_v59, %s3731_s8  ;;  %301 = vrot.lane.b32.xlu1 %v294_v60, %s3732_s0 }
 0x1ed   :  { %v224_v2 = vsel %vm222_vm5, %v212_v1, 0  ;;  %v3053_v1 = vor.u32 %v3351_v62, %v3052_v61  ;;  %v3356_v61 = vld [vmem:[#allocation5 + $0x60] sm:$0x10] }
 0x1ee   :  { %233 = vmatpush.bf16.msra.mxu3 %v224_v2  ;;  %v243_v24 = vpop.permute.xlu2 %242  ;;  %v382_v2 = vld [vmem:[%s4395_s4 + $0x38] sm:$0x3] }
 0x1f1   :  { %3034 = vmatmul.msk.bf16.vlgmr.msra.gmra.mxu3 %vm218_vm6, %v3033_v3 }
 0x1f4   :  { %334 = vperm.xlu1 %3430, %v330_v5   ;;  %247 = vperm.xlu0 %3442, %v207_v6  }
 0x1f6   :  { %v340_v39 = vpop.permute.xlu2 %339 }
 0x1f7   :  { %v365_v43 = vadd.f32 %v364_v36, %v340_v39 }
 0x25e   :  { %v3439_v9 = vpop.permute.xlu0 %3438  ;;  %v302_v10 = vpop.permute.xlu1 %301 }
 0x25f   :  { %v3441_v11 = vunpack.i.h.bf16 %v3439_v9  ;;  %v3440_v12 = vunpack.i.l.bf16 %v3439_v9  ;;  %v307_v13 = vsel %vm222_vm5, %v302_v10, 0  ;;  %v3057_v9 = vld [vmem:[#allocation5 + $0x48] sm:$0xf]  ;;  %v3352_v10 = vld [vmem:[#allocation5 + $0x48] sm:$0x10] }
 0x260   :  { %316 = vmatpush.bf16.msrb.mxu1 %v307_v13  ;;  %v3058_v13 = vor.u32 %v3352_v10, %v3057_v9 }
 0x261   :  { %v260_v15 = vsel %vm3803_vm4, %v3440_v12, 0.0  ;;  %v261_v16 = vsel %vm3803_vm4, %v3441_v11, 0.0 }
 0x262   :  { %v264_v20 = vpack.c.bf16 %v261_v16, %v260_v15  ;;  %v3353_v15 = vld [vmem:[#allocation5 + $0x58] sm:$0x10] }
 0x263   :  { %3044 = vmatmul.msk.bf16.vlgmr.msrb.gmra.mxu1 %vm218_vm6, %v3043_v14  ;;  %v3062_v14 = vld [vmem:[#allocation5 + $0x58] sm:$0xf] }
 0x264   :  { %v274_v21 = vsel %vm222_vm5, %v264_v20, 0  ;;  %v3063_v19 = vor.u32 %v3353_v15, %v3062_v14 }
 0x265   :  { %283 = vmatpush.bf16.msrb.mxu0 %v274_v21  ;;  %v3082_v21 = vld [vmem:[#allocation5 + $0x68] sm:$0xf] }
 0x266   :  { %v248_v30 = vpop.permute.xlu0 %247  ;;  %v335_v34 = vpop.permute.xlu1 %334 }
 0x267   :  { %v363_v41 = vadd.f32 %v362_v25, %v335_v34 }
 0x268   :  { %3039 = vmatmul.msk.bf16.vlgmr.msrb.gmra.mxu0 %vm218_vm6, %v3038_v22  ;;  %v3357_v22 = vld [vmem:[#allocation5 + $0x68] sm:$0x10] }
 0x274   :  { %v235_v23 = vpop.f32.mrf.mxu3 }
 0x275   :  { %v250_v26 = vadd.f32 %v243_v24, %v235_v23  ;;  %v3083_v23 = vor.u32 %v3357_v22, %v3082_v21 }
 0x27c   :  { %v237_v31 = vpop.f32.mrf.mxu3 }
 0x27d   :  { %v251_v33 = vadd.f32 %v248_v30, %v237_v31 }
 0x2e0   :  { %v318_v27 = vpop.f32.mrf.mxu1 }
 0x2e5   :  { %v285_v28 = vpop.f32.mrf.mxu0 }
 0x2e6   :  { %v290_v29 = vadd.f32 %v285_v28, %v250_v26 }
 0x2e8   :  { %v323_v32 = vadd.f32 %v318_v27, %v290_v29  ;;  %v320_v40 = vpop.f32.mrf.mxu1 }
 0x2ea   :  { %v325_v37 = vmax.f32 %v323_v32, 0.0 }
 0x2ec   :  { %v367_v44 = vadd.f32 %v363_v41, %v325_v37  ;;  %v510_v41 = vld [vmem:[%s4395_s4 + $0x40] sm:$0xff] }
 0x2ed   :  { %v287_v35 = vpop.f32.mrf.mxu0 }
 0x2ee   :  { %v291_v38 = vadd.f32 %v287_v35, %v251_v33  ;;  %v369_v47 = vmax.f32 %v367_v44, 0.0 }
 0x2f0   :  { %v324_v42 = vadd.f32 %v320_v40, %v291_v38 }
 0x2f2   :  { %v326_v45 = vmax.f32 %v324_v42, 0.0  ;;  %v635_v42 = vld [vmem:[%s4395_s4 + $0x58] sm:$0x3] }
 0x2f4   :  { %v368_v46 = vadd.f32 %v365_v43, %v326_v45 }
 0x2f6   :  { %v370_v48 = vmax.f32 %v368_v46, 0.0 }
 0x2f8   :  { %v3443_v49 = vpack.i.bf16 %v370_v48, %v369_v47  ;;  %v633_v50 = vpack.c.bf16 %v370_v48, %v369_v47 }
 0x2fa   :  { %3444 = vrot.lane.b32.xlu1 %v3443_v49, %s3730_s2  ;;  %v655_v20 = vsel %vm222_vm5, %v633_v50, 0 }
 0x302   :  { %415 = vperm.xlu1 %3430, %v381_v51  }
 0x36c   :  { %v3445_v52 = vpop.permute.xlu1 %3444 }
 0x36d   :  { %v3447_v53 = vunpack.i.h.bf16 %v3445_v52  ;;  %v3446_v54 = vunpack.i.l.bf16 %v3445_v52  ;;  %v3067_v52 = vld [vmem:[#allocation5 + $0x40] sm:$0xf] }
 0x36f   :  { %v380_v55 = vsel %vm73_vm0, 0.0, %v3447_v53  ;;  %v379_v56 = vsel %vm73_vm0, 0.0, %v3446_v54  ;;  %v3354_v53 = vld [vmem:[#allocation5 + $0x40] sm:$0x10] }
 0x370   :  { %v3448_v57 = vpack.i.bf16 %v380_v55, %v379_v56  ;;  %v467_v58 = vpack.c.bf16 %v380_v55, %v379_v56  ;;  %v383_v59 = vsel %vm3786_vm1, %v379_v56, 0.0  ;;  %v384_v60 = vsel %vm3786_vm1, %v380_v55, 0.0 }
 0x371   :  { %v387_v63 = vpack.c.bf16 %v384_v60, %v383_v59  ;;  %v3068_v56 = vor.u32 %v3354_v53, %v3067_v52  ;;  %v3077_v59 = vld [vmem:[#allocation5 + $0x60] sm:$0xf]  ;;  %v688_v52 = vld [vmem:[#allocation5 + $0x70] sm:$0x7] }
 0x372   :  { %3449 = vrot.lane.b32.xlu2 %v3448_v57, %s3731_s8  ;;  %474 = vrot.lane.b32.xlu0 %v467_v58, %s3732_s0  ;;  %v511_v57 = vld [vmem:[%s4395_s4 + $0x48] sm:$0x3]  ;;  %v634_v58 = vld [vmem:[%s4395_s4 + $0x50] sm:$0xff] }
 0x373   :  { %v397_v0 = vsel %vm222_vm5, %v387_v63, 0  ;;  %v3078_v63 = vor.u32 %v3356_v61, %v3077_v59 }
 0x374   :  { %406 = vmatpush.bf16.msrb.mxu3 %v397_v0  ;;  %v416_v27 = vpop.permute.xlu1 %415 }
 0x377   :  { %3054 = vmatmul.msk.bf16.vlgmr.msrb.gmra.mxu3 %vm218_vm6, %v3053_v1 }
 0x37a   :  { %420 = vperm.xlu2 %3431, %v382_v2  }
 0x3cc   :  { %v3450_v3 = vpop.permute.xlu2 %3449 }
 0x3cd   :  { %v3452_v5 = vunpack.i.h.bf16 %v3450_v3  ;;  %v3451_v6 = vunpack.i.l.bf16 %v3450_v3 }
 0x3cf   :  { %v434_v7 = vsel %vm3803_vm4, %v3452_v5, 0.0  ;;  %v433_v8 = vsel %vm3803_vm4, %v3451_v6, 0.0  ;;  %v3072_v6 = vld [vmem:[#allocation5 + $0x50] sm:$0xf] }
 0x3d0   :  { %v437_v11 = vpack.c.bf16 %v434_v7, %v433_v8  ;;  %v3355_v7 = vld [vmem:[#allocation5 + $0x50] sm:$0x10] }
 0x3d1   :  { %v3073_v10 = vor.u32 %v3355_v7, %v3072_v6 }
 0x3d2   :  { %v447_v12 = vsel %vm222_vm5, %v437_v11, 0 }
 0x3d3   :  { %456 = vmatpush.bf16.msra.mxu0 %v447_v12 }
 0x3d4   :  { %v421_v30 = vpop.permute.xlu2 %420 }
 0x3d6   :  { %3059 = vmatmul.msk.bf16.vlgmr.msra.gmra.mxu0 %vm218_vm6, %v3058_v13 }
 0x3e4   :  { %v475_v16 = vpop.permute.xlu0 %474 }
 0x3e5   :  { %v480_v17 = vsel %vm222_vm5, %v475_v16, 0 }
 0x3e6   :  { %489 = vmatpush.bf16.msra.mxu1 %v480_v17 }
 0x3e9   :  { %3064 = vmatmul.msk.bf16.vlgmr.msra.gmra.mxu1 %vm218_vm6, %v3063_v19 }
 0x3ea   :  { %664 = vmatpush.bf16.msrb.mxu1 %v655_v20 }
 0x3f9   :  { %3084 = vmatmul.msk.bf16.vlgmr.msrb.gmra.mxu1 %vm218_vm6, %v3083_v23 }
 0x3fa   :  { %v408_v24 = vpop.f32.mrf.mxu3 }
 0x3fb   :  { %v423_v29 = vadd.f32 %v416_v27, %v408_v24 }
 0x402   :  { %v410_v28 = vpop.f32.mrf.mxu3 }
 0x403   :  { %v424_v32 = vadd.f32 %v421_v30, %v410_v28 }
 0x453   :  { %v458_v25 = vpop.f32.mrf.mxu0 }
 0x454   :  { %v463_v33 = vadd.f32 %v458_v25, %v423_v29 }
 0x45b   :  { %v460_v31 = vpop.f32.mrf.mxu0 }
 0x45c   :  { %v464_v34 = vadd.f32 %v460_v31, %v424_v32 }
 0x466   :  { %v491_v26 = vpop.f32.mrf.mxu1 }
 0x467   :  { %v496_v35 = vadd.f32 %v491_v26, %v463_v33 }
 0x469   :  { %v498_v38 = vmax.f32 %v496_v35, 0.0 }
 0x46e   :  { %v493_v36 = vpop.f32.mrf.mxu1 }
 0x46f   :  { %v497_v37 = vadd.f32 %v493_v36, %v464_v34 }
 0x471   :  { %v499_v39 = vmax.f32 %v497_v37, 0.0 }
 0x473   :  { %v3453_v40 = vpack.i.bf16 %v499_v39, %v498_v38 }
 0x475   :  { %3454 = vrot.lane.b32.xlu0 %v3453_v40, %s3730_s2  ;;  %v685_v40 = vld [vmem:[%s4395_s4 + $0x60] sm:$0x3f] }
 0x476   :  { %v666_v13 = vpop.f32.mrf.mxu1 }
 0x47d   :  { %546 = vperm.xlu0 %3442, %v510_v41  }
 0x47e   :  { %v668_v25 = vpop.f32.mrf.mxu1 }
 0x485   :  { %643 = vperm.xlu0 %3442, %v635_v42  }
 0x4e7   :  { %v3455_v43 = vpop.permute.xlu0 %3454 }
 0x4e8   :  { %v3457_v44 = vunpack.i.h.bf16 %v3455_v43  ;;  %v3456_v45 = vunpack.i.l.bf16 %v3455_v43 }
 0x4ea   :  { %v509_v46 = vsel %vm73_vm0, 0.0, %v3457_v44  ;;  %v508_v47 = vsel %vm73_vm0, 0.0, %v3456_v45 }
 0x4eb   :  { %v513_v48 = vsel %vm3786_vm1, %v509_v46, 0.0  ;;  %v512_v49 = vsel %vm3786_vm1, %v508_v47, 0.0  ;;  %v3458_v50 = vpack.i.bf16 %v509_v46, %v508_v47  ;;  %v598_v51 = vpack.c.bf16 %v509_v46, %v508_v47 }
 0x4ec   :  { %v516_v54 = vpack.c.bf16 %v513_v48, %v512_v49 }
 0x4ed   :  { %3459 = vrot.lane.b32.xlu1 %v3458_v50, %s3731_s8  ;;  %605 = vrot.lane.b32.xlu2 %v598_v51, %s3732_s0 }
 0x4ee   :  { %v528_v55 = vsel %vm526_vm7, %v516_v54, 0 }
 0x4ef   :  { %537 = vmatpush.bf16.msra.mxu2 %v528_v55  ;;  %v547_v12 = vpop.permute.xlu0 %546 }
 0x4f2   :  { %3069 = vmatmul.msk.bf16.vlgmr.msra.gmra.mxu2 %vm522_vm8, %v3068_v56 }
 0x4f5   :  { %551 = vperm.xlu1 %3430, %v511_v57   ;;  %638 = vperm.xlu2 %3431, %v634_v58  }
 0x4f7   :  { %v644_v28 = vpop.permute.xlu0 %643 }
 0x4f8   :  { %v669_v32 = vadd.f32 %v668_v25, %v644_v28 }
 0x547   :  { %v606_v60 = vpop.permute.xlu2 %605 }
 0x548   :  { %v611_v62 = vsel %vm526_vm7, %v606_v60, 0  ;;  %v725_v60 = vld [vmem:[#allocation5 + $0x80] sm:$0x7] }
 0x549   :  { %620 = vmatpush.bf16.msrb.mxu0 %v611_v62 }
 0x54c   :  { %3079 = vmatmul.msk.bf16.vlgmr.msrb.gmra.mxu0 %vm522_vm8, %v3078_v63 }
 0x54f   :  { %v639_v23 = vpop.permute.xlu2 %638 }
 0x550   :  { %v667_v30 = vadd.f32 %v666_v13, %v639_v23  ;;  %v864_v23 = vld [vmem:[%s4395_s4 + $0x70] sm:$0x3f] }
 0x55f   :  { %v3460_v0 = vpop.permute.xlu1 %3459 }
 0x560   :  { %v3462_v1 = vunpack.i.h.bf16 %v3460_v0  ;;  %v3461_v2 = vunpack.i.l.bf16 %v3460_v0  ;;  %v747_v0 = vld [vmem:[#allocation5 + $0x90] sm:$0x7] }
 0x562   :  { %v565_v3 = vsel %vm3803_vm4, %v3462_v1, 0.0  ;;  %v564_v5 = vsel %vm3803_vm4, %v3461_v2, 0.0 }
 0x563   :  { %v568_v8 = vpack.c.bf16 %v565_v3, %v564_v5  ;;  %v862_v3 = vld [vmem:[#allocation5 + $0xa0] sm:$0x7] }
 0x565   :  { %v578_v9 = vsel %vm526_vm7, %v568_v8, 0 }
 0x566   :  { %587 = vmatpush.bf16.msra.mxu3 %v578_v9 }
 0x567   :  { %v552_v21 = vpop.permute.xlu1 %551 }
 0x569   :  { %3074 = vmatmul.msk.bf16.vlgmr.msra.gmra.mxu3 %vm522_vm8, %v3073_v10 }
 0x575   :  { %v539_v11 = vpop.f32.mrf.mxu2 }
 0x576   :  { %v554_v14 = vadd.f32 %v547_v12, %v539_v11 }
 0x57d   :  { %v541_v19 = vpop.f32.mrf.mxu2 }
 0x57e   :  { %v555_v22 = vadd.f32 %v552_v21, %v541_v19 }
 0x5c9   :  { %v622_v15 = vpop.f32.mrf.mxu0 }
 0x5d1   :  { %v624_v29 = vpop.f32.mrf.mxu0 }
 0x5ec   :  { %v589_v16 = vpop.f32.mrf.mxu3 }
 0x5ed   :  { %v594_v17 = vadd.f32 %v589_v16, %v554_v14  ;;  %v778_v14 = vld [vmem:[%s4395_s4 + $0x68] sm:$0x3f] }
 0x5ef   :  { %v627_v20 = vadd.f32 %v622_v15, %v594_v17 }
 0x5f1   :  { %v629_v26 = vmax.f32 %v627_v20, 0.0 }
 0x5f3   :  { %v671_v33 = vadd.f32 %v667_v30, %v629_v26 }
 0x5f4   :  { %v591_v24 = vpop.f32.mrf.mxu3 }
 0x5f5   :  { %v595_v27 = vadd.f32 %v591_v24, %v555_v22  ;;  %v673_v36 = vmax.f32 %v671_v33, 0.0  ;;  %v780_v22 = vld [vmem:[#allocation5 + $0x78] sm:$0x7] }
 0x5f7   :  { %v628_v31 = vadd.f32 %v624_v29, %v595_v27 }
 0x5f9   :  { %v630_v34 = vmax.f32 %v628_v31, 0.0  ;;  %v836_v31 = vld [vmem:[#allocation5 + $0x98] sm:$0x7] }
 0x5fb   :  { %v672_v35 = vadd.f32 %v669_v32, %v630_v34  ;;  %v814_v32 = vld [vmem:[#allocation5 + $0x88] sm:$0x7] }
 0x5fd   :  { %v674_v37 = vmax.f32 %v672_v35, 0.0 }
 0x5ff   :  { %v3463_v38 = vpack.i.bf16 %v674_v37, %v673_v36  ;;  %v863_v39 = vpack.c.bf16 %v674_v37, %v673_v36 }
 0x601   :  { %3464 = vrot.lane.b32.xlu1 %v3463_v38, %s3730_s2  ;;  %v874_v63 = vsel %vm526_vm7, %v863_v39, 0 }
 0x609   :  { %711 = vperm.xlu1 %3430, %v685_v40  }
 0x673   :  { %v3465_v41 = vpop.permute.xlu1 %3464 }
 0x674   :  { %v3467_v42 = vunpack.i.h.bf16 %v3465_v41  ;;  %v3466_v43 = vunpack.i.l.bf16 %v3465_v41 }
 0x676   :  { %v684_v44 = vsel %vm73_vm0, 0.0, %v3467_v42  ;;  %v683_v45 = vsel %vm73_vm0, 0.0, %v3466_v43 }
 0x677   :  { %v687_v46 = vsel %vm3786_vm1, %v684_v44, 0.0  ;;  %v686_v47 = vsel %vm3786_vm1, %v683_v45, 0.0  ;;  %v3468_v48 = vpack.i.bf16 %v684_v44, %v683_v45  ;;  %v748_v49 = vpack.c.bf16 %v684_v44, %v683_v45 }
 0x678   :  { %v689_v50 = vpack.c.bf16 %v687_v46, %v686_v47 }
 0x679   :  { %3469 = vrot.lane.b32.xlu2 %v3468_v48, %s3731_s8  ;;  %750 = vrot.lane.b32.xlu0 %v748_v49, %s3732_s0  ;;  %v3358_v48 = vld [vmem:[#allocation5 + $0xa8] sm:$0xff] }
 0x67a   :  { %v694_v51 = vsel %vm526_vm7, %v689_v50, 0 }
 0x67b   :  { %703 = vmatpush.bf16.msrb.mxu2 %v694_v51  ;;  %v712_v7 = vpop.permute.xlu1 %711 }
 0x67e   :  { %3085 = vmatmul.msk.bf16.vlgmr.msrb.gmra.mxu2 %vm522_vm8, %v688_v52  ;;  %v3473_v52 = vld [vmem:[%s4395_s4 + $0x78] ss:$0 sm:$0xff] }
 0x6d3   :  { %v3470_v53 = vpop.permute.xlu2 %3469 }
 0x6d4   :  { %v3472_v54 = vunpack.i.h.bf16 %v3470_v53  ;;  %v3471_v55 = vunpack.i.l.bf16 %v3470_v53 }
 0x6d6   :  { %v724_v56 = vsel %vm3803_vm4, %v3472_v54, 0.0  ;;  %v723_v57 = vsel %vm3803_vm4, %v3471_v55, 0.0 }
 0x6d7   :  { %v726_v58 = vpack.c.bf16 %v724_v56, %v723_v57  ;;  %v3961_v56 = vld [vmem:[%s4395_s4 + $0x88] sm:$0xff] }
 0x6d9   :  { %v731_v59 = vsel %vm526_vm7, %v726_v58, 0  ;;  %v3968_v58 = vld [vmem:[%s4395_s4 + $0x90] sm:$0xff] }
 0x6da   :  { %740 = vmatpush.bf16.msrb.mxu3 %v731_v59 }
 0x6dd   :  { %3086 = vmatmul.msk.bf16.vlgmr.msrb.gmra.mxu3 %vm522_vm8, %v725_v60  ;;  %v3974_v60 = vld [vmem:[%s4395_s4 + $0xa0] sm:$0xff] }
 0x6eb   :  { %v751_v61 = vpop.permute.xlu0 %750 }
 0x6ec   :  { %v756_v62 = vsel %vm526_vm7, %v751_v61, 0 }
 0x6ed   :  { %765 = vmatpush.bf16.msra.mxu0 %v756_v62 }
 0x6f0   :  { %3087 = vmatmul.msk.bf16.vlgmr.msra.gmra.mxu0 %vm522_vm8, %v747_v0  ;;  %v3989_v0 = vld [vmem:[%s4395_s4 + $0xa8] sm:$0xff] }
 0x6f1   :  { %883 = vmatpush.bf16.msrb.mxu0 %v874_v63  ;;  %v3984_v63 = vld [vmem:[%s4395_s4 + $0x98] sm:$0xff] }
 0x700   :  { %3091 = vmatmul.msk.bf16.vlgmr.msrb.gmra.mxu0 %vm522_vm8, %v862_v3 }
 0x701   :  { %v705_v1 = vpop.f32.mrf.mxu2 }
 0x702   :  { %v714_v8 = vadd.f32 %v712_v7, %v705_v1  ;;  %v3994_v1 = vld [vmem:[%s4395_s4 + $0xb0] sm:$0xff] }
 0x709   :  { %v707_v2 = vpop.f32.mrf.mxu2 }
 0x760   :  { %v742_v5 = vpop.f32.mrf.mxu3 }
 0x761   :  { %v746_v9 = vadd.f32 %v742_v5, %v714_v8 }
 0x768   :  { %v744_v6 = vpop.f32.mrf.mxu3 }
 0x76d   :  { %v767_v10 = vpop.f32.mrf.mxu0 }
 0x76e   :  { %v771_v11 = vadd.f32 %v767_v10, %v746_v9 }
 0x770   :  { %v772_v12 = vmax.f32 %v771_v11, 0.0 }
 0x772   :  { %774 = vrot.lane.b32.xlu2 %v772_v12, %s3730_s2 }
 0x775   :  { %v769_v13 = vpop.f32.mrf.mxu0 }
 0x77a   :  { %805 = vperm.xlu2 %3431, %v778_v14  }
 0x77d   :  { %v885_v4 = vpop.f32.mrf.mxu0 }
 0x785   :  { %v887_v24 = vpop.f32.mrf.mxu0 }
 0x7cc   :  { %v775_v15 = vpop.permute.xlu2 %774 }
 0x7cd   :  { %v777_v16 = vsel %vm73_vm0, 0.0, %v775_v15 }
 0x7ce   :  { %v779_v17 = vsel %vm3786_vm1, %v777_v16, 0.0  ;;  %v837_v19 = vpack.c.bf16 %v777_v16, %v777_v16  ;;  %810 = vrot.lane.b32.xlu0 %v777_v16, %s3731_s8  ;;  %s3734_s8 = smov 112  }
 0x7cf   :  { %v781_v20 = vpack.c.bf16 %v779_v17, %v779_v17 }
 0x7d0   :  { %839 = vrot.lane.b32.xlu1 %v837_v19, %s3732_s0  ;;  %s3735_s0 = smov 96  }
 0x7d1   :  { %v788_v21 = vsel %vm786_vm9, %v781_v20, 0  ;;  %v932_v20 = vld [vmem:[%s4395_s4 + $0xb8] sm:$0xff] }
 0x7d2   :  { %797 = vmatpush.bf16.msra.mxu1 %v788_v21 }
 0x7d4   :  { %v806_v35 = vpop.permute.xlu2 %805 }
 0x7d5   :  { %3088 = vmatmul.msk.bf16.vlgmr.msra.gmra.mxu1 %vm782_vm10, %v780_v22 }
 0x7d6   :  { %867 = vperm.xlu0 %3442, %v864_v23   ;;  %919 = vmatpush.bf16.msrb.mxu1 %v3358_v48 }
 0x840   :  { %v811_v25 = vpop.permute.xlu0 %810 }
 0x841   :  { %v813_v26 = vsel %vm3803_vm4, %v811_v25, 0.0 }
 0x842   :  { %v815_v27 = vpack.c.bf16 %v813_v26, %v813_v26  ;;  %v840_v28 = vpop.permute.xlu1 %839 }
 0x843   :  { %v845_v29 = vsel %vm786_vm9, %v840_v28, 0 }
 0x844   :  { %v820_v30 = vsel %vm786_vm9, %v815_v27, 0  ;;  %854 = vmatpush.bf16.msra.mxu3 %v845_v29  ;;  %v934_v27 = vld [vmem:[%s4395_s4 + $0xc8] sm:$0xff] }
 0x845   :  { %829 = vmatpush.bf16.msra.mxu2 %v820_v30 }
 0x847   :  { %3090 = vmatmul.msk.bf16.vlgmr.msra.gmra.mxu3 %vm782_vm10, %v836_v31  ;;  %v935_v31 = vld [vmem:[%s4395_s4 + $0xd0] sm:$0xff] }
 0x848   :  { %3089 = vmatmul.msk.bf16.vlgmr.msra.gmra.mxu2 %vm782_vm10, %v814_v32  ;;  %v868_v39 = vpop.permute.xlu0 %867 }
 0x849   :  { %v886_v41 = vadd.f32 %v885_v4, %v868_v39  ;;  %v933_v4 = vld [vmem:[%s4395_s4 + $0xc0] sm:$0xff] }
 0x852   :  { %v799_v33 = vpop.f32.mrf.mxu1 }
 0x853   :  { %v808_v36 = vadd.f32 %v806_v35, %v799_v33  ;;  %v936_v35 = vld [vmem:[%s4395_s4 + $0xd8] sm:$0xff] }
 0x85a   :  { %v801_v34 = vpop.f32.mrf.mxu1 }
 0x8ca   :  { %v856_v18 = vpop.f32.mrf.mxu3 }
 0x8cb   :  { %v831_v37 = vpop.f32.mrf.mxu2 }
 0x8cc   :  { %v835_v38 = vadd.f32 %v831_v37, %v808_v36 }
 0x8ce   :  { %v860_v40 = vadd.f32 %v856_v18, %v835_v38  ;;  %v937_v38 = vld [vmem:[%s4395_s4 + $0xe0] sm:$0xff] }
 0x8d0   :  { %v861_v42 = vmax.f32 %v860_v40, 0.0 }
 0x8d2   :  { %v889_v43 = vadd.f32 %v886_v41, %v861_v42  ;;  %v858_v44 = vpop.f32.mrf.mxu3 }
 0x8d3   :  { %v833_v45 = vpop.f32.mrf.mxu2 }
 0x8d4   :  { %v890_v46 = vmax.f32 %v889_v43, 0.0 }
 0x8d6   :  { %v892_v47 = vrot.slane %v890_v46, 2 }
 0x8d8   :  { %893 = vrot.lane.b32.xlu1 %v892_v47, %s3734_s8 }
 0x94a   :  { %v894_v49 = vpop.permute.xlu1 %893 }
 0x94b   :  { %v896_v50 = vsel %vm222_vm5, %v890_v46, %v894_v49 }
 0x94c   :  { %v899_v51 = vpack.c.bf16 %v894_v49, %v896_v50 }
 0x94e   :  { %3096 = vmatmul.msk.bf16.vlgmr.msrb.gmra.mxu1 %vm908_vm11, %v899_v51 }
 0x9cb   :  { %v921_v53 = vpop.f32.mrf.mxu1 }
 0x9cc   :  { %v3954_v54 = vadd.f32 %v3473_v52, %v921_v53 }
 0x9ce   :  { %952 = vrot.lane.b32.xlu2 %v3954_v54, %s3734_s8  ;;  %v940_v59 = vrot.slane %v3954_v54, 4  ;;  %v946_v3 = vmul.f32 %v3961_v56, %v3954_v54  ;;  %v949_v7 = vmul.f32 %v3974_v60, %v3954_v54 }
 0x9d3   :  { %v923_v55 = vpop.f32.mrf.mxu1 }
 0x9d4   :  { %v3963_v57 = vadd.f32 %v3473_v52, %v923_v55 }
 0x9d6   :  { %v941_v61 = vrot.slane %v3963_v57, 4  ;;  %v945_v62 = vsel %vm93_vm2, %v3963_v57, %v940_v59  ;;  %954 = vrot.lane.b32.xlu0 %v3963_v57, %s3734_s8  ;;  %v1096_v2 = vpack.c.bf16 %v3963_v57, %v3954_v54 }
 0x9d7   :  { %v947_v5 = vmul.f32 %v945_v62, %v3968_v58  ;;  %v950_v10 = vmul.f32 %v945_v62, %v3989_v0 }
 0x9d8   :  { %v942_v6 = vsel %vm93_vm2, %v940_v59, %v941_v61 }
 0x9d9   :  { %v990_v8 = vpack.c.bf16 %v947_v5, %v946_v3  ;;  %v948_v9 = vmul.f32 %v942_v6, %v3984_v63  ;;  %v951_v11 = vmul.f32 %v942_v6, %v3994_v1 }
 0x9db   :  { %v991_v12 = vpack.c.bf16 %v949_v7, %v948_v9  ;;  %v992_v13 = vpack.c.bf16 %v951_v11, %v950_v10 }
 0xa28   :  { %v953_v14 = vpop.permute.xlu2 %952 }
 0xa29   :  { %958 = vxpose.xlu1.b32.start [1/2] (short) (narrow) %v953_v14, 16 }
 0xa48   :  { %v955_v15 = vpop.permute.xlu0 %954 }
 0xa49   :  { %959 = vxpose.xlu1.b32.end [2/2] (short) (narrow) %v955_v15, 16 }
 0xae5   :  { %v974_v16 = vpop.trf.xlu1 }
 0xaed   :  { %v975_v17 = vpop.trf.xlu1 }
 0xaee   :  { %v993_v19 = vpack.c.bf16 %v975_v17, %v974_v16 }
 0xaf0   :  { %1010 = vmatpush.bf16.msrb.mxu2 %v993_v19 }
 0xaf3   :  { %3097 = vmatmul.msk.bf16.vlgmr.msrb.gmra.mxu2 %vm908_vm11, %v990_v8 }
 0xb03   :  { %3098 = vmatmul.msk.bf16.gmra.mxu2 %vm908_vm11, %v991_v12 }
 0xb13   :  { %3099 = vmatmul.msk.bf16.gmra.mxu2 %vm908_vm11, %v992_v13 }
 0xb76   :  { %v1012_v21 = vpop.f32.mrf.mxu2 }
 0xb77   :  { %v1013_v22 = vadd.f32 %v1012_v21, %v932_v20 }
 0xb79   :  { %v1027_v23 = vsel %vm218_vm6, %v1013_v22, -inf }
 0xb7a   :  { %1028 = vmax.xlane.f32.xlu2 %v1027_v23 }
 0xb7e   :  { %v1014_v24 = vpop.f32.mrf.mxu2 }
 0xb7f   :  { %v1015_v25 = vadd.f32 %v1014_v24, %v933_v4 }
 0xb81   :  { %v1030_v26 = vsel %vm218_vm6, %v1015_v25, -inf }
 0xb82   :  { %1031 = vmax.xlane.f32.xlu0 %v1030_v26 }
 0xb86   :  { %v1017_v28 = vpop.f32.mrf.mxu2 }
 0xb87   :  { %v1018_v29 = vadd.f32 %v1017_v28, %v934_v27 }
 0xb89   :  { %v1033_v30 = vsel %vm218_vm6, %v1018_v29, -inf }
 0xb8a   :  { %1034 = vmax.xlane.f32.xlu2 %v1033_v30 }
 0xb8e   :  { %v1019_v32 = vpop.f32.mrf.mxu2 }
 0xb8f   :  { %v1020_v33 = vadd.f32 %v1019_v32, %v935_v31 }
 0xb91   :  { %v1036_v34 = vsel %vm218_vm6, %v1020_v33, -inf }
 0xb92   :  { %1037 = vmax.xlane.f32.xlu2 %v1036_v34 }
 0xb96   :  { %v1022_v36 = vpop.f32.mrf.mxu2 }
 0xb97   :  { %v1023_v18 = vadd.f32 %v1022_v36, %v936_v35 }
 0xb99   :  { %v1039_v37 = vsel %vm218_vm6, %v1023_v18, -inf }
 0xb9a   :  { %1040 = vmax.xlane.f32.xlu0 %v1039_v37 }
 0xb9e   :  { %v1024_v39 = vpop.f32.mrf.mxu2 }
 0xb9f   :  { %v1025_v40 = vadd.f32 %v1024_v39, %v937_v38 }
 0xba1   :  { %v1042_v41 = vsel %vm218_vm6, %v1025_v40, -inf }
 0xba2   :  { %1043 = vmax.xlane.f32.xlu2 %v1042_v41 }
 0xbba   :  { %1098 = vrot.lane.b32.xlu2 %v1096_v2, %s3735_s0 }
 0xbed   :  { %v1029_v42 = vpop.xlane.xlu2 %1028 }
 0xbee   :  { %v1045_v43 = vsub.f32 %v1013_v22, %v1029_v42 }
 0xbf0   :  { %v1051_v44 = vmul.f32 1.442695, %v1045_v43 }
 0xbf2   :  { %3478 = vpow2.f32 %v1051_v44 }
 0xbf5   :  { %v1032_v45 = vpop.xlane.xlu0 %1031 }
 0xbf6   :  { %v1046_v46 = vsub.f32 %v1015_v25, %v1032_v45 }
 0xbf8   :  { %v3479_v47 = vpop.eup %3478  ;;  %v1053_v48 = vmul.f32 1.442695, %v1046_v46 }
 0xbf9   :  { %v1063_v49 = vsel %vm218_vm6, %v3479_v47, 0.0 }
 0xbfa   :  { %3480 = vpow2.f32 %v1053_v48  ;;  %1064 = vadd.xlane.f32.xlu0 %v1063_v49 }
 0xbfd   :  { %v1035_v50 = vpop.xlane.xlu2 %1034 }
 0xbfe   :  { %v1047_v51 = vsub.f32 %v1018_v29, %v1035_v50 }
 0xc00   :  { %v3481_v52 = vpop.eup %3480  ;;  %v1055_v53 = vmul.f32 1.442695, %v1047_v51  ;;  %v3105_v51 = vld [vmem:[#allocation5 + $0xb8] sm:$0xf] }
 0xc01   :  { %v1066_v54 = vsel %vm218_vm6, %v3481_v52, 0.0 }
 0xc02   :  { %3482 = vpow2.f32 %v1055_v53  ;;  %1067 = vadd.xlane.f32.xlu1 %v1066_v54 }
 0xc05   :  { %v1038_v55 = vpop.xlane.xlu2 %1037 }
 0xc06   :  { %v1048_v57 = vsub.f32 %v1020_v33, %v1038_v55 }
 0xc08   :  { %v3483_v59 = vpop.eup %3482  ;;  %v1057_v61 = vmul.f32 1.442695, %v1048_v57  ;;  %v3361_v57 = vld [vmem:[#allocation5 + $0xc0] sm:$0xff] }
 0xc09   :  { %v1069_v62 = vsel %vm218_vm6, %v3483_v59, 0.0 }
 0xc0a   :  { %3484 = vpow2.f32 %v1057_v61  ;;  %1070 = vadd.xlane.f32.xlu0 %v1069_v62  ;;  %v3474_v61 = vld [vmem:[%s4395_s4 + $0x80] ss:$0 sm:$0xff] }
 0xc0d   :  { %v1041_v2 = vpop.xlane.xlu0 %1040 }
 0xc0e   :  { %v1049_v3 = vsub.f32 %v1023_v18, %v1041_v2 }
 0xc10   :  { %v3485_v5 = vpop.eup %3484  ;;  %v1059_v6 = vmul.f32 1.442695, %v1049_v3 }
 0xc11   :  { %v1072_v7 = vsel %vm218_vm6, %v3485_v5, 0.0 }
 0xc12   :  { %3486 = vpow2.f32 %v1059_v6  ;;  %1073 = vadd.xlane.f32.xlu0 %v1072_v7 }
 0xc15   :  { %v1044_v8 = vpop.xlane.xlu2 %1043 }
 0xc16   :  { %v1050_v9 = vsub.f32 %v1025_v40, %v1044_v8  ;;  %v4064_v8 = vld [vmem:[%s4395_s4 + $0xe8] ss:$0 sm:$0xff] }
 0xc18   :  { %v3487_v10 = vpop.eup %3486  ;;  %v1061_v11 = vmul.f32 1.442695, %v1050_v9 }
 0xc19   :  { %v1075_v12 = vsel %vm218_vm6, %v3487_v10, 0.0 }
 0xc1a   :  { %3488 = vpow2.f32 %v1061_v11  ;;  %1076 = vadd.xlane.f32.xlu0 %v1075_v12 }
 0xc1d   :  { %v1099_v13 = vpop.permute.xlu2 %1098 }
 0xc1e   :  { %v1110_v14 = vsel %vm222_vm5, %v1099_v13, 0  ;;  %v1204_v13 = vld [vmem:[%s4395_s4 + $0xf8] sm:$0x3] }
 0xc1f   :  { %1119 = vmatpush.bf16.msrb.mxu3 %v1110_v14 }
 0xc20   :  { %v3489_v15 = vpop.eup %3488 }
 0xc21   :  { %v1078_v16 = vsel %vm218_vm6, %v3489_v15, 0.0 }
 0xc22   :  { %1079 = vadd.xlane.f32.xlu2 %v1078_v16 }
 0xc6d   :  { %v1065_v17 = vpop.xlane.xlu0 %1064 }
 0xc6e   :  { %3490 = vrcp.f32 %v1065_v17 }
 0xc74   :  { %v3491_v20 = vpop.eup %3490 }
 0xc75   :  { %v1068_v19 = vpop.xlane.xlu1 %1067  ;;  %v1087_v22 = vmul.f32 %v3491_v20, %v3479_v47 }
 0xc76   :  { %3492 = vrcp.f32 %v1068_v19 }
 0xc7c   :  { %v3493_v21 = vpop.eup %3492 }
 0xc7d   :  { %v1088_v23 = vmul.f32 %v3493_v21, %v3481_v52  ;;  %v1071_v4 = vpop.xlane.xlu0 %1070  ;;  %v3359_v52 = vld [vmem:[#allocation5 + $0xb8] sm:$0x30] }
 0xc7e   :  { %3494 = vrcp.f32 %v1071_v4  ;;  %v3106_v54 = vor.u32 %v3359_v52, %v3105_v51 }
 0xc7f   :  { %v1093_v24 = vpack.c.bf16 %v1088_v23, %v1087_v22 }
 0xc81   :  { %3100 = vmatmul.msk.bf16.vlgmr.msrb.gmra.mxu3 %vm218_vm6, %v1093_v24 }
 0xc84   :  { %v3495_v26 = vpop.eup %3494 }
 0xc85   :  { %v1074_v25 = vpop.xlane.xlu0 %1073  ;;  %v1089_v28 = vmul.f32 %v3495_v26, %v3483_v59 }
 0xc86   :  { %3496 = vrcp.f32 %v1074_v25 }
 0xc8c   :  { %v3497_v27 = vpop.eup %3496 }
 0xc8d   :  { %v1090_v29 = vmul.f32 %v3497_v27, %v3485_v5  ;;  %v1077_v31 = vpop.xlane.xlu0 %1076 }
 0xc8e   :  { %3498 = vrcp.f32 %v1077_v31 }
 0xc8f   :  { %v1094_v30 = vpack.c.bf16 %v1090_v29, %v1089_v28 }
 0xc91   :  { %3101 = vmatmul.msk.bf16.gmra.mxu3 %vm218_vm6, %v1094_v30 }
 0xc94   :  { %v3499_v33 = vpop.eup %3498 }
 0xc95   :  { %v1080_v32 = vpop.xlane.xlu2 %1079  ;;  %v1091_v35 = vmul.f32 %v3499_v33, %v3487_v10 }
 0xc96   :  { %3500 = vrcp.f32 %v1080_v32 }
 0xc9c   :  { %v3501_v34 = vpop.eup %3500 }
 0xc9d   :  { %v1092_v36 = vmul.f32 %v3501_v34, %v3489_v15 }
 0xc9f   :  { %v1095_v18 = vpack.c.bf16 %v1092_v36, %v1091_v35 }
 0xca1   :  { %3102 = vmatmul.msk.bf16.gmra.mxu3 %vm218_vm6, %v1095_v18 }
 0xd04   :  { %v1121_v37 = vpop.f32.mrf.mxu3 }
 0xd05   :  { %v1136_v50 = vmul.f32 %v1121_v37, %v3961_v56  ;;  %v1203_v56 = vld [vmem:[%s4395_s4 + $0xf0] sm:$0x3] }
 0xd06   :  { %v1230_v55 = vpack.c.bf16 %v1203_v56, %v1203_v56 }
 0xd0c   :  { %v1123_v38 = vpop.f32.mrf.mxu3 }
 0xd0d   :  { %v1137_v48 = vmul.f32 %v1123_v38, %v3968_v58  ;;  %v3362_v58 = vld [vmem:[#allocation5 + $0xc8] sm:$0xff] }
 0xd0e   :  { %1457 = vmatpush.bf16.msra.mxu2 %v3362_v58  ;;  %1528 = vmatpush.bf16.msra.mxu3 %v3362_v58 }
 0xd0f   :  { %v1144_v53 = vpack.c.bf16 %v1137_v48, %v1136_v50 }
 0xd14   :  { %v1126_v39 = vpop.f32.mrf.mxu3 }
 0xd15   :  { %v1138_v47 = vmul.f32 %v1126_v39, %v3984_v63 }
 0xd1c   :  { %v1128_v40 = vpop.f32.mrf.mxu3 }
 0xd1d   :  { %v1139_v45 = vmul.f32 %v1128_v40, %v3974_v60 }
 0xd1f   :  { %v1145_v49 = vpack.c.bf16 %v1139_v45, %v1138_v47 }
 0xd24   :  { %v1131_v41 = vpop.f32.mrf.mxu3 }
 0xd25   :  { %v1140_v43 = vmul.f32 %v1131_v41, %v3989_v0  ;;  %v3360_v0 = vld [vmem:[#allocation5 + $0xb0] sm:$0xff] }
 0xd26   :  { %1191 = vmatpush.bf16.msra.mxu1 %v3360_v0 }
 0xd2a   :  { %1247 = vmatpush.bf16.msrb.mxu1 %v3362_v58 }
 0xd2c   :  { %v1133_v42 = vpop.f32.mrf.mxu3 }
 0xd2d   :  { %v1141_v44 = vmul.f32 %v1133_v42, %v3994_v1 }
 0xd2f   :  { %v1146_v46 = vpack.c.bf16 %v1141_v44, %v1140_v43 }
 0xd31   :  { %1161 = vmatpush.bf16.msra.mxu0 %v1146_v46 }
 0xd35   :  { %1162 = vmatpush.bf16.msra.mxu0 %v1145_v49 }
 0xd39   :  { %1163 = vmatpush.bf16.msra.mxu0 %v1144_v53 }
 0xd3c   :  { %3107 = vmatmul.msk.bf16.vlgmr.msra.gmra.mxu0 %vm1152_vm12, %v3106_v54 }
 0xd3d   :  { %1223 = vmatpush.bf16.msrb.mxu0 %v3361_v57 }
 0xd41   :  { %1315 = vmatpush.bf16.msra.mxu0 %v3362_v58 }
 0xdb9   :  { %v1165_v60 = vpop.f32.mrf.mxu0 }
 0xdc1   :  { %v1167_v1 = vpop.f32.mrf.mxu0 }
 0xdc2   :  { %v1172_v63 = vpack.c.bf16 %v1167_v1, %v1165_v60 }
 0xdc4   :  { %3112 = vmatmul.msk.bf16.vlgmr.msra.gmra.mxu1 %vm908_vm11, %v1172_v63 }
 0xdc5   :  { %1386 = vmatpush.bf16.msra.mxu1 %v3362_v58 }
 0xdd4   :  { %3122 = vmatmul.msk.bf16.vlgmr.msrb.gmra.mxu1 %vm908_vm11, %v1230_v55 }
 0xe41   :  { %v1193_v59 = vpop.f32.mrf.mxu1 }
 0xe42   :  { %v1194_v2 = vadd.f32 %v3474_v61, %v1193_v59 }
 0xe49   :  { %v1195_v62 = vpop.f32.mrf.mxu1 }
 0xe4a   :  { %v1196_v3 = vadd.f32 %v3474_v61, %v1195_v62 }
 0xe4c   :  { %v1205_v5 = vpack.c.bf16 %v1196_v3, %v1194_v2 }
 0xe4e   :  { %3117 = vmatmul.msk.bf16.vlgmr.msrb.gmra.mxu0 %vm908_vm11, %v1205_v5 }
 0xe4f   :  { %1594 = vmatpush.bf16.msrb.mxu0 %v3362_v58 }
 0xe51   :  { %v1249_v6 = vpop.f32.mrf.mxu1 }
 0xe59   :  { %v1251_v7 = vpop.f32.mrf.mxu1 }
 0xecb   :  { %v1225_v9 = vpop.f32.mrf.mxu0 }
 0xecc   :  { %v4067_v10 = vadd.f32 %v4064_v8, %v1225_v9 }
 0xece   :  { %v1253_v11 = vadd.f32 %v1249_v6, %v4067_v10 }
 0xed0   :  { %3502 = vtanh.f32 %v1253_v11  ;;  %v3123_v14 = vmul.f32 -1.442695, %v1253_v11 }
 0xed2   :  { %3504 = vpow2.f32 %v3123_v14 }
 0xed3   :  { %v4083_v37 = vpop.f32.mrf.mxu0 }
 0xed6   :  { %v3503_v12 = vpop.eup %3502 }
 0xed7   :  { %1280 = vrot.lane.b32.xlu0 %v3503_v12, %s3736_s20 }
 0xed8   :  { %v3505_v15 = vpop.eup %3504 }
 0xed9   :  { %v1257_v16 = vadd.f32 1.0, %v3505_v15 }
 0xedb   :  { %3506 = vrcp.f32 %v1257_v16  ;;  %v1269_v23 = vand.u32 2147483648, %v1257_v16  ;;  %vm1263_vm14 = vweird.f32 %v1257_v16  ;;  %v1267_v4 = vand.u32 2147483647, %v1257_v16 }
 0xedd   :  { %v1270_v25 = vor.u32 1.1754944e-38, %v1269_v23  ;;  %vm1268_vm0 = vcmp.eq.f32.partialorder %v1267_v4, 8.507059e+37 }
 0xedf   :  { %1275 = vrot.lane.b32.xlu0 %v1204_v13, %s3729_s6 }
 0xee1   :  { %v3507_v17 = vpop.eup %3506 }
 0xee2   :  { %v1259_v19 = vmul.f32 %v3507_v17, %v1257_v16  ;;  %vm1264_vm13 = vweird.f32 %v3507_v17 }
 0xee3   :  { %vm1265_vm15 = vmor %vm1263_vm14, %vm1264_vm13 }
 0xee4   :  { %v1260_v20 = vsub.f32 1.0, %v1259_v19 }
 0xee6   :  { %v1261_v21 = vmul.f32 %v3507_v17, %v1260_v20 }
 0xee8   :  { %v1262_v22 = vadd.f32 %v3507_v17, %v1261_v21 }
 0xeea   :  { %v1266_v24 = vsel %vm1265_vm15, %v3507_v17, %v1262_v22 }
 0xeeb   :  { %v1271_v27 = vsel %vm1268_vm0, %v1270_v25, %v1266_v24 }
 0xf49   :  { %v1281_v26 = vpop.permute.xlu0 %1280 }
 0xf4a   :  { %v1283_v28 = vmul.f32 %v1281_v26, %v1271_v27 }
 0xf4c   :  { %1285 = vrot.lane.b32.xlu0 %v1283_v28, %s3729_s6 }
 0xf51   :  { %v1276_v29 = vpop.permute.xlu0 %1275 }
 0xf52   :  { %v1278_v30 = vmul.f32 %v1276_v29, %v1271_v27 }
 0xfbe   :  { %v1286_v31 = vpop.permute.xlu0 %1285 }
 0xfbf   :  { %v1288_v32 = vadd.f32 %v1286_v31, %v1278_v30 }
 0xfc1   :  { %3508 = vtanh.f32 %v1288_v32  ;;  %v1346_v63 = vrot.slane %v1288_v32, 6 }
 0xfc7   :  { %v3509_v33 = vpop.eup %3508 }
 0xfc8   :  { %1291 = vrot.lane.b32.xlu0 %v3509_v33, %s3729_s6 }
0x103a   :  { %v1292_v34 = vpop.permute.xlu0 %1291 }
0x103b   :  { %v4077_v35 = vmul.f32 %v1292_v34, %v1271_v27 }
0x103d   :  { %v1301_v36 = vpack.c.bf16 %v4077_v35, %v4077_v35 }
0x103f   :  { %1303 = vrot.lane.b32.xlu2 %v1301_v36, %s3735_s0 }
0x1099   :  { %v1304_v18 = vpop.permute.xlu2 %1303 }
0x109a   :  { %3124 = vmatmul.msk.bf16.vlgmr.msra.gmra.mxu0 %vm908_vm11, %v1304_v18 }
0x1117   :  { %v1317_v38 = vpop.f32.mrf.mxu0 }
0x1118   :  { %v1322_v39 = vrot.slane %v1317_v38, 6 }
0x111a   :  { %v1324_v40 = vadd.f32 %v1322_v39, %v4067_v10 }
0x111c   :  { %3510 = vtanh.f32 %v1324_v40  ;;  %v3125_v43 = vmul.f32 -1.442695, %v1324_v40 }
0x111e   :  { %3512 = vpow2.f32 %v3125_v43 }
0x111f   :  { %v1319_v41 = vpop.f32.mrf.mxu0 }
0x1122   :  { %v3511_v42 = vpop.eup %3510 }
0x1123   :  { %1350 = vrot.lane.b32.xlu0 %v3511_v42, %s3736_s20 }
0x1124   :  { %v3513_v44 = vpop.eup %3512 }
0x1125   :  { %v1328_v45 = vadd.f32 1.0, %v3513_v44 }
0x1127   :  { %3514 = vrcp.f32 %v1328_v45  ;;  %v1340_v51 = vand.u32 2147483648, %v1328_v45  ;;  %vm1334_vm4 = vweird.f32 %v1328_v45  ;;  %v1338_v52 = vand.u32 2147483647, %v1328_v45 }
0x1129   :  { %v1341_v54 = vor.u32 1.1754944e-38, %v1340_v51  ;;  %vm1339_vm6 = vcmp.eq.f32.partialorder %v1338_v52, 8.507059e+37 }
0x112d   :  { %v3515_v46 = vpop.eup %3514 }
0x112e   :  { %v1330_v47 = vmul.f32 %v3515_v46, %v1328_v45  ;;  %vm1335_vm1 = vweird.f32 %v3515_v46 }
0x112f   :  { %vm1336_vm5 = vmor %vm1334_vm4, %vm1335_vm1 }
0x1130   :  { %v1331_v48 = vsub.f32 1.0, %v1330_v47 }
0x1132   :  { %v1332_v49 = vmul.f32 %v3515_v46, %v1331_v48 }
0x1134   :  { %v1333_v50 = vadd.f32 %v3515_v46, %v1332_v49 }
0x1136   :  { %v1337_v53 = vsel %vm1336_vm5, %v3515_v46, %v1333_v50 }
0x1137   :  { %v1342_v60 = vsel %vm1339_vm6, %v1341_v54, %v1337_v53 }
0x1138   :  { %v1348_v58 = vmul.f32 %v1346_v63, %v1342_v60 }
0x1195   :  { %v1351_v0 = vpop.permute.xlu0 %1350 }
0x1196   :  { %v1353_v1 = vmul.f32 %v1351_v0, %v1342_v60 }
0x1198   :  { %1355 = vrot.lane.b32.xlu0 %v1353_v1, %s3729_s6 }
0x120a   :  { %v1356_v56 = vpop.permute.xlu0 %1355 }
0x120b   :  { %v1358_v55 = vadd.f32 %v1356_v56, %v1348_v58 }
0x120d   :  { %3516 = vtanh.f32 %v1358_v55  ;;  %v1417_v27 = vrot.slane %v1358_v55, 6 }
0x1213   :  { %v3517_v57 = vpop.eup %3516 }
0x1214   :  { %1361 = vrot.lane.b32.xlu0 %v3517_v57, %s3729_s6 }
0x1286   :  { %v1362_v59 = vpop.permute.xlu0 %1361 }
0x1287   :  { %v4089_v61 = vmul.f32 %v1362_v59, %v1342_v60 }
0x1289   :  { %v1371_v62 = vpack.c.bf16 %v4089_v61, %v4089_v61 }
0x128b   :  { %v1373_v2 = vrot.slane %v1371_v62, 1 }
0x128d   :  { %1374 = vrot.lane.b32.xlu2 %v1373_v2, %s3735_s0 }
0x12e7   :  { %v1375_v3 = vpop.permute.xlu2 %1374 }
0x12e8   :  { %3126 = vmatmul.msk.bf16.vlgmr.msra.gmra.mxu1 %vm908_vm11, %v1375_v3 }
0x1365   :  { %v1388_v5 = vpop.f32.mrf.mxu1 }
0x1366   :  { %v1393_v6 = vrot.slane %v1388_v5, 4  ;;  %v1228_v5 = vadd.f32 %v4064_v8, %v4083_v37 }
0x1368   :  { %v1395_v7 = vadd.f32 %v1393_v6, %v4067_v10 }
0x136a   :  { %3518 = vtanh.f32 %v1395_v7  ;;  %v3127_v12 = vmul.f32 -1.442695, %v1395_v7 }
0x136c   :  { %3520 = vpow2.f32 %v3127_v12 }
0x136d   :  { %v1390_v9 = vpop.f32.mrf.mxu1 }
0x1370   :  { %v3519_v11 = vpop.eup %3518 }
0x1371   :  { %1421 = vrot.lane.b32.xlu1 %v3519_v11, %s3736_s20 }
0x1372   :  { %v3521_v13 = vpop.eup %3520 }
0x1373   :  { %v1399_v14 = vadd.f32 1.0, %v3521_v13 }
0x1375   :  { %3522 = vrcp.f32 %v1399_v14  ;;  %v1411_v21 = vand.u32 2147483648, %v1399_v14  ;;  %vm1405_vm8 = vweird.f32 %v1399_v14  ;;  %v1409_v22 = vand.u32 2147483647, %v1399_v14 }
0x1377   :  { %v1412_v4 = vor.u32 1.1754944e-38, %v1411_v21  ;;  %vm1410_vm14 = vcmp.eq.f32.partialorder %v1409_v22, 8.507059e+37 }
0x137b   :  { %v3523_v15 = vpop.eup %3522 }
0x137c   :  { %v1401_v16 = vmul.f32 %v3523_v15, %v1399_v14  ;;  %vm1406_vm7 = vweird.f32 %v3523_v15 }
0x137d   :  { %vm1407_vm13 = vmor %vm1405_vm8, %vm1406_vm7 }
0x137e   :  { %v1402_v17 = vsub.f32 1.0, %v1401_v16 }
0x1380   :  { %v1403_v19 = vmul.f32 %v3523_v15, %v1402_v17 }
0x1382   :  { %v1404_v20 = vadd.f32 %v3523_v15, %v1403_v19 }
0x1384   :  { %v1408_v23 = vsel %vm1407_vm13, %v3523_v15, %v1404_v20 }
0x1385   :  { %v1413_v25 = vsel %vm1410_vm14, %v1412_v4, %v1408_v23 }
0x1386   :  { %v1419_v28 = vmul.f32 %v1417_v27, %v1413_v25 }
0x13e3   :  { %v1422_v24 = vpop.permute.xlu1 %1421 }
0x13e4   :  { %v1424_v26 = vmul.f32 %v1422_v24, %v1413_v25 }
0x13e6   :  { %1426 = vrot.lane.b32.xlu0 %v1424_v26, %s3729_s6 }
0x1458   :  { %v1427_v29 = vpop.permute.xlu0 %1426 }
0x1459   :  { %v1429_v30 = vadd.f32 %v1427_v29, %v1419_v28 }
0x145b   :  { %3524 = vtanh.f32 %v1429_v30  ;;  %v1488_v1 = vrot.slane %v1429_v30, 6 }
0x1461   :  { %v3525_v31 = vpop.eup %3524 }
0x1462   :  { %1432 = vrot.lane.b32.xlu2 %v3525_v31, %s3729_s6 }
0x14bc   :  { %v1433_v32 = vpop.permute.xlu2 %1432 }
0x14bd   :  { %v4099_v33 = vmul.f32 %v1433_v32, %v1413_v25 }
0x14bf   :  { %v1442_v34 = vpack.c.bf16 %v4099_v33, %v4099_v33 }
0x14c1   :  { %v1444_v36 = vrot.slane %v1442_v34, 2 }
0x14c3   :  { %1445 = vrot.lane.b32.xlu0 %v1444_v36, %s3735_s0 }
0x1535   :  { %v1446_v18 = vpop.permute.xlu0 %1445 }
0x1536   :  { %3128 = vmatmul.msk.bf16.vlgmr.msra.gmra.mxu2 %vm908_vm11, %v1446_v18 }
0x15b9   :  { %v1459_v38 = vpop.f32.mrf.mxu2 }
0x15ba   :  { %v1464_v39 = vrot.slane %v1459_v38, 2 }
0x15bc   :  { %v1466_v40 = vadd.f32 %v1464_v39, %v4067_v10 }
0x15be   :  { %3526 = vtanh.f32 %v1466_v40  ;;  %v3129_v43 = vmul.f32 -1.442695, %v1466_v40 }
0x15c0   :  { %3528 = vpow2.f32 %v3129_v43 }
0x15c1   :  { %v1461_v41 = vpop.f32.mrf.mxu2 }
0x15c4   :  { %v3527_v42 = vpop.eup %3526 }
0x15c5   :  { %1492 = vrot.lane.b32.xlu2 %v3527_v42, %s3736_s20 }
0x15c6   :  { %v3529_v44 = vpop.eup %3528 }
0x15c7   :  { %v1470_v45 = vadd.f32 1.0, %v3529_v44 }
0x15c9   :  { %3530 = vrcp.f32 %v1470_v45  ;;  %v1482_v51 = vand.u32 2147483648, %v1470_v45  ;;  %vm1476_vm0 = vweird.f32 %v1470_v45  ;;  %v1480_v52 = vand.u32 2147483647, %v1470_v45 }
0x15cb   :  { %v1483_v53 = vor.u32 1.1754944e-38, %v1482_v51  ;;  %vm1481_vm4 = vcmp.eq.f32.partialorder %v1480_v52, 8.507059e+37 }
0x15cf   :  { %v3531_v46 = vpop.eup %3530 }
0x15d0   :  { %v1472_v47 = vmul.f32 %v3531_v46, %v1470_v45  ;;  %vm1477_vm15 = vweird.f32 %v3531_v46 }
0x15d1   :  { %vm1478_vm1 = vmor %vm1476_vm0, %vm1477_vm15 }
0x15d2   :  { %v1473_v48 = vsub.f32 1.0, %v1472_v47 }
0x15d4   :  { %v1474_v49 = vmul.f32 %v3531_v46, %v1473_v48 }
0x15d6   :  { %v1475_v50 = vadd.f32 %v3531_v46, %v1474_v49 }
0x15d8   :  { %v1479_v10 = vsel %vm1478_vm1, %v3531_v46, %v1475_v50  ;;  %vm1299_vm1 = vcmask 123904  }
0x15d9   :  { %v1484_v0 = vsel %vm1481_vm4, %v1483_v53, %v1479_v10  ;;  %vm1511_vm4 = vcmask 130054  }
0x15da   :  { %v1490_v63 = vmul.f32 %v1488_v1, %v1484_v0 }
0x161f   :  { %v1493_v54 = vpop.permute.xlu2 %1492 }
0x1620   :  { %v1495_v60 = vmul.f32 %v1493_v54, %v1484_v0 }
0x1622   :  { %1497 = vrot.lane.b32.xlu0 %v1495_v60, %s3729_s6 }
0x1694   :  { %v1498_v58 = vpop.permute.xlu0 %1497 }
0x1695   :  { %v1500_v56 = vadd.f32 %v1498_v58, %v1490_v63 }
0x1697   :  { %3532 = vtanh.f32 %v1500_v56  ;;  %v1556_v25 = vrot.slane %v1500_v56, 6 }
0x169d   :  { %v3533_v55 = vpop.eup %3532 }
0x169e   :  { %1503 = vrot.lane.b32.xlu2 %v3533_v55, %s3729_s6 }
0x16f8   :  { %v1504_v57 = vpop.permute.xlu2 %1503 }
0x16f9   :  { %v1506_v59 = vmul.f32 %v1504_v57, %v1484_v0 }
0x16fb   :  { %v1513_v62 = vpack.c.bf16 %v1506_v59, %v1506_v59 }
0x16fd   :  { %v1515_v2 = vrot.slane %v1513_v62, 3 }
0x16ff   :  { %1516 = vrot.lane.b32.xlu0 %v1515_v2, %s3735_s0  ;;  %v1653_v2 = vld [vmem:[#allocation5 + $0xd8] sm:$0x7] }
0x1771   :  { %v1517_v3 = vpop.permute.xlu0 %1516 }
0x1772   :  { %3130 = vmatmul.msk.bf16.vlgmr.msra.gmra.mxu3 %vm908_vm11, %v1517_v3  ;;  %v1687_v3 = vsel %vm786_vm9, %v1653_v2, 0 }
0x1773   :  { %1696 = vmatpush.bf16.msrb.mxu2 %v1687_v3  ;;  %1764 = vmatpush.bf16.msrb.mxu3 %v1687_v3 }
0x1774   :  { %1835 = vmatpush.bf16.msra.mxu0 %v1687_v3 }
0x1777   :  { %1977 = vmatpush.bf16.msra.mxu2 %v1687_v3  ;;  %2043 = vmatpush.bf16.msra.mxu3 %v1687_v3 }
0x17f5   :  { %v1530_v6 = vpop.f32.mrf.mxu3 }
0x17f6   :  { %v1534_v7 = vadd.f32 %v1530_v6, %v1228_v5 }
0x17f8   :  { %3534 = vtanh.f32 %v1534_v7  ;;  %v3131_v12 = vmul.f32 -1.442695, %v1534_v7  ;;  %v1656_v7 = vld [vmem:[%s4395_s4 + $0x110] sm:$0x3] }
0x17fa   :  { %3536 = vpow2.f32 %v3131_v12 }
0x17fd   :  { %v1532_v9 = vpop.f32.mrf.mxu3 }
0x17fe   :  { %v3535_v11 = vpop.eup %3534 }
0x17ff   :  { %1560 = vrot.lane.b32.xlu1 %v3535_v11, %s3736_s20 }
0x1800   :  { %v3537_v13 = vpop.eup %3536 }
0x1801   :  { %v1538_v14 = vadd.f32 1.0, %v3537_v13 }
0x1803   :  { %3538 = vrcp.f32 %v1538_v14  ;;  %v1550_v21 = vand.u32 2147483648, %v1538_v14  ;;  %vm1544_vm6 = vweird.f32 %v1538_v14  ;;  %v1548_v8 = vand.u32 2147483647, %v1538_v14 }
0x1805   :  { %v1551_v22 = vor.u32 1.1754944e-38, %v1550_v21  ;;  %vm1549_vm8 = vcmp.eq.f32.partialorder %v1548_v8, 8.507059e+37 }
0x1809   :  { %v3539_v15 = vpop.eup %3538 }
0x180a   :  { %v1540_v16 = vmul.f32 %v3539_v15, %v1538_v14  ;;  %vm1545_vm5 = vweird.f32 %v3539_v15 }
0x180b   :  { %vm1546_vm7 = vmor %vm1544_vm6, %vm1545_vm5  ;;  %vm1369_vm5 = vcmask 125954   ;;  %vm1440_vm6 = vcmask 128004  }
0x180c   :  { %v1541_v17 = vsub.f32 1.0, %v1540_v16  ;;  %v4147_v16 = vld [vmem:[%s4395_s4 + $0x100] ss:$0 sm:$0xff] }
0x180e   :  { %v1542_v19 = vmul.f32 %v3539_v15, %v1541_v17 }
0x1810   :  { %v1543_v20 = vadd.f32 %v3539_v15, %v1542_v19 }
0x1812   :  { %v1547_v37 = vsel %vm1546_vm7, %v3539_v15, %v1543_v20 }
0x1813   :  { %v1552_v4 = vsel %vm1549_vm8, %v1551_v22, %v1547_v37 }
0x1814   :  { %v1558_v26 = vmul.f32 %v1556_v25, %v1552_v4 }
0x1871   :  { %v1561_v23 = vpop.permute.xlu1 %1560 }
0x1872   :  { %v1563_v24 = vmul.f32 %v1561_v23, %v1552_v4 }
0x1874   :  { %1565 = vrot.lane.b32.xlu2 %v1563_v24, %s3729_s6 }
0x18ce   :  { %v1566_v27 = vpop.permute.xlu2 %1565 }
0x18cf   :  { %v1568_v28 = vadd.f32 %v1566_v27, %v1558_v26 }
0x18d1   :  { %3540 = vtanh.f32 %v1568_v28  ;;  %v1625_v60 = vrot.slane %v1568_v28, 6 }
0x18d7   :  { %v3541_v29 = vpop.eup %3540 }
0x18d8   :  { %1571 = vrot.lane.b32.xlu0 %v3541_v29, %s3729_s6 }
0x194a   :  { %v1572_v30 = vpop.permute.xlu0 %1571 }
0x194b   :  { %v1574_v31 = vmul.f32 %v1572_v30, %v1552_v4 }
0x194d   :  { %v1580_v32 = vpack.c.bf16 %v1574_v31, %v1574_v31 }
0x194f   :  { %1582 = vrot.lane.b32.xlu1 %v1580_v32, %s3735_s0 }
0x19c1   :  { %v1583_v34 = vpop.permute.xlu1 %1582 }
0x19c2   :  { %3132 = vmatmul.msk.bf16.vlgmr.msrb.gmra.mxu0 %vm908_vm11, %v1583_v34 }
0x1a3f   :  { %v1596_v36 = vpop.f32.mrf.mxu0 }
0x1a40   :  { %v1601_v18 = vrot.slane %v1596_v36, 6 }
0x1a42   :  { %v1603_v38 = vadd.f32 %v1601_v18, %v1228_v5  ;;  %v1655_v5 = vld [vmem:[%s4395_s4 + $0x108] sm:$0x3] }
0x1a43   :  { %v1682_v6 = vpack.c.bf16 %v1655_v5, %v1655_v5 }
0x1a44   :  { %3542 = vtanh.f32 %v1603_v38  ;;  %v3133_v41 = vmul.f32 -1.442695, %v1603_v38 }
0x1a45   :  { %3139 = vmatmul.msk.bf16.vlgmr.msrb.gmra.mxu2 %vm782_vm10, %v1682_v6 }
0x1a46   :  { %3544 = vpow2.f32 %v3133_v41 }
0x1a47   :  { %v1598_v39 = vpop.f32.mrf.mxu0 }
0x1a4a   :  { %v3543_v40 = vpop.eup %3542 }
0x1a4b   :  { %1629 = vrot.lane.b32.xlu2 %v3543_v40, %s3736_s20 }
0x1a4c   :  { %v3545_v42 = vpop.eup %3544 }
0x1a4d   :  { %v1607_v43 = vadd.f32 1.0, %v3545_v42 }
0x1a4f   :  { %3546 = vrcp.f32 %v1607_v43  ;;  %v1619_v49 = vand.u32 2147483648, %v1607_v43  ;;  %vm1613_vm14 = vweird.f32 %v1607_v43  ;;  %v1617_v50 = vand.u32 2147483647, %v1607_v43 }
0x1a51   :  { %v1620_v52 = vor.u32 1.1754944e-38, %v1619_v49  ;;  %vm1618_vm0 = vcmp.eq.f32.partialorder %v1617_v50, 8.507059e+37 }
0x1a53   :  { %1296 = vrot.lane.b32.xlu2 %v4077_v35, %s3735_s0 }
0x1a55   :  { %v3547_v44 = vpop.eup %3546 }
0x1a56   :  { %v1609_v45 = vmul.f32 %v3547_v44, %v1607_v43  ;;  %vm1614_vm13 = vweird.f32 %v3547_v44 }
0x1a57   :  { %vm1615_vm15 = vmor %vm1613_vm14, %vm1614_vm13 }
0x1a58   :  { %v1610_v46 = vsub.f32 1.0, %v1609_v45 }
0x1a5a   :  { %v1611_v47 = vmul.f32 %v3547_v44, %v1610_v46 }
0x1a5b   :  { %1508 = vrot.lane.b32.xlu2 %v1506_v59, %s3735_s0 }
0x1a5c   :  { %v1612_v48 = vadd.f32 %v3547_v44, %v1611_v47 }
0x1a5e   :  { %v1616_v51 = vsel %vm1615_vm15, %v3547_v44, %v1612_v48 }
0x1a5f   :  { %v1621_v10 = vsel %vm1618_vm0, %v1620_v52, %v1616_v51 }
0x1a60   :  { %v1627_v1 = vmul.f32 %v1625_v60, %v1621_v10 }
0x1aa5   :  { %v1630_v35 = vpop.permute.xlu2 %1629 }
0x1aa6   :  { %v1632_v53 = vmul.f32 %v1630_v35, %v1621_v10 }
0x1aa8   :  { %1634 = vrot.lane.b32.xlu0 %v1632_v53, %s3729_s6 }
0x1aad   :  { %v1297_v54 = vpop.permute.xlu2 %1296 }
0x1aae   :  { %1300 = vst.msk [vmem:[#allocation2] sm:$0x3] %vm1299_vm1, %v1297_v54 }
0x1ab0   :  { %1366 = vrot.lane.b32.xlu0 %v4089_v61, %s3735_s0 }
0x1ab5   :  { %v1509_v0 = vpop.permute.xlu2 %1508 }
0x1ab6   :  { %1512 = vst.msk [vmem:[#allocation2] sm:$0xc0] %vm1511_vm4, %v1509_v0 }
0x1ab8   :  { %1576 = vrot.lane.b32.xlu0 %v1574_v31, %s3735_s0 }
0x1ac0   :  { %1724 = vrot.lane.b32.xlu0 %v1656_v7, %s3737_s27 }
0x1ac8   :  { %v1698_v14 = vpop.f32.mrf.mxu2 }
0x1ad0   :  { %v1700_v15 = vpop.f32.mrf.mxu2 }
0x1b1a   :  { %v1635_v63 = vpop.permute.xlu0 %1634 }
0x1b1b   :  { %v1637_v58 = vadd.f32 %v1635_v63, %v1627_v1 }
0x1b1d   :  { %3548 = vtanh.f32 %v1637_v58 }
0x1b22   :  { %v1367_v56 = vpop.permute.xlu0 %1366 }
0x1b23   :  { %v3549_v55 = vpop.eup %3548  ;;  %1370 = vst.msk [vmem:[#allocation2] sm:$0xc] %vm1369_vm5, %v1367_v56 }
0x1b24   :  { %1640 = vrot.lane.b32.xlu1 %v3549_v55, %s3729_s6 }
0x1b2a   :  { %v1577_v57 = vpop.permute.xlu0 %1576 }
0x1b2b   :  { %1579 = vst.msk [vmem:[#allocation2 + $0x8] sm:$0x3] %vm1299_vm1, %v1577_v57 }
0x1b2c   :  { %1437 = vrot.lane.b32.xlu1 %v4099_v33, %s3735_s0  ;;  %v3363_v33 = vld [vmem:[#allocation5 + $0xd0] sm:$0xff] }
0x1b2d   :  { %1675 = vmatpush.bf16.msrb.mxu1 %v3363_v33 }
0x1b31   :  { %1906 = vmatpush.bf16.msra.mxu1 %v1687_v3 }
0x1b32   :  { %v1725_v36 = vpop.permute.xlu0 %1724 }
0x1b96   :  { %v1641_v61 = vpop.permute.xlu1 %1640 }
0x1b97   :  { %v1643_v59 = vmul.f32 %v1641_v61, %v1621_v10 }
0x1b99   :  { %1645 = vrot.lane.b32.xlu1 %v1643_v59, %s3735_s0  ;;  %s3741_s0 = smov 104  }
0x1b9e   :  { %v1438_v62 = vpop.permute.xlu1 %1437 }
0x1b9f   :  { %1441 = vst.msk [vmem:[#allocation2] sm:$0x30] %vm1440_vm6, %v1438_v62 }
0x1ba6   :  { %v1649_v11 = vld [vmem:[#allocation2] sm:$0xff] }
0x1c0b   :  { %v1646_v9 = vpop.permute.xlu1 %1645 }
0x1c0c   :  { %1648 = vst.msk [vmem:[#allocation2 + $0x8] sm:$0xc] %vm1369_vm5, %v1646_v9 }
0x1c13   :  { %v1650_v12 = vld [vmem:[#allocation2 + $0x8] sm:$0xf] }
0x1c14   :  { %v1657_v13 = vpack.c.bf16 %v1650_v12, %v1649_v11 }
0x1c16   :  { %3138 = vmatmul.msk.bf16.vlgmr.msrb.gmra.mxu1 %vm908_vm11, %v1657_v13 }
0x1c93   :  { %v1677_v17 = vpop.f32.mrf.mxu1 }
0x1c94   :  { %v4150_v19 = vadd.f32 %v4147_v16, %v1677_v17 }
0x1c96   :  { %v1702_v20 = vadd.f32 %v1698_v14, %v4150_v19 }
0x1c98   :  { %3550 = vtanh.f32 %v1702_v20  ;;  %v3140_v8 = vmul.f32 -1.442695, %v1702_v20 }
0x1c9a   :  { %3552 = vpow2.f32 %v3140_v8 }
0x1c9e   :  { %v3551_v21 = vpop.eup %3550 }
0x1c9f   :  { %1729 = vrot.lane.b32.xlu2 %v3551_v21, %s3738_s30 }
0x1ca0   :  { %v3553_v37 = vpop.eup %3552 }
0x1ca1   :  { %v1706_v22 = vadd.f32 1.0, %v3553_v37 }
0x1ca3   :  { %3554 = vrcp.f32 %v1706_v22  ;;  %v1718_v27 = vand.u32 2147483648, %v1706_v22  ;;  %vm1712_vm7 = vweird.f32 %v1706_v22  ;;  %v1716_v28 = vand.u32 2147483647, %v1706_v22 }
0x1ca5   :  { %v1719_v30 = vor.u32 1.1754944e-38, %v1718_v27  ;;  %vm1717_vm13 = vcmp.eq.f32.partialorder %v1716_v28, 8.507059e+37 }
0x1ca9   :  { %v3555_v23 = vpop.eup %3554 }
0x1caa   :  { %v1708_v4 = vmul.f32 %v3555_v23, %v1706_v22  ;;  %vm1713_vm11 = vweird.f32 %v3555_v23 }
0x1cab   :  { %vm1714_vm8 = vmor %vm1712_vm7, %vm1713_vm11 }
0x1cac   :  { %v1709_v24 = vsub.f32 1.0, %v1708_v4 }
0x1cae   :  { %v1710_v25 = vmul.f32 %v3555_v23, %v1709_v24 }
0x1cb0   :  { %v1711_v26 = vadd.f32 %v3555_v23, %v1710_v25 }
0x1cb2   :  { %v1715_v29 = vsel %vm1714_vm8, %v3555_v23, %v1711_v26 }
0x1cb3   :  { %v1720_v31 = vsel %vm1717_vm13, %v1719_v30, %v1715_v29 }
0x1cb4   :  { %v1727_v18 = vmul.f32 %v1725_v36, %v1720_v31 }
0x1cf9   :  { %v1730_v32 = vpop.permute.xlu2 %1729 }
0x1cfa   :  { %v1732_v34 = vmul.f32 %v1730_v32, %v1720_v31 }
0x1cfc   :  { %1734 = vrot.lane.b32.xlu1 %v1732_v34, %s3737_s27 }
0x1d6e   :  { %v1735_v38 = vpop.permute.xlu1 %1734 }
0x1d6f   :  { %v1737_v39 = vadd.f32 %v1735_v38, %v1727_v18 }
0x1d71   :  { %3556 = vtanh.f32 %v1737_v39  ;;  %v1795_v61 = vrot.slane %v1737_v39, 6 }
0x1d77   :  { %v3557_v40 = vpop.eup %3556 }
0x1d78   :  { %1740 = vrot.lane.b32.xlu2 %v3557_v40, %s3737_s27 }
0x1dd2   :  { %v1741_v41 = vpop.permute.xlu2 %1740 }
0x1dd3   :  { %v4156_v42 = vmul.f32 %v1741_v41, %v1720_v31 }
0x1dd5   :  { %v1750_v43 = vpack.c.bf16 %v4156_v42, %v4156_v42 }
0x1dd7   :  { %1752 = vrot.lane.b32.xlu0 %v1750_v43, %s3739_s1 }
0x1e49   :  { %v1753_v44 = vpop.permute.xlu0 %1752 }
0x1e4a   :  { %3141 = vmatmul.msk.bf16.vlgmr.msrb.gmra.mxu3 %vm782_vm10, %v1753_v44  ;;  %v1679_v44 = vpop.f32.mrf.mxu1 }
0x1ecd   :  { %v1766_v45 = vpop.f32.mrf.mxu3 }
0x1ece   :  { %v1771_v46 = vrot.slane %v1766_v45, 6 }
0x1ed0   :  { %v1773_v47 = vadd.f32 %v1771_v46, %v4150_v19 }
0x1ed2   :  { %3558 = vtanh.f32 %v1773_v47  ;;  %v3142_v50 = vmul.f32 -1.442695, %v1773_v47 }
0x1ed4   :  { %3560 = vpow2.f32 %v3142_v50 }
0x1ed5   :  { %v1768_v48 = vpop.f32.mrf.mxu3 }
0x1ed8   :  { %v3559_v49 = vpop.eup %3558 }
0x1ed9   :  { %1799 = vrot.lane.b32.xlu1 %v3559_v49, %s3738_s30 }
0x1eda   :  { %v3561_v51 = vpop.eup %3560 }
0x1edb   :  { %v1777_v52 = vadd.f32 1.0, %v3561_v51 }
0x1edd   :  { %3562 = vrcp.f32 %v1777_v52  ;;  %v1789_v60 = vand.u32 2147483648, %v1777_v52  ;;  %vm1783_vm15 = vweird.f32 %v1777_v52  ;;  %v1787_v1 = vand.u32 2147483647, %v1777_v52 }
0x1edf   :  { %v1790_v58 = vor.u32 1.1754944e-38, %v1789_v60  ;;  %vm1788_vm1 = vcmp.eq.f32.partialorder %v1787_v1, 8.507059e+37 }
0x1ee3   :  { %v3563_v35 = vpop.eup %3562 }
0x1ee4   :  { %v1779_v10 = vmul.f32 %v3563_v35, %v1777_v52  ;;  %vm1784_vm14 = vweird.f32 %v3563_v35 }
0x1ee5   :  { %vm1785_vm0 = vmor %vm1783_vm15, %vm1784_vm14 }
0x1ee6   :  { %v1780_v53 = vsub.f32 1.0, %v1779_v10 }
0x1ee8   :  { %v1781_v54 = vmul.f32 %v3563_v35, %v1780_v53 }
0x1eea   :  { %v1782_v0 = vadd.f32 %v3563_v35, %v1781_v54 }
0x1eec   :  { %v1786_v63 = vsel %vm1785_vm0, %v3563_v35, %v1782_v0 }
0x1eed   :  { %v1791_v55 = vsel %vm1788_vm1, %v1790_v58, %v1786_v63 }
0x1eee   :  { %v1797_v59 = vmul.f32 %v1795_v61, %v1791_v55 }
0x1f4b   :  { %v1800_v56 = vpop.permute.xlu1 %1799 }
0x1f4c   :  { %v1802_v57 = vmul.f32 %v1800_v56, %v1791_v55 }
0x1f4e   :  { %1804 = vrot.lane.b32.xlu2 %v1802_v57, %s3737_s27 }
0x1fa8   :  { %v1805_v62 = vpop.permute.xlu2 %1804 }
0x1fa9   :  { %v1807_v2 = vadd.f32 %v1805_v62, %v1797_v59 }
0x1fab   :  { %3564 = vtanh.f32 %v1807_v2  ;;  %v1866_v31 = vrot.slane %v1807_v2, 6 }
0x1fb1   :  { %v3565_v3 = vpop.eup %3564 }
0x1fb2   :  { %1810 = vrot.lane.b32.xlu0 %v3565_v3, %s3737_s27 }
0x2024   :  { %v1811_v5 = vpop.permute.xlu0 %1810 }
0x2025   :  { %v4166_v6 = vmul.f32 %v1811_v5, %v1791_v55 }
0x2027   :  { %v1820_v33 = vpack.c.bf16 %v4166_v6, %v4166_v6 }
0x2029   :  { %v1822_v7 = vrot.slane %v1820_v33, 1 }
0x202b   :  { %1823 = vrot.lane.b32.xlu1 %v1822_v7, %s3739_s1 }
0x209d   :  { %v1824_v9 = vpop.permute.xlu1 %1823 }
0x209e   :  { %3143 = vmatmul.msk.bf16.vlgmr.msra.gmra.mxu0 %vm782_vm10, %v1824_v9 }
0x211b   :  { %v1837_v11 = vpop.f32.mrf.mxu0 }
0x211c   :  { %v1842_v12 = vrot.slane %v1837_v11, 4  ;;  %v1680_v11 = vadd.f32 %v4147_v16, %v1679_v44 }
0x211e   :  { %v1844_v13 = vadd.f32 %v1842_v12, %v4150_v19 }
0x2120   :  { %3566 = vtanh.f32 %v1844_v13  ;;  %v3144_v17 = vmul.f32 -1.442695, %v1844_v13 }
0x2122   :  { %3568 = vpow2.f32 %v3144_v17 }
0x2123   :  { %v1839_v14 = vpop.f32.mrf.mxu0 }
0x2126   :  { %v3567_v15 = vpop.eup %3566 }
0x2127   :  { %1870 = vrot.lane.b32.xlu2 %v3567_v15, %s3738_s30 }
0x2128   :  { %v3569_v20 = vpop.eup %3568 }
0x2129   :  { %v1848_v21 = vadd.f32 1.0, %v3569_v20 }
0x212b   :  { %3570 = vrcp.f32 %v1848_v21  ;;  %v1860_v24 = vand.u32 2147483648, %v1848_v21  ;;  %vm1854_vm5 = vweird.f32 %v1848_v21  ;;  %v1858_v25 = vand.u32 2147483647, %v1848_v21 }
0x212d   :  { %v1861_v27 = vor.u32 1.1754944e-38, %v1860_v24  ;;  %vm1859_vm11 = vcmp.eq.f32.partialorder %v1858_v25, 8.507059e+37 }
0x2131   :  { %v3571_v8 = vpop.eup %3570 }
0x2132   :  { %v1850_v37 = vmul.f32 %v3571_v8, %v1848_v21  ;;  %vm1855_vm4 = vweird.f32 %v3571_v8 }
0x2133   :  { %vm1856_vm6 = vmor %vm1854_vm5, %vm1855_vm4 }
0x2134   :  { %v1851_v22 = vsub.f32 1.0, %v1850_v37 }
0x2136   :  { %v1852_v23 = vmul.f32 %v3571_v8, %v1851_v22 }
0x2138   :  { %v1853_v4 = vadd.f32 %v3571_v8, %v1852_v23 }
0x213a   :  { %v1857_v26 = vsel %vm1856_vm6, %v3571_v8, %v1853_v4 }
0x213b   :  { %v1862_v29 = vsel %vm1859_vm11, %v1861_v27, %v1857_v26 }
0x213c   :  { %v1868_v32 = vmul.f32 %v1866_v31, %v1862_v29 }
0x2181   :  { %v1871_v28 = vpop.permute.xlu2 %1870 }
0x2182   :  { %v1873_v30 = vmul.f32 %v1871_v28, %v1862_v29 }
0x2184   :  { %1875 = vrot.lane.b32.xlu0 %v1873_v30, %s3737_s27 }
0x21f6   :  { %v1876_v34 = vpop.permute.xlu0 %1875 }
0x21f7   :  { %v1878_v36 = vadd.f32 %v1876_v34, %v1868_v32 }
0x21f9   :  { %3572 = vtanh.f32 %v1878_v36  ;;  %v1937_v57 = vrot.slane %v1878_v36, 6 }
0x21ff   :  { %v3573_v18 = vpop.eup %3572 }
0x2200   :  { %1881 = vrot.lane.b32.xlu1 %v3573_v18, %s3737_s27 }
0x2272   :  { %v1882_v38 = vpop.permute.xlu1 %1881 }
0x2273   :  { %v4176_v39 = vmul.f32 %v1882_v38, %v1862_v29 }
0x2275   :  { %v1891_v40 = vpack.c.bf16 %v4176_v39, %v4176_v39 }
0x2277   :  { %v1893_v41 = vrot.slane %v1891_v40, 2 }
0x2279   :  { %1894 = vrot.lane.b32.xlu2 %v1893_v41, %s3739_s1 }
0x22d3   :  { %v1895_v43 = vpop.permute.xlu2 %1894 }
0x22d4   :  { %3145 = vmatmul.msk.bf16.vlgmr.msra.gmra.mxu1 %vm782_vm10, %v1895_v43 }
0x2351   :  { %v1908_v45 = vpop.f32.mrf.mxu1 }
0x2352   :  { %v1913_v46 = vrot.slane %v1908_v45, 2 }
0x2354   :  { %v1915_v47 = vadd.f32 %v1913_v46, %v4150_v19 }
0x2356   :  { %3574 = vtanh.f32 %v1915_v47  ;;  %v3146_v50 = vmul.f32 -1.442695, %v1915_v47 }
0x2358   :  { %3576 = vpow2.f32 %v3146_v50 }
0x2359   :  { %v1910_v48 = vpop.f32.mrf.mxu1 }
0x235c   :  { %v3575_v49 = vpop.eup %3574 }
0x235d   :  { %1941 = vrot.lane.b32.xlu0 %v3575_v49, %s3738_s30 }
0x235e   :  { %v3577_v51 = vpop.eup %3576 }
0x235f   :  { %v1919_v52 = vadd.f32 1.0, %v3577_v51 }
0x2361   :  { %3578 = vrcp.f32 %v1919_v52  ;;  %v1931_v60 = vand.u32 2147483648, %v1919_v52  ;;  %vm1925_vm8 = vweird.f32 %v1919_v52  ;;  %v1929_v1 = vand.u32 2147483647, %v1919_v52 }
0x2363   :  { %v1932_v63 = vor.u32 1.1754944e-38, %v1931_v60  ;;  %vm1930_vm14 = vcmp.eq.f32.partialorder %v1929_v1, 8.507059e+37 }
0x2367   :  { %v3579_v35 = vpop.eup %3578 }
0x2368   :  { %v1921_v10 = vmul.f32 %v3579_v35, %v1919_v52  ;;  %vm1926_vm7 = vweird.f32 %v3579_v35 }
0x2369   :  { %vm1927_vm13 = vmor %vm1925_vm8, %vm1926_vm7  ;;  %vm1748_vm8 = vcmask 41984  }
0x236a   :  { %v1922_v53 = vsub.f32 1.0, %v1921_v10 }
0x236c   :  { %v1923_v54 = vmul.f32 %v3579_v35, %v1922_v53 }
0x236e   :  { %v1924_v0 = vadd.f32 %v3579_v35, %v1923_v54 }
0x2370   :  { %v1928_v19 = vsel %vm1927_vm13, %v3579_v35, %v1924_v0  ;;  %vm1960_vm13 = vcmask 48134  }
0x2371   :  { %v1933_v56 = vsel %vm1930_vm14, %v1932_v63, %v1928_v19  ;;  %vm1818_vm14 = vcmask 44034  }
0x2372   :  { %v1939_v61 = vmul.f32 %v1937_v57, %v1933_v56 }
0x23cf   :  { %v1942_v58 = vpop.permute.xlu0 %1941 }
0x23d0   :  { %v1944_v55 = vmul.f32 %v1942_v58, %v1933_v56 }
0x23d2   :  { %1946 = vrot.lane.b32.xlu1 %v1944_v55, %s3737_s27 }
0x2444   :  { %v1947_v59 = vpop.permute.xlu1 %1946 }
0x2445   :  { %v1949_v62 = vadd.f32 %v1947_v59, %v1939_v61 }
0x2447   :  { %3580 = vtanh.f32 %v1949_v62  ;;  %v2005_v30 = vrot.slane %v1949_v62, 6 }
0x244d   :  { %v3581_v2 = vpop.eup %3580 }
0x244e   :  { %1952 = vrot.lane.b32.xlu2 %v3581_v2, %s3737_s27 }
0x24a8   :  { %v1953_v3 = vpop.permute.xlu2 %1952 }
0x24a9   :  { %v1955_v5 = vmul.f32 %v1953_v3, %v1933_v56 }
0x24ab   :  { %v1962_v33 = vpack.c.bf16 %v1955_v5, %v1955_v5 }
0x24ad   :  { %v1964_v7 = vrot.slane %v1962_v33, 3 }
0x24af   :  { %1965 = vrot.lane.b32.xlu0 %v1964_v7, %s3739_s1  ;;  %v2101_v7 = vld [vmem:[#allocation5 + $0xe8] sm:$0xf] }
0x2521   :  { %v1966_v9 = vpop.permute.xlu0 %1965 }
0x2522   :  { %3147 = vmatmul.msk.bf16.vlgmr.msra.gmra.mxu2 %vm782_vm10, %v1966_v9  ;;  %v2100_v9 = vld [vmem:[#allocation5 + $0xe0] sm:$0x7] }
0x25a5   :  { %v1979_v12 = vpop.f32.mrf.mxu2 }
0x25a6   :  { %v1983_v13 = vadd.f32 %v1979_v12, %v1680_v11  ;;  %v2111_v12 = vsel %vm786_vm9, %v2100_v9, 0 }
0x25a7   :  { %2120 = vmatpush.bf16.msrb.mxu0 %v2111_v12 }
0x25a8   :  { %3582 = vtanh.f32 %v1983_v13  ;;  %v3148_v17 = vmul.f32 -1.442695, %v1983_v13  ;;  %v2103_v13 = vld [vmem:[%s4395_s4 + $0x120] sm:$0x3] }
0x25aa   :  { %3584 = vpow2.f32 %v3148_v17 }
0x25ad   :  { %v1981_v14 = vpop.f32.mrf.mxu2 }
0x25ae   :  { %v3583_v15 = vpop.eup %3582  ;;  %v2104_v14 = vld [vmem:[%s4395_s4 + $0x128] sm:$0x3] }
0x25af   :  { %2009 = vrot.lane.b32.xlu1 %v3583_v15, %s3738_s30 }
0x25b0   :  { %v3585_v20 = vpop.eup %3584 }
0x25b1   :  { %v1987_v21 = vadd.f32 1.0, %v3585_v20 }
0x25b3   :  { %3586 = vrcp.f32 %v1987_v21  ;;  %v1999_v24 = vand.u32 2147483648, %v1987_v21  ;;  %vm1993_vm0 = vweird.f32 %v1987_v21  ;;  %v1997_v16 = vand.u32 2147483647, %v1987_v21 }
0x25b5   :  { %v2000_v26 = vor.u32 1.1754944e-38, %v1999_v24  ;;  %vm1998_vm4 = vcmp.eq.f32.partialorder %v1997_v16, 8.507059e+37 }
0x25b9   :  { %v3587_v8 = vpop.eup %3586 }
0x25ba   :  { %v1989_v37 = vmul.f32 %v3587_v8, %v1987_v21  ;;  %vm1994_vm15 = vweird.f32 %v3587_v8 }
0x25bb   :  { %vm1995_vm1 = vmor %vm1993_vm0, %vm1994_vm15  ;;  %vm1889_vm15 = vcmask 46084  }
0x25bc   :  { %v1990_v22 = vsub.f32 1.0, %v1989_v37 }
0x25be   :  { %v1991_v23 = vmul.f32 %v3587_v8, %v1990_v22  ;;  %v4224_v22 = vld [vmem:[%s4395_s4 + $0x118] ss:$0 sm:$0xff]  ;;  %s3742_s4 = smov 120  }
0x25c0   :  { %v1992_v4 = vadd.f32 %v3587_v8, %v1991_v23 }
0x25c2   :  { %v1996_v25 = vsel %vm1995_vm1, %v3587_v8, %v1992_v4 }
0x25c3   :  { %v2001_v28 = vsel %vm1998_vm4, %v2000_v26, %v1996_v25 }
0x25c4   :  { %v2007_v31 = vmul.f32 %v2005_v30, %v2001_v28 }
0x2621   :  { %v2010_v27 = vpop.permute.xlu1 %2009 }
0x2622   :  { %v2012_v29 = vmul.f32 %v2010_v27, %v2001_v28 }
0x2624   :  { %2014 = vrot.lane.b32.xlu2 %v2012_v29, %s3737_s27 }
0x267e   :  { %v2015_v32 = vpop.permute.xlu2 %2014 }
0x267f   :  { %v2017_v34 = vadd.f32 %v2015_v32, %v2007_v31 }
0x2681   :  { %3588 = vtanh.f32 %v2017_v34  ;;  %v2074_v55 = vrot.slane %v2017_v34, 6 }
0x2687   :  { %v3589_v36 = vpop.eup %3588 }
0x2688   :  { %2020 = vrot.lane.b32.xlu0 %v3589_v36, %s3737_s27 }
0x26fa   :  { %v2021_v18 = vpop.permute.xlu0 %2020 }
0x26fb   :  { %v2023_v38 = vmul.f32 %v2021_v18, %v2001_v28 }
0x26fd   :  { %v2029_v40 = vpack.c.bf16 %v2023_v38, %v2023_v38 }
0x26ff   :  { %2031 = vrot.lane.b32.xlu1 %v2029_v40, %s3739_s1 }
0x2771   :  { %v2032_v41 = vpop.permute.xlu1 %2031 }
0x2772   :  { %3149 = vmatmul.msk.bf16.vlgmr.msra.gmra.mxu3 %vm782_vm10, %v2032_v41 }
0x27f5   :  { %v2045_v43 = vpop.f32.mrf.mxu3 }
0x27f6   :  { %v2050_v44 = vrot.slane %v2045_v43, 6 }
0x27f8   :  { %v2052_v45 = vadd.f32 %v2050_v44, %v1680_v11  ;;  %v2132_v11 = vsel %vm93_vm2, %v2101_v7, 0 }
0x27f9   :  { %2141 = vmatpush.bf16.msrb.mxu1 %v2132_v11  ;;  %2209 = vmatpush.bf16.msrb.mxu2 %v2132_v11 }
0x27fa   :  { %3590 = vtanh.f32 %v2052_v45  ;;  %v3150_v48 = vmul.f32 -1.442695, %v2052_v45  ;;  %2280 = vmatpush.bf16.msrb.mxu3 %v2132_v11  ;;  %2347 = vmatpush.bf16.msra.mxu0 %v2132_v11 }
0x27fc   :  { %3592 = vpow2.f32 %v3150_v48 }
0x27fd   :  { %v2047_v46 = vpop.f32.mrf.mxu3  ;;  %2418 = vmatpush.bf16.msra.mxu1 %v2132_v11  ;;  %2485 = vmatpush.bf16.msra.mxu2 %v2132_v11 }
0x2800   :  { %v3591_v47 = vpop.eup %3590 }
0x2801   :  { %2078 = vrot.lane.b32.xlu2 %v3591_v47, %s3738_s30 }
0x2802   :  { %v3593_v49 = vpop.eup %3592 }
0x2803   :  { %v2056_v50 = vadd.f32 1.0, %v3593_v49 }
0x2805   :  { %3594 = vrcp.f32 %v2056_v50  ;;  %v2068_v54 = vand.u32 2147483648, %v2056_v50  ;;  %vm2062_vm6 = vweird.f32 %v2056_v50  ;;  %v2066_v0 = vand.u32 2147483647, %v2056_v50 }
0x2807   :  { %v2069_v1 = vor.u32 1.1754944e-38, %v2068_v54  ;;  %vm2067_vm7 = vcmp.eq.f32.partialorder %v2066_v0, 8.507059e+37 }
0x2809   :  { %1745 = vrot.lane.b32.xlu2 %v4156_v42, %s3739_s1 }
0x280b   :  { %v3595_v51 = vpop.eup %3594 }
0x280c   :  { %v2058_v52 = vmul.f32 %v3595_v51, %v2056_v50  ;;  %vm2063_vm5 = vweird.f32 %v3595_v51 }
0x280d   :  { %vm2064_vm11 = vmor %vm2062_vm6, %vm2063_vm5 }
0x280e   :  { %v2059_v35 = vsub.f32 1.0, %v2058_v52 }
0x2810   :  { %v2060_v10 = vmul.f32 %v3595_v51, %v2059_v35 }
0x2811   :  { %1957 = vrot.lane.b32.xlu2 %v1955_v5, %s3739_s1 }
0x2812   :  { %v2061_v53 = vadd.f32 %v3595_v51, %v2060_v10 }
0x2814   :  { %v2065_v60 = vsel %vm2064_vm11, %v3595_v51, %v2061_v53 }
0x2815   :  { %v2070_v19 = vsel %vm2067_vm7, %v2069_v1, %v2065_v60 }
0x2816   :  { %v2076_v57 = vmul.f32 %v2074_v55, %v2070_v19 }
0x285b   :  { %v2079_v42 = vpop.permute.xlu2 %2078 }
0x285c   :  { %v2081_v63 = vmul.f32 %v2079_v42, %v2070_v19 }
0x285e   :  { %2083 = vrot.lane.b32.xlu0 %v2081_v63, %s3737_s27 }
0x2863   :  { %v1746_v58 = vpop.permute.xlu2 %1745 }
0x2864   :  { %1749 = vst.msk [vmem:[#allocation3] sm:$0x3] %vm1748_vm8, %v1746_v58 }
0x2866   :  { %1815 = vrot.lane.b32.xlu0 %v4166_v6, %s3739_s1 }
0x286b   :  { %v1958_v56 = vpop.permute.xlu2 %1957 }
0x286c   :  { %1961 = vst.msk [vmem:[#allocation3] sm:$0xc0] %vm1960_vm13, %v1958_v56 }
0x286e   :  { %2025 = vrot.lane.b32.xlu0 %v2023_v38, %s3739_s1 }
0x2876   :  { %2169 = vrot.lane.b32.xlu0 %v2104_v14, %s3740_s12 }
0x28d0   :  { %v2084_v61 = vpop.permute.xlu0 %2083 }
0x28d1   :  { %v2086_v59 = vadd.f32 %v2084_v61, %v2076_v57 }
0x28d3   :  { %3596 = vtanh.f32 %v2086_v59 }
0x28d8   :  { %v1816_v62 = vpop.permute.xlu0 %1815 }
0x28d9   :  { %v3597_v2 = vpop.eup %3596  ;;  %1819 = vst.msk [vmem:[#allocation3] sm:$0xc] %vm1818_vm14, %v1816_v62 }
0x28da   :  { %2089 = vrot.lane.b32.xlu1 %v3597_v2, %s3737_s27 }
0x28e0   :  { %v2026_v3 = vpop.permute.xlu0 %2025 }
0x28e1   :  { %2028 = vst.msk [vmem:[#allocation3 + $0x8] sm:$0x3] %vm1748_vm8, %v2026_v3 }
0x28e2   :  { %1886 = vrot.lane.b32.xlu1 %v4176_v39, %s3739_s1  ;;  %v2127_v39 = vpack.c.bf16 %v2103_v13, %v2103_v13 }
0x28e4   :  { %3152 = vmatmul.msk.bf16.vlgmr.msrb.gmra.mxu1 %vm89_vm3, %v2127_v39 }
0x28e8   :  { %v2170_v44 = vpop.permute.xlu0 %2169 }
0x294c   :  { %v2090_v6 = vpop.permute.xlu1 %2089 }
0x294d   :  { %v2092_v5 = vmul.f32 %v2090_v6, %v2070_v19 }
0x294f   :  { %2094 = vrot.lane.b32.xlu1 %v2092_v5, %s3739_s1 }
0x2954   :  { %v1887_v33 = vpop.permute.xlu1 %1886 }
0x2955   :  { %1890 = vst.msk [vmem:[#allocation3] sm:$0x30] %vm1889_vm15, %v1887_v33 }
0x295c   :  { %v2098_v17 = vld [vmem:[#allocation3] sm:$0xff] }
0x2961   :  { %v2143_v8 = vpop.f32.mrf.mxu1 }
0x2969   :  { %v2145_v37 = vpop.f32.mrf.mxu1 }
0x29c1   :  { %v2095_v15 = vpop.permute.xlu1 %2094 }
0x29c2   :  { %2097 = vst.msk [vmem:[#allocation3 + $0x8] sm:$0xc] %vm1818_vm14, %v2095_v15 }
0x29c9   :  { %v2099_v20 = vld [vmem:[#allocation3 + $0x8] sm:$0xf] }
0x29ca   :  { %v2105_v21 = vpack.c.bf16 %v2099_v20, %v2098_v17 }
0x29cc   :  { %3151 = vmatmul.msk.bf16.vlgmr.msrb.gmra.mxu0 %vm782_vm10, %v2105_v21 }
0x2a49   :  { %v2122_v23 = vpop.f32.mrf.mxu0 }
0x2a4a   :  { %v4227_v4 = vadd.f32 %v4224_v22, %v2122_v23 }
0x2a4c   :  { %v2147_v24 = vadd.f32 %v2143_v8, %v4227_v4 }
0x2a4e   :  { %3598 = vtanh.f32 %v2147_v24  ;;  %v3153_v25 = vmul.f32 -1.442695, %v2147_v24 }
0x2a50   :  { %3600 = vpow2.f32 %v3153_v25 }
0x2a54   :  { %v3599_v16 = vpop.eup %3598 }
0x2a55   :  { %2174 = vrot.lane.b32.xlu2 %v3599_v16, %s3741_s0 }
0x2a56   :  { %v3601_v26 = vpop.eup %3600 }
0x2a57   :  { %v2151_v27 = vadd.f32 1.0, %v3601_v26 }
0x2a59   :  { %3602 = vrcp.f32 %v2151_v27  ;;  %v2163_v34 = vand.u32 2147483648, %v2151_v27  ;;  %vm2157_vm9 = vweird.f32 %v2151_v27  ;;  %v2161_v36 = vand.u32 2147483647, %v2151_v27 }
0x2a5b   :  { %v2164_v38 = vor.u32 1.1754944e-38, %v2163_v34  ;;  %vm2162_vm0 = vcmp.eq.f32.partialorder %v2161_v36, 8.507059e+37 }
0x2a5f   :  { %v3603_v28 = vpop.eup %3602 }
0x2a60   :  { %v2153_v29 = vmul.f32 %v3603_v28, %v2151_v27  ;;  %vm2158_vm2 = vweird.f32 %v3603_v28 }
0x2a61   :  { %vm2159_vm10 = vmor %vm2157_vm9, %vm2158_vm2 }
0x2a62   :  { %v2154_v30 = vsub.f32 1.0, %v2153_v29 }
0x2a64   :  { %v2155_v31 = vmul.f32 %v3603_v28, %v2154_v30 }
0x2a66   :  { %v2156_v32 = vadd.f32 %v3603_v28, %v2155_v31 }
0x2a68   :  { %v2160_v18 = vsel %vm2159_vm10, %v3603_v28, %v2156_v32 }
0x2a69   :  { %v2165_v40 = vsel %vm2162_vm0, %v2164_v38, %v2160_v18 }
0x2a6a   :  { %v2172_v45 = vmul.f32 %v2170_v44, %v2165_v40 }
0x2aaf   :  { %v2175_v41 = vpop.permute.xlu2 %2174 }
0x2ab0   :  { %v2177_v43 = vmul.f32 %v2175_v41, %v2165_v40 }
0x2ab2   :  { %2179 = vrot.lane.b32.xlu1 %v2177_v43, %s3740_s12 }
0x2b24   :  { %v2180_v46 = vpop.permute.xlu1 %2179 }
0x2b25   :  { %v2182_v47 = vadd.f32 %v2180_v46, %v2172_v45 }
0x2b27   :  { %3604 = vtanh.f32 %v2182_v47  ;;  %v2240_v5 = vrot.slane %v2182_v47, 6 }
0x2b2d   :  { %v3605_v48 = vpop.eup %3604 }
0x2b2e   :  { %2185 = vrot.lane.b32.xlu2 %v3605_v48, %s3740_s12 }
0x2b88   :  { %v2186_v49 = vpop.permute.xlu2 %2185 }
0x2b89   :  { %v4233_v50 = vmul.f32 %v2186_v49, %v2165_v40 }
0x2b8b   :  { %v2195_v51 = vpack.c.bf16 %v4233_v50, %v4233_v50 }
0x2b8d   :  { %2197 = vrot.lane.b32.xlu0 %v2195_v51, %s3734_s8 }
0x2bff   :  { %v2198_v52 = vpop.permute.xlu0 %2197 }
0x2c00   :  { %3154 = vmatmul.msk.bf16.vlgmr.msrb.gmra.mxu2 %vm89_vm3, %v2198_v52  ;;  %v2124_v52 = vpop.f32.mrf.mxu0 }
0x2c83   :  { %v2211_v35 = vpop.f32.mrf.mxu2 }
0x2c84   :  { %v2216_v10 = vrot.slane %v2211_v35, 6 }
0x2c86   :  { %v2218_v53 = vadd.f32 %v2216_v10, %v4227_v4 }
0x2c88   :  { %3606 = vtanh.f32 %v2218_v53  ;;  %v3155_v60 = vmul.f32 -1.442695, %v2218_v53 }
0x2c8a   :  { %3608 = vpow2.f32 %v3155_v60 }
0x2c8b   :  { %v2213_v54 = vpop.f32.mrf.mxu2 }
0x2c8e   :  { %v3607_v0 = vpop.eup %3606 }
0x2c8f   :  { %2244 = vrot.lane.b32.xlu1 %v3607_v0, %s3741_s0 }
0x2c90   :  { %v3609_v1 = vpop.eup %3608 }
0x2c91   :  { %v2222_v42 = vadd.f32 1.0, %v3609_v1 }
0x2c93   :  { %3610 = vrcp.f32 %v2222_v42  ;;  %v2234_v57 = vand.u32 2147483648, %v2222_v42  ;;  %vm2228_vm4 = vweird.f32 %v2222_v42  ;;  %v2232_v61 = vand.u32 2147483647, %v2222_v42 }
0x2c95   :  { %v2235_v62 = vor.u32 1.1754944e-38, %v2234_v57  ;;  %vm2233_vm6 = vcmp.eq.f32.partialorder %v2232_v61, 8.507059e+37 }
0x2c99   :  { %v3611_v19 = vpop.eup %3610 }
0x2c9a   :  { %v2224_v63 = vmul.f32 %v3611_v19, %v2222_v42  ;;  %vm2229_vm1 = vweird.f32 %v3611_v19 }
0x2c9b   :  { %vm2230_vm5 = vmor %vm2228_vm4, %vm2229_vm1 }
0x2c9c   :  { %v2225_v58 = vsub.f32 1.0, %v2224_v63 }
0x2c9e   :  { %v2226_v56 = vmul.f32 %v3611_v19, %v2225_v58 }
0x2ca0   :  { %v2227_v55 = vadd.f32 %v3611_v19, %v2226_v56 }
0x2ca2   :  { %v2231_v59 = vsel %vm2230_vm5, %v3611_v19, %v2227_v55 }
0x2ca3   :  { %v2236_v3 = vsel %vm2233_vm6, %v2235_v62, %v2231_v59 }
0x2ca4   :  { %v2242_v33 = vmul.f32 %v2240_v5, %v2236_v3 }
0x2d01   :  { %v2245_v2 = vpop.permute.xlu1 %2244 }
0x2d02   :  { %v2247_v6 = vmul.f32 %v2245_v2, %v2236_v3 }
0x2d04   :  { %2249 = vrot.lane.b32.xlu2 %v2247_v6, %s3740_s12 }
0x2d5e   :  { %v2250_v7 = vpop.permute.xlu2 %2249 }
0x2d5f   :  { %v2252_v9 = vadd.f32 %v2250_v7, %v2242_v33 }
0x2d61   :  { %3612 = vtanh.f32 %v2252_v9  ;;  %v2311_v40 = vrot.slane %v2252_v9, 6 }
0x2d67   :  { %v3613_v11 = vpop.eup %3612 }
0x2d68   :  { %2255 = vrot.lane.b32.xlu0 %v3613_v11, %s3740_s12 }
0x2dda   :  { %v2256_v12 = vpop.permute.xlu0 %2255 }
0x2ddb   :  { %v4243_v13 = vmul.f32 %v2256_v12, %v2236_v3 }
0x2ddd   :  { %v2265_v39 = vpack.c.bf16 %v4243_v13, %v4243_v13 }
0x2ddf   :  { %v2267_v14 = vrot.slane %v2265_v39, 1 }
0x2de1   :  { %2268 = vrot.lane.b32.xlu1 %v2267_v14, %s3734_s8 }
0x2e53   :  { %v2269_v15 = vpop.permute.xlu1 %2268 }
0x2e54   :  { %3156 = vmatmul.msk.bf16.vlgmr.msrb.gmra.mxu3 %vm89_vm3, %v2269_v15 }
0x2ed7   :  { %v2282_v17 = vpop.f32.mrf.mxu3 }
0x2ed8   :  { %v2287_v20 = vrot.slane %v2282_v17, 4  ;;  %v2125_v17 = vadd.f32 %v4224_v22, %v2124_v52 }
0x2eda   :  { %v2289_v21 = vadd.f32 %v2287_v20, %v4227_v4 }
0x2edc   :  { %3614 = vtanh.f32 %v2289_v21  ;;  %v3157_v23 = vmul.f32 -1.442695, %v2289_v21 }
0x2ede   :  { %3616 = vpow2.f32 %v3157_v23 }
0x2edf   :  { %v2284_v8 = vpop.f32.mrf.mxu3 }
0x2ee2   :  { %v3615_v37 = vpop.eup %3614 }
0x2ee3   :  { %2315 = vrot.lane.b32.xlu2 %v3615_v37, %s3741_s0 }
0x2ee4   :  { %v3617_v24 = vpop.eup %3616 }
0x2ee5   :  { %v2293_v16 = vadd.f32 1.0, %v3617_v24 }
0x2ee7   :  { %3618 = vrcp.f32 %v2293_v16  ;;  %v2305_v30 = vand.u32 2147483648, %v2293_v16  ;;  %vm2299_vm7 = vweird.f32 %v2293_v16  ;;  %v2303_v31 = vand.u32 2147483647, %v2293_v16 }
0x2ee9   :  { %v2306_v34 = vor.u32 1.1754944e-38, %v2305_v30  ;;  %vm2304_vm13 = vcmp.eq.f32.partialorder %v2303_v31, 8.507059e+37 }
0x2eed   :  { %v3619_v25 = vpop.eup %3618 }
0x2eee   :  { %v2295_v26 = vmul.f32 %v3619_v25, %v2293_v16  ;;  %vm2300_vm11 = vweird.f32 %v3619_v25 }
0x2eef   :  { %vm2301_vm8 = vmor %vm2299_vm7, %vm2300_vm11  ;;  %vm2193_vm7 = vcmask 58368  }
0x2ef0   :  { %v2296_v27 = vsub.f32 1.0, %v2295_v26 }
0x2ef2   :  { %v2297_v28 = vmul.f32 %v3619_v25, %v2296_v27 }
0x2ef4   :  { %v2298_v29 = vadd.f32 %v3619_v25, %v2297_v28 }
0x2ef6   :  { %v2302_v32 = vsel %vm2301_vm8, %v3619_v25, %v2298_v29  ;;  %vm2263_vm8 = vcmask 126018  }
0x2ef7   :  { %v2307_v18 = vsel %vm2304_vm13, %v2306_v34, %v2302_v32  ;;  %vm2330_vm13 = vcmask 193668  }
0x2ef8   :  { %v2313_v41 = vmul.f32 %v2311_v40, %v2307_v18 }
0x2f3d   :  { %v2316_v36 = vpop.permute.xlu2 %2315 }
0x2f3e   :  { %v2318_v38 = vmul.f32 %v2316_v36, %v2307_v18 }
0x2f40   :  { %2320 = vrot.lane.b32.xlu0 %v2318_v38, %s3740_s12 }
0x2fb2   :  { %v2321_v43 = vpop.permute.xlu0 %2320 }
0x2fb3   :  { %v2323_v44 = vadd.f32 %v2321_v43, %v2313_v41 }
0x2fb5   :  { %3620 = vtanh.f32 %v2323_v44  ;;  %v2378_v6 = vrot.slane %v2323_v44, 6 }
0x2fbb   :  { %v3621_v45 = vpop.eup %3620 }
0x2fbc   :  { %2326 = vrot.lane.b32.xlu1 %v3621_v45, %s3740_s12 }
0x302e   :  { %v2327_v46 = vpop.permute.xlu1 %2326 }
0x302f   :  { %v4253_v47 = vmul.f32 %v2327_v46, %v2307_v18 }
0x3031   :  { %v2332_v48 = vpack.c.bf16 %v4253_v47, %v4253_v47 }
0x3033   :  { %v2334_v49 = vrot.slane %v2332_v48, 2 }
0x3035   :  { %2335 = vrot.lane.b32.xlu2 %v2334_v49, %s3734_s8 }
0x308f   :  { %v2336_v51 = vpop.permute.xlu2 %2335 }
0x3090   :  { %3158 = vmatmul.msk.bf16.vlgmr.msra.gmra.mxu0 %vm89_vm3, %v2336_v51 }
0x310d   :  { %v2349_v35 = vpop.f32.mrf.mxu0 }
0x310e   :  { %v2354_v10 = vrot.slane %v2349_v35, 2 }
0x3110   :  { %v2356_v53 = vadd.f32 %v2354_v10, %v4227_v4 }
0x3112   :  { %3622 = vtanh.f32 %v2356_v53  ;;  %v3159_v60 = vmul.f32 -1.442695, %v2356_v53 }
0x3114   :  { %3624 = vpow2.f32 %v3159_v60 }
0x3115   :  { %v2351_v54 = vpop.f32.mrf.mxu0 }
0x3118   :  { %v3623_v0 = vpop.eup %3622 }
0x3119   :  { %2382 = vrot.lane.b32.xlu0 %v3623_v0, %s3741_s0 }
0x311a   :  { %v3625_v1 = vpop.eup %3624 }
0x311b   :  { %v2360_v42 = vadd.f32 1.0, %v3625_v1 }
0x311d   :  { %3626 = vrcp.f32 %v2360_v42  ;;  %v2372_v57 = vand.u32 2147483648, %v2360_v42  ;;  %vm2366_vm15 = vweird.f32 %v2360_v42  ;;  %v2370_v61 = vand.u32 2147483647, %v2360_v42 }
0x311f   :  { %v2373_v59 = vor.u32 1.1754944e-38, %v2372_v57  ;;  %vm2371_vm9 = vcmp.eq.f32.partialorder %v2370_v61, 8.507059e+37 }
0x3123   :  { %v3627_v19 = vpop.eup %3626 }
0x3124   :  { %v2362_v63 = vmul.f32 %v3627_v19, %v2360_v42  ;;  %vm2367_vm14 = vweird.f32 %v3627_v19 }
0x3125   :  { %vm2368_vm2 = vmor %vm2366_vm15, %vm2367_vm14  ;;  %vm2401_vm14 = vcmask 261318   ;;  %vm2469_vm15 = vcmask 320768  }
0x3126   :  { %v2363_v58 = vsub.f32 1.0, %v2362_v63 }
0x3128   :  { %v2364_v56 = vmul.f32 %v3627_v19, %v2363_v58 }
0x312a   :  { %v2365_v55 = vadd.f32 %v3627_v19, %v2364_v56 }
0x312c   :  { %v2369_v4 = vsel %vm2368_vm2, %v3627_v19, %v2365_v55  ;;  %vm2539_vm2 = vcmask 388418  }
0x312d   :  { %v2374_v2 = vsel %vm2371_vm9, %v2373_v59, %v2369_v4 }
0x312e   :  { %v2380_v5 = vmul.f32 %v2378_v6, %v2374_v2 }
0x318b   :  { %v2383_v62 = vpop.permute.xlu0 %2382 }
0x318c   :  { %v2385_v3 = vmul.f32 %v2383_v62, %v2374_v2 }
0x318e   :  { %2387 = vrot.lane.b32.xlu1 %v2385_v3, %s3740_s12 }
0x3200   :  { %v2388_v33 = vpop.permute.xlu1 %2387 }
0x3201   :  { %v2390_v7 = vadd.f32 %v2388_v33, %v2380_v5 }
0x3203   :  { %3628 = vtanh.f32 %v2390_v7  ;;  %v2446_v38 = vrot.slane %v2390_v7, 6 }
0x3209   :  { %v3629_v9 = vpop.eup %3628 }
0x320a   :  { %2393 = vrot.lane.b32.xlu2 %v3629_v9, %s3740_s12  ;;  %v3198_v9 = vld [vmem:[#allocation8 + $0x40] sm:$0xf] }
0x3264   :  { %v2394_v11 = vpop.permute.xlu2 %2393 }
0x3265   :  { %v4263_v12 = vmul.f32 %v2394_v11, %v2374_v2  ;;  %v3374_v11 = vld [vmem:[#allocation8 + $0x4c] sm:$0xf0] }
0x3267   :  { %v2403_v39 = vpack.c.bf16 %v4263_v12, %v4263_v12 }
0x3269   :  { %v2405_v14 = vrot.slane %v2403_v39, 3  ;;  %v3199_v39 = vor.u32 %v3374_v11, %v3198_v9  ;;  %v3393_v9 = vld [vmem:[%s4394_s3 + $0x88] sm:$0xff] }
0x326b   :  { %2406 = vrot.lane.b32.xlu0 %v2405_v14, %s3734_s8  ;;  %v3200_v14 = vld [vmem:[#allocation8 + $0x50] sm:$0xf0]  ;;  %2633 = vmatpush.bf16.msra.mxu3 %v3199_v39  ;;  %v3378_v39 = vld [vmem:[%s4394_s3 + $0x10] sm:$0xff] }
0x32dd   :  { %v2407_v15 = vpop.permute.xlu0 %2406 }
0x32de   :  { %3160 = vmatmul.msk.bf16.vlgmr.msra.gmra.mxu1 %vm89_vm3, %v2407_v15  ;;  %v3206_v15 = vld [vmem:[#allocation8 + $0x48] sm:$0xf] }
0x335b   :  { %v2420_v20 = vpop.f32.mrf.mxu1 }
0x335c   :  { %v2424_v21 = vadd.f32 %v2420_v20, %v2125_v17 }
0x335e   :  { %3630 = vtanh.f32 %v2424_v21  ;;  %v3161_v23 = vmul.f32 -1.442695, %v2424_v21 }
0x3360   :  { %3632 = vpow2.f32 %v3161_v23 }
0x3363   :  { %v2422_v8 = vpop.f32.mrf.mxu1 }
0x3364   :  { %v3631_v37 = vpop.eup %3630  ;;  %v3373_v8 = vld [vmem:[#allocation8 + $0x4c] sm:$0xf] }
0x3365   :  { %2450 = vrot.lane.b32.xlu1 %v3631_v37, %s3741_s0  ;;  %v3208_v37 = vld [vmem:[#allocation8 + $0x58] sm:$0xf0] }
0x3366   :  { %v3633_v24 = vpop.eup %3632  ;;  %v3211_v23 = vor.u32 %v3373_v8, %v3208_v37  ;;  %v3376_v8 = vld [vmem:[%s4394_s3] sm:$0xff] }
0x3367   :  { %v2428_v16 = vadd.f32 1.0, %v3633_v24  ;;  %v3400_v37 = vld [vmem:[%s4394_s3 + $0xc0] sm:$0xff] }
0x3368   :  { %2672 = vmatpush.bf16.msrb.mxu2 %v3211_v23  ;;  %v2555_v23 = vld [vmem:[#allocation8 + $0x60] sm:$0x11] }
0x3369   :  { %3634 = vrcp.f32 %v2428_v16  ;;  %v2440_v30 = vand.u32 2147483648, %v2428_v16  ;;  %vm2434_vm0 = vweird.f32 %v2428_v16  ;;  %v2438_v22 = vand.u32 2147483647, %v2428_v16 }
0x336b   :  { %v2441_v32 = vor.u32 1.1754944e-38, %v2440_v30  ;;  %vm2439_vm4 = vcmp.eq.f32.partialorder %v2438_v22, 8.507059e+37  ;;  %v3190_v30 = vld [vmem:[#allocation8 + $0x28] sm:$0xf]  ;;  %v3371_v22 = vld [vmem:[#allocation8 + $0x34] sm:$0xf0] }
0x336f   :  { %v3635_v25 = vpop.eup %3634 }
0x3370   :  { %v2430_v26 = vmul.f32 %v3635_v25, %v2428_v16  ;;  %vm2435_vm10 = vweird.f32 %v3635_v25 }
0x3371   :  { %vm2436_vm1 = vmor %vm2434_vm0, %vm2435_vm10 }
0x3372   :  { %v2431_v27 = vsub.f32 1.0, %v2430_v26  ;;  %v3370_v26 = vld [vmem:[#allocation8 + $0x2c] sm:$0xf0] }
0x3374   :  { %v2432_v28 = vmul.f32 %v3635_v25, %v2431_v27  ;;  %v3368_v27 = vld [vmem:[#allocation8 + $0x24] sm:$0xf] }
0x3376   :  { %v2433_v29 = vadd.f32 %v3635_v25, %v2432_v28 }
0x3378   :  { %v2437_v31 = vsel %vm2436_vm1, %v3635_v25, %v2433_v29  ;;  %v3182_v25 = vld [vmem:[#allocation8 + $0x20] sm:$0xf]  ;;  %v3184_v29 = vld [vmem:[#allocation8 + $0x30] sm:$0xf0] }
0x3379   :  { %v2442_v36 = vsel %vm2439_vm4, %v2441_v32, %v2437_v31  ;;  %v3183_v28 = vor.u32 %v3370_v26, %v3182_v25  ;;  %v3187_v31 = vor.u32 %v3368_v27, %v3184_v29  ;;  %v3191_v32 = vor.u32 %v3371_v22, %v3190_v30 }
0x337a   :  { %v2448_v40 = vmul.f32 %v2446_v38, %v2442_v36  ;;  %v2557_v26 = vunpack.c.l.bf16 %v2555_v23 }
0x337b   :  { %2634 = vmatpush.bf16.msra.mxu3 %v3183_v28 }
0x33d7   :  { %v2451_v34 = vpop.permute.xlu1 %2450 }
0x33d8   :  { %v2453_v18 = vmul.f32 %v2451_v34, %v2442_v36  ;;  %v3369_v34 = vld [vmem:[#allocation8 + $0x2c] sm:$0xf] }
0x33da   :  { %2455 = vrot.lane.b32.xlu2 %v2453_v18, %s3740_s12  ;;  %v3166_v18 = vld [vmem:[#allocation8] sm:$0xf] }
0x3434   :  { %v2456_v41 = vpop.permute.xlu2 %2455 }
0x3435   :  { %v2458_v43 = vadd.f32 %v2456_v41, %v2448_v40  ;;  %v3366_v40 = vld [vmem:[#allocation8 + $0xc] sm:$0xf0]  ;;  %v3364_v41 = vld [vmem:[#allocation8 + $0x4] sm:$0xf] }
0x3437   :  { %3636 = vtanh.f32 %v2458_v43  ;;  %v2516_v2 = vrot.slane %v2458_v43, 6  ;;  %v3168_v43 = vld [vmem:[#allocation8 + $0x10] sm:$0xf0] }
0x343d   :  { %v3637_v44 = vpop.eup %3636 }
0x343e   :  { %2461 = vrot.lane.b32.xlu0 %v3637_v44, %s3740_s12  ;;  %v3167_v44 = vor.u32 %v3366_v40, %v3166_v18 }
0x3440   :  { %2635 = vmatpush.bf16.msra.mxu3 %v3167_v44 }
0x34b0   :  { %v2462_v45 = vpop.permute.xlu0 %2461 }
0x34b1   :  { %v2464_v46 = vmul.f32 %v2462_v45, %v2442_v36  ;;  %v3192_v36 = vld [vmem:[#allocation8 + $0x38] sm:$0xf0]  ;;  %v3171_v45 = vor.u32 %v3364_v41, %v3168_v43 }
0x34b2   :  { %v3195_v38 = vor.u32 %v3369_v34, %v3192_v36 }
0x34b3   :  { %v2471_v48 = vpack.c.bf16 %v2464_v46, %v2464_v46 }
0x34b4   :  { %2673 = vmatpush.bf16.msrb.mxu2 %v3195_v38 }
0x34b5   :  { %2473 = vrot.lane.b32.xlu1 %v2471_v48, %s3734_s8  ;;  %v3367_v48 = vld [vmem:[#allocation8 + $0x14] sm:$0xf0] }
0x3527   :  { %v2474_v49 = vpop.permute.xlu1 %2473 }
0x3528   :  { %3162 = vmatmul.msk.bf16.vlgmr.msra.gmra.mxu2 %vm89_vm3, %v2474_v49  ;;  %v3365_v49 = vld [vmem:[#allocation8 + $0xc] sm:$0xf] }
0x35ab   :  { %v2487_v51 = vpop.f32.mrf.mxu2 }
0x35ac   :  { %v2492_v52 = vrot.slane %v2487_v51, 6 }
0x35ae   :  { %v2494_v35 = vadd.f32 %v2492_v52, %v2125_v17  ;;  %v3375_v17 = vld [vmem:[#allocation8 + $0x54] sm:$0xf0]  ;;  %v3176_v52 = vld [vmem:[#allocation8 + $0x18] sm:$0xf0] }
0x35af   :  { %v3207_v21 = vor.u32 %v3375_v17, %v3206_v15  ;;  %v3384_v15 = vld [vmem:[%s4394_s3 + $0x40] sm:$0xff] }
0x35b0   :  { %3638 = vtanh.f32 %v2494_v35  ;;  %v3163_v54 = vmul.f32 -1.442695, %v2494_v35  ;;  %v3179_v35 = vor.u32 %v3365_v49, %v3176_v52  ;;  %v3392_v17 = vld [vmem:[%s4394_s3 + $0x80] sm:$0xff] }
0x35b1   :  { %2659 = vmatpush.bf16.msrb.mxu1 %v3207_v21  ;;  %v3401_v21 = vld [vmem:[%s4394_s3 + $0xc8] sm:$0xff] }
0x35b2   :  { %3640 = vpow2.f32 %v3163_v54  ;;  %2674 = vmatpush.bf16.msrb.mxu2 %v3179_v35  ;;  %v3383_v54 = vld [vmem:[%s4394_s3 + $0x38] sm:$0xff]  ;;  %v2748_v35 = vld [vmem:[%s4394_s3 + $0x100] sm:$0x1] }
0x35b3   :  { %v2489_v10 = vpop.f32.mrf.mxu2  ;;  %2943 = vmatpush.bf16.msrb.mxu3 %v3383_v54 }
0x35b4   :  { %v3391_v10 = vld [vmem:[%s4394_s3 + $0x78] sm:$0xff] }
0x35b5   :  { %2660 = vmatpush.bf16.msrb.mxu1 %v3191_v32  ;;  %v2561_v32 = vperm.slane %v2557_v26, 0 }
0x35b6   :  { %v3639_v53 = vpop.eup %3638 }
0x35b7   :  { %2520 = vrot.lane.b32.xlu2 %v3639_v53, %s3741_s0  ;;  %v3399_v53 = vld [vmem:[%s4394_s3 + $0xb8] sm:$0xff] }
0x35b8   :  { %v3641_v0 = vpop.eup %3640 }
0x35b9   :  { %v2498_v60 = vadd.f32 1.0, %v3641_v0  ;;  %v3407_v0 = vld [vmem:[%s4394_s3 + $0xf8] sm:$0xff] }
0x35ba   :  { %2982 = vmatpush.bf16.msra.mxu2 %v3407_v0 }
0x35bb   :  { %3642 = vrcp.f32 %v2498_v60  ;;  %v2510_v56 = vand.u32 2147483648, %v2498_v60  ;;  %vm2504_vm5 = vweird.f32 %v2498_v60  ;;  %v2508_v55 = vand.u32 2147483647, %v2498_v60 }
0x35bd   :  { %v2511_v61 = vor.u32 1.1754944e-38, %v2510_v56  ;;  %vm2509_vm11 = vcmp.eq.f32.partialorder %v2508_v55, 8.507059e+37  ;;  %v3381_v56 = vld [vmem:[%s4394_s3 + $0x28] sm:$0xff] }
0x35be   :  { %v3405_v55 = vld [vmem:[%s4394_s3 + $0xe8] sm:$0xff] }
0x35bf   :  { %2190 = vrot.lane.b32.xlu2 %v4233_v50, %s3734_s8 }
0x35c1   :  { %v3643_v1 = vpop.eup %3642 }
0x35c2   :  { %v2500_v42 = vmul.f32 %v3643_v1, %v2498_v60  ;;  %vm2505_vm3 = vweird.f32 %v3643_v1  ;;  %v3390_v60 = vld [vmem:[%s4394_s3 + $0x70] sm:$0xff] }
0x35c3   :  { %vm2506_vm6 = vmor %vm2504_vm5, %vm2505_vm3 }
0x35c4   :  { %v2501_v19 = vsub.f32 1.0, %v2500_v42  ;;  %v3382_v42 = vld [vmem:[%s4394_s3 + $0x30] sm:$0xff] }
0x35c5   :  { %2944 = vmatpush.bf16.msrb.mxu3 %v3382_v42 }
0x35c6   :  { %v2502_v63 = vmul.f32 %v3643_v1, %v2501_v19  ;;  %v3406_v19 = vld [vmem:[%s4394_s3 + $0xf0] sm:$0xff] }
0x35c7   :  { %2466 = vrot.lane.b32.xlu2 %v2464_v46, %s3729_s6  ;;  %s3743_s6 = smov 24   ;;  %v3174_v46 = vld [vmem:[#allocation8 + $0x8] sm:$0xf]  ;;  %2983 = vmatpush.bf16.msra.mxu2 %v3406_v19 }
0x35c8   :  { %v2503_v58 = vadd.f32 %v3643_v1, %v2502_v63  ;;  %v3175_v51 = vor.u32 %v3367_v48, %v3174_v46  ;;  %v3389_v63 = vld [vmem:[%s4394_s3 + $0x68] sm:$0xff] }
0x35c9   :  { %2945 = vmatpush.bf16.msrb.mxu3 %v3381_v56 }
0x35ca   :  { %v2507_v57 = vsel %vm2506_vm6, %v3643_v1, %v2503_v58  ;;  %2661 = vmatpush.bf16.msrb.mxu1 %v3175_v51  ;;  %v3398_v1 = vld [vmem:[%s4394_s3 + $0xb0] sm:$0xff]  ;;  %v3397_v58 = vld [vmem:[%s4394_s3 + $0xa8] sm:$0xff] }
0x35cb   :  { %v2512_v4 = vsel %vm2509_vm11, %v2511_v61, %v2507_v57  ;;  %v3388_v57 = vld [vmem:[%s4394_s3 + $0x60] sm:$0xff]  ;;  %2984 = vmatpush.bf16.msra.mxu2 %v3405_v55 }
0x35cc   :  { %v2518_v3 = vmul.f32 %v2516_v2, %v2512_v4  ;;  %v3396_v61 = vld [vmem:[%s4394_s3 + $0xa0] sm:$0xff]  ;;  %v3379_v2 = vld [vmem:[%s4394_s3 + $0x18] sm:$0xff] }
0x35ce   :  { %2969 = vmatpush.bf16.msra.mxu1 %v3399_v53 }
0x35d2   :  { %2970 = vmatpush.bf16.msra.mxu1 %v3398_v1 }
0x35d6   :  { %2971 = vmatpush.bf16.msra.mxu1 %v3397_v58 }
0x35da   :  { %2972 = vmatpush.bf16.msra.mxu1 %v3396_v61 }
0x3611   :  { %v2521_v50 = vpop.permute.xlu2 %2520 }
0x3612   :  { %v2523_v59 = vmul.f32 %v2521_v50, %v2512_v4  ;;  %v3380_v50 = vld [vmem:[%s4394_s3 + $0x20] sm:$0xff] }
0x3613   :  { %2946 = vmatpush.bf16.msrb.mxu3 %v3380_v50 }
0x3614   :  { %2525 = vrot.lane.b32.xlu0 %v2523_v59, %s3740_s12  ;;  %v3387_v59 = vld [vmem:[%s4394_s3 + $0x58] sm:$0xff] }
0x3617   :  { %2947 = vmatpush.bf16.msrb.mxu3 %v3379_v2 }
0x3619   :  { %v2191_v62 = vpop.permute.xlu2 %2190 }
0x361a   :  { %2194 = vst.msk [vmem:[#allocation4] sm:$0x3] %vm2193_vm7, %v2191_v62  ;;  %v3395_v62 = vld [vmem:[%s4394_s3 + $0x98] sm:$0xff] }
0x361b   :  { %2973 = vmatpush.bf16.msra.mxu1 %v3395_v62  ;;  %2948 = vmatpush.bf16.msrb.mxu3 %v3378_v39 }
0x361c   :  { %2260 = vrot.lane.b32.xlu0 %v4243_v13, %s3742_s4  ;;  %v3372_v13 = vld [vmem:[#allocation8 + $0x44] sm:$0xf] }
0x361d   :  { %v3203_v20 = vor.u32 %v3372_v13, %v3200_v14  ;;  %v3402_v14 = vld [vmem:[%s4394_s3 + $0xd0] sm:$0xff] }
0x361f   :  { %2646 = vmatpush.bf16.msrb.mxu0 %v3203_v20  ;;  %v3377_v20 = vld [vmem:[%s4394_s3 + $0x8] sm:$0xff] }
0x3620   :  { %2949 = vmatpush.bf16.msrb.mxu3 %v3377_v20 }
0x3621   :  { %v2467_v16 = vpop.permute.xlu2 %2466 }
0x3623   :  { %2647 = vmatpush.bf16.msrb.mxu0 %v3187_v31 }
0x3624   :  { %2950 = vmatpush.bf16.msrb.mxu3 %v3376_v8 }
0x3627   :  { %2648 = vmatpush.bf16.msrb.mxu0 %v3171_v45 }
0x362b   :  { %2956 = vmatpush.bf16.msra.mxu0 %v3391_v10  ;;  %v2749_v10 = vunpack.c.l.bf16 %v2748_v35 }
0x362d   :  { %v2750_v0 = vperm.slane %v2749_v10, 0 }
0x362f   :  { %2957 = vmatpush.bf16.msra.mxu0 %v3390_v60 }
0x3633   :  { %2958 = vmatpush.bf16.msra.mxu0 %v3389_v63 }
0x3637   :  { %2959 = vmatpush.bf16.msra.mxu0 %v3388_v57 }
0x363b   :  { %2960 = vmatpush.bf16.msra.mxu0 %v3387_v59 }
0x3686   :  { %v2526_v6 = vpop.permute.xlu0 %2525 }
0x3687   :  { %v2528_v5 = vadd.f32 %v2526_v6, %v2518_v3  ;;  %v3403_v3 = vld [vmem:[%s4394_s3 + $0xd8] sm:$0xff]  ;;  %v3386_v6 = vld [vmem:[%s4394_s3 + $0x50] sm:$0xff] }
0x3688   :  { %2961 = vmatpush.bf16.msra.mxu0 %v3386_v6 }
0x3689   :  { %3644 = vtanh.f32 %v2528_v5  ;;  %v3394_v5 = vld [vmem:[%s4394_s3 + $0x90] sm:$0xff] }
0x368a   :  { %2974 = vmatpush.bf16.msra.mxu1 %v3394_v5 }
0x368e   :  { %v2261_v33 = vpop.permute.xlu0 %2260  ;;  %2975 = vmatpush.bf16.msra.mxu1 %v3393_v9 }
0x368f   :  { %v3645_v7 = vpop.eup %3644  ;;  %2264 = vst.msk [vmem:[#allocation4 - $0x2] sm:$0xc] %vm2263_vm8, %v2261_v33 }
0x3690   :  { %2531 = vrot.lane.b32.xlu1 %v3645_v7, %s3740_s12  ;;  %2331 = vst.msk [vmem:[#allocation4 - $0x4] sm:$0x30] %vm2330_vm13, %v4253_v47  ;;  %v3385_v7 = vld [vmem:[%s4394_s3 + $0x48] sm:$0xff] }
0x3691   :  { %2962 = vmatpush.bf16.msra.mxu0 %v3385_v7 }
0x3692   :  { %2976 = vmatpush.bf16.msra.mxu1 %v3392_v17 }
0x3695   :  { %2963 = vmatpush.bf16.msra.mxu0 %v3384_v15 }
0x3698   :  { %2398 = vrot.lane.b32.xlu1 %v4263_v12, %s3740_s12 }
0x3702   :  { %v2532_v47 = vpop.permute.xlu1 %2531 }
0x3703   :  { %v2534_v24 = vmul.f32 %v2532_v47, %v2512_v4  ;;  %v3404_v4 = vld [vmem:[%s4394_s3 + $0xe0] sm:$0xff]  ;;  %v2556_v47 = vld [vmem:[#allocation8 + $0x68] sm:$0x11] }
0x3704   :  { %2985 = vmatpush.bf16.msra.mxu2 %v3404_v4  ;;  %v2560_v28 = vunpack.c.h.bf16 %v2556_v47 }
0x3705   :  { %2536 = vrot.lane.b32.xlu0 %v2534_v24, %s3743_s6  ;;  %v2558_v24 = vunpack.c.h.bf16 %v2555_v23 }
0x3706   :  { %v2564_v36 = vperm.slane %v2560_v28, 0 }
0x3708   :  { %2986 = vmatpush.bf16.msra.mxu2 %v3403_v3 }
0x370a   :  { %v2399_v12 = vpop.permute.xlu1 %2398 }
0x370b   :  { %2402 = vst.msk [vmem:[#allocation4 - $0x6] sm:$0xc0] %vm2401_vm14, %v2399_v12  ;;  %v2559_v12 = vunpack.c.l.bf16 %v2556_v47 }
0x370c   :  { %2470 = vst.msk [vmem:[#allocation4] sm:$0x3] %vm2469_vm15, %v2467_v16  ;;  %2987 = vmatpush.bf16.msra.mxu2 %v3402_v14  ;;  %v2562_v16 = vperm.slane %v2558_v24, 0 }
0x370d   :  { %v2563_v25 = vperm.slane %v2559_v12, 0 }
0x3710   :  { %2988 = vmatpush.bf16.msra.mxu2 %v3401_v21 }
0x3714   :  { %2989 = vmatpush.bf16.msra.mxu2 %v3400_v37 }
0x3777   :  { %v2537_v33 = vpop.permute.xlu0 %2536 }
0x3778   :  { %2540 = vst.msk [vmem:[#allocation4 - $0x2] sm:$0xc] %vm2539_vm2, %v2537_v33 }
0x377f   :  { %v2541_v11 = vld [vmem:[#allocation4] sm:$0x3] }
0x3780   :  { %v2554_v13 = vpack.c.bf16 %v2541_v11, %v2541_v11 }
0x3782   :  { %3212 = vmatmul.msk.bf16.vlgmr.msra.gmra.mxu3 %vm1152_vm12, %v2554_v13  ;;  %3213 = vmatmul.msk.bf16.vlgmr.msrb.gmra.mxu0 %vm1152_vm12, %v2554_v13 }
0x3783   :  { %3214 = vmatmul.msk.bf16.vlgmr.msrb.gmra.mxu1 %vm1152_vm12, %v2554_v13  ;;  %3215 = vmatmul.msk.bf16.vlgmr.msrb.gmra.mxu2 %vm1152_vm12, %v2554_v13  ;;  %vm2995_vm12 = vcmask 33792  }
0x37ff   :  { %v2650_v27 = vpop.f32.mrf.mxu0 }
0x3800   :  { %v2651_v29 = vadd.f32 %v2650_v27, %v2562_v16  ;;  %v2663_v30 = vpop.f32.mrf.mxu1 }
0x3801   :  { %v2664_v22 = vadd.f32 %v2663_v30, %v2563_v25 }
0x3802   :  { %v2745_v31 = vpack.c.bf16 %v2651_v29, %v2651_v29 }
0x3803   :  { %v2746_v34 = vpack.c.bf16 %v2664_v22, %v2664_v22 }
0x3804   :  { %2964 = vmatmul.bf16.vlgmr.msra.gmra.mxu0 %v2745_v31 }
0x3805   :  { %2977 = vmatmul.bf16.vlgmr.msra.gmra.mxu1 %v2746_v34  ;;  %v2637_v18 = vpop.f32.mrf.mxu3 }
0x3806   :  { %v2638_v38 = vadd.f32 %v2637_v18, %v2561_v32  ;;  %v2676_v40 = vpop.f32.mrf.mxu2 }
0x3807   :  { %v2677_v41 = vadd.f32 %v2676_v40, %v2564_v36  ;;  %v2652_v43 = vpop.f32.mrf.mxu0 }
0x3808   :  { %v2744_v44 = vpack.c.bf16 %v2638_v38, %v2638_v38  ;;  %v2665_v45 = vpop.f32.mrf.mxu1 }
0x3809   :  { %v2747_v46 = vpack.c.bf16 %v2677_v41, %v2677_v41 }
0x380a   :  { %2951 = vmatmul.bf16.vlgmr.msrb.gmra.mxu3 %v2744_v44 }
0x380b   :  { %2990 = vmatmul.bf16.vlgmr.msra.gmra.mxu2 %v2747_v46 }
0x380d   :  { %v2639_v48 = vpop.f32.mrf.mxu3 }
0x380e   :  { %v2678_v49 = vpop.f32.mrf.mxu2 }
0x3881   :  { %v2965_v51 = vpop.f32.mrf.mxu0 }
0x3882   :  { %v2978_v52 = vpop.f32.mrf.mxu1 }
0x3889   :  { %v2967_v53 = vpop.f32.mrf.mxu0 }
0x388a   :  { %v2980_v54 = vpop.f32.mrf.mxu1 }
0x388d   :  { %v2952_v60 = vpop.f32.mrf.mxu3 }
0x388e   :  { %v2953_v1 = vadd.f32 %v2952_v60, %v2750_v0  ;;  %v2991_v42 = vpop.f32.mrf.mxu2 }
0x3890   :  { %v2966_v19 = vadd.f32 %v2965_v51, %v2953_v1 }
0x3892   :  { %v2979_v63 = vadd.f32 %v2978_v52, %v2966_v19 }
0x3894   :  { %v2992_v58 = vadd.f32 %v2991_v42, %v2979_v63 }
0x3895   :  { %v2954_v56 = vpop.f32.mrf.mxu3 }
0x3896   :  { %v2993_v55 = vpop.f32.mrf.mxu2  ;;  %2996 = vst.msk [vmem:[#allocation10] sm:$0x3] %vm2995_vm12, %v2992_v58 }
0x3897   :  { %3007 = dma.vmem_to_hbm [thread:$0]  %s3003_s22, 32, %s3005_s25, [#allocation7]  }
0x3898   :  { %3722 = dma.done.wait [#allocation7], 32  }
0x3899   :  { %3723 = vsyncadd [#allocation7], 4294967264 }
0x389a   :  { %3012 = vsyncpa [#allocation6], 1 }
0x389b   :  { %3013 = vsyncpa [#allocation9], 1 }
0x389c   :  { %3014 = vsyncpa [#allocation7], 1 }

</bundles_post_ra>
